<compile_context>
chip_gen: v6e
topology: v6e:2x2x1
jax: 0.10.0
libtpu: 0.0.40
codegen_flags: <defaults>
</compile_context>

<pallas_src>
import functools
import math

import jax
import jax.numpy as jnp
from jax.experimental import pallas as pl
from jax.experimental.pallas import tpu as pltpu

_LANES = 128
_GOLDEN = 0x9E3779B9  # golden-ratio constant for stream separation


def _mix32(x):
    """murmur3 fmix32 finalizer: strong 32-bit avalanche mixer (elementwise)."""
    x = x ^ (x >> 16)
    x = x * jnp.uint32(0x85EBCA6B)
    x = x ^ (x >> 13)
    x = x * jnp.uint32(0xC2B2AE35)
    x = x ^ (x >> 16)
    return x


def _gaussian_dropout_kernel(seed_ref, x_ref, o_ref, *, alpha, tile_rows, width):
    shape = x_ref.shape
    pid = pl.program_id(0)
    seed = seed_ref[0].astype(jnp.uint32)

    # Global element index of every element in this tile (counter for the RNG).
    # Deterministic per element regardless of tiling / core assignment.
    row = jax.lax.broadcasted_iota(jnp.int32, shape, 0)
    col = jax.lax.broadcasted_iota(jnp.int32, shape, 1)
    gidx = ((pid * tile_rows + row) * width + col).astype(jnp.uint32)

    # Two decorrelated 32-bit streams per element.
    b1 = _mix32(gidx + seed * jnp.uint32(_GOLDEN) + jnp.uint32(1))
    b2 = _mix32(b1 ^ jnp.uint32(_GOLDEN))

    # Uniforms: u1 in (0, 1) (never 0 -> log is finite), u2 in [0, 1).
    inv24 = jnp.float32(1.0 / 16777216.0)
    u1 = ((b1 >> 8).astype(jnp.float32) + jnp.float32(0.5)) * inv24
    u2 = (b2 >> 8).astype(jnp.float32) * inv24

    # Box-Muller -> standard normal z, then eps ~ N(1, alpha^2).
    r = jnp.sqrt(jnp.float32(-2.0) * jnp.log(u1))
    theta = jnp.float32(2.0 * math.pi) * u2
    z = r * jnp.cos(theta)
    eps = z * jnp.float32(alpha) + jnp.float32(1.0)

    o_ref[...] = (x_ref[...].astype(jnp.float32) * eps).astype(o_ref.dtype)


def gaussian_dropout(x, seed: int, alpha: float = 1.0):
    """x * eps, eps ~ N(1, alpha^2). Matches GaussianDropout.forward (training)."""
    orig_shape = x.shape
    orig_dtype = x.dtype
    total = x.size

    # Widest lane-dense slab width that divides the flattened size -> no
    # materialized padding pass, wide unmasked stores.
    width = None
    for w in (2048, 1024, 512, 256, 128):
        if total % w == 0:
            width = w
            break
    x_flat = x.reshape(-1)
    if width is None:  # ragged fallback: pad up to one lane group
        width = _LANES
        pad = (-total) % width
        x_flat = jnp.concatenate([x_flat, jnp.zeros((pad,), dtype=orig_dtype)])
    padded_total = x_flat.size
    rows = padded_total // width

    # <= 256 x 2048 x 4B = 2 MiB per block: 2 (in+out) x 2 buffers = 8 MiB,
    # fits default scoped VMEM on v5e (16 MiB), v6e and v7x (32 MiB).
    tile_rows = min(rows, 256)
    grid = (pl.cdiv(rows, tile_rows),)

    x2 = x_flat.reshape(rows, width)
    seed_arr = jnp.asarray([seed], dtype=jnp.int32)
    kernel = functools.partial(
        _gaussian_dropout_kernel,
        alpha=float(alpha), tile_rows=tile_rows, width=width)

    out2 = pl.pallas_call(
        kernel,
        out_shape=jax.ShapeDtypeStruct((rows, width), orig_dtype),
        grid_spec=pltpu.PrefetchScalarGridSpec(
            num_scalar_prefetch=1,  # seed lands in SMEM
            grid=grid,
            in_specs=[pl.BlockSpec((tile_rows, width), lambda i, seed: (i, 0))],
            out_specs=pl.BlockSpec((tile_rows, width), lambda i, seed: (i, 0)),
        ),
        compiler_params=pltpu.CompilerParams(
            dimension_semantics=("parallel",),  # counter-based RNG -> tiles independent
        ),
    )(seed_arr, x2)

    out_flat = out2.reshape(-1)
    if padded_total != total:
        out_flat = out_flat[:total]
    return out_flat.reshape(orig_shape)


if __name__ == "__main__":
    key = jax.random.PRNGKey(0)
    # NCHW, matching the PyTorch convention: batch=2, channels=4, spatial=16.
    x = jax.random.normal(key, (2, 4, 16, 16), dtype=jnp.float32)

    alpha = 1.0
    y = jax.block_until_ready(gaussian_dropout(x, seed=0, alpha=alpha))

    assert y.shape == x.shape
    assert y.dtype == x.dtype
    assert bool(jnp.all(jnp.isfinite(y)))

    # Noise must actually be applied.
    assert not bool(jnp.allclose(y, x))

    # Pure multiplicative noise: zero inputs stay exactly zero.
    x0 = x.at[0, 0, 0, :].set(0.0)
    y0 = jax.block_until_ready(gaussian_dropout(x0, seed=1, alpha=alpha))
    assert bool(jnp.all(y0[0, 0, 0, :] == 0.0))

    # Loose statistical sanity: recovered eps = y / x should be ~ N(1, alpha^2).
    eps = (y / x).reshape(-1)
    m = float(jnp.mean(eps))
    s = float(jnp.std(eps))
    assert 0.7 < m < 1.3, m
    assert 0.7 < s < 1.4, s

    print("KERNEL_OK")
</pallas_src>

<mosaic_0001>
module attributes {stable_mosaic.version = 11 : i64} {
  func.func @_gaussian_dropout_kernel(%arg0: i32, %arg1: memref<1xi32, #tpu.memory_space<smem>>, %arg2: memref<1x2048xf32, #tpu.memory_space<vmem>>, %arg3: memref<1x2048xf32, #tpu.memory_space<vmem>>) attributes {dimension_semantics = [#tpu.dimension_semantics<parallel>], iteration_bounds = array<i64: 1>, scalar_prefetch = 1 : i64, scratch_operands = 0 : i64, tpu.core_type = #tpu.core_type<tc>, window_params = [{transform_indices = @transform_0, window_bounds = array<i64: 1, 2048>}, {transform_indices = @transform_1, window_bounds = array<i64: 1, 2048>}]} {
    %c0 = arith.constant 0 : index
    %0 = memref.load %arg1[%c0] : memref<1xi32, #tpu.memory_space<smem>>
    %1 = tpu.iota {dimensions = array<i32: 0>} : vector<1x2048xi32>
    %2 = tpu.iota {dimensions = array<i32: 1>} : vector<1x2048xi32>
    %c1_i32 = arith.constant 1 : i32
    %3 = arith.muli %arg0, %c1_i32 : i32
    %4 = vector.broadcast %3 : i32 to vector<1x2048xi32>
    %5 = arith.addi %4, %1 : vector<1x2048xi32>
    %c2048_i32 = arith.constant 2048 : i32
    %6 = vector.broadcast %c2048_i32 : i32 to vector<1x2048xi32>
    %7 = arith.muli %5, %6 : vector<1x2048xi32>
    %8 = arith.addi %7, %2 : vector<1x2048xi32>
    %c-1640531527_i32 = arith.constant -1640531527 : i32
    %9 = arith.muli %0, %c-1640531527_i32 : i32
    %10 = vector.broadcast %9 : i32 to vector<1x2048xi32>
    %11 = arith.addi %8, %10 : vector<1x2048xi32>
    %c1_i32_0 = arith.constant 1 : i32
    %12 = vector.broadcast %c1_i32_0 : i32 to vector<1x2048xi32>
    %13 = arith.addi %11, %12 : vector<1x2048xi32>
    %c16_i32 = arith.constant 16 : i32
    %14 = vector.broadcast %c16_i32 : i32 to vector<1x2048xi32>
    %15 = arith.shrui %13, %14 : vector<1x2048xi32>
    %16 = arith.xori %13, %15 : vector<1x2048xi32>
    %c-2048144789_i32 = arith.constant -2048144789 : i32
    %17 = vector.broadcast %c-2048144789_i32 : i32 to vector<1x2048xi32>
    %18 = arith.muli %16, %17 : vector<1x2048xi32>
    %c13_i32 = arith.constant 13 : i32
    %19 = vector.broadcast %c13_i32 : i32 to vector<1x2048xi32>
    %20 = arith.shrui %18, %19 : vector<1x2048xi32>
    %21 = arith.xori %18, %20 : vector<1x2048xi32>
    %c-1028477387_i32 = arith.constant -1028477387 : i32
    %22 = vector.broadcast %c-1028477387_i32 : i32 to vector<1x2048xi32>
    %23 = arith.muli %21, %22 : vector<1x2048xi32>
    %c16_i32_1 = arith.constant 16 : i32
    %24 = vector.broadcast %c16_i32_1 : i32 to vector<1x2048xi32>
    %25 = arith.shrui %23, %24 : vector<1x2048xi32>
    %26 = arith.xori %23, %25 : vector<1x2048xi32>
    %c-1640531527_i32_2 = arith.constant -1640531527 : i32
    %27 = vector.broadcast %c-1640531527_i32_2 : i32 to vector<1x2048xi32>
    %28 = arith.xori %26, %27 : vector<1x2048xi32>
    %c16_i32_3 = arith.constant 16 : i32
    %29 = vector.broadcast %c16_i32_3 : i32 to vector<1x2048xi32>
    %30 = arith.shrui %28, %29 : vector<1x2048xi32>
    %31 = arith.xori %28, %30 : vector<1x2048xi32>
    %c-2048144789_i32_4 = arith.constant -2048144789 : i32
    %32 = vector.broadcast %c-2048144789_i32_4 : i32 to vector<1x2048xi32>
    %33 = arith.muli %31, %32 : vector<1x2048xi32>
    %c13_i32_5 = arith.constant 13 : i32
    %34 = vector.broadcast %c13_i32_5 : i32 to vector<1x2048xi32>
    %35 = arith.shrui %33, %34 : vector<1x2048xi32>
    %36 = arith.xori %33, %35 : vector<1x2048xi32>
    %c-1028477387_i32_6 = arith.constant -1028477387 : i32
    %37 = vector.broadcast %c-1028477387_i32_6 : i32 to vector<1x2048xi32>
    %38 = arith.muli %36, %37 : vector<1x2048xi32>
    %c16_i32_7 = arith.constant 16 : i32
    %39 = vector.broadcast %c16_i32_7 : i32 to vector<1x2048xi32>
    %40 = arith.shrui %38, %39 : vector<1x2048xi32>
    %41 = arith.xori %38, %40 : vector<1x2048xi32>
    %c8_i32 = arith.constant 8 : i32
    %42 = vector.broadcast %c8_i32 : i32 to vector<1x2048xi32>
    %43 = arith.shrui %26, %42 : vector<1x2048xi32>
    %44 = arith.uitofp %43 : vector<1x2048xi32> to vector<1x2048xf32>
    %cst = arith.constant 5.000000e-01 : f32
    %45 = vector.broadcast %cst : f32 to vector<1x2048xf32>
    %46 = arith.addf %44, %45 : vector<1x2048xf32>
    %cst_8 = arith.constant 5.96046448E-8 : f32
    %47 = vector.broadcast %cst_8 : f32 to vector<1x2048xf32>
    %48 = arith.mulf %46, %47 : vector<1x2048xf32>
    %c8_i32_9 = arith.constant 8 : i32
    %49 = vector.broadcast %c8_i32_9 : i32 to vector<1x2048xi32>
    %50 = arith.shrui %41, %49 : vector<1x2048xi32>
    %51 = arith.uitofp %50 : vector<1x2048xi32> to vector<1x2048xf32>
    %cst_10 = arith.constant 5.96046448E-8 : f32
    %52 = vector.broadcast %cst_10 : f32 to vector<1x2048xf32>
    %53 = arith.mulf %51, %52 : vector<1x2048xf32>
    %54 = math.log %48 : vector<1x2048xf32>
    %cst_11 = arith.constant -2.000000e+00 : f32
    %55 = vector.broadcast %cst_11 : f32 to vector<1x2048xf32>
    %56 = arith.mulf %55, %54 : vector<1x2048xf32>
    %57 = math.sqrt %56 : vector<1x2048xf32>
    %cst_12 = arith.constant 6.28318548 : f32
    %58 = vector.broadcast %cst_12 : f32 to vector<1x2048xf32>
    %59 = arith.mulf %58, %53 : vector<1x2048xf32>
    %60 = math.cos %59 : vector<1x2048xf32>
    %61 = arith.mulf %57, %60 : vector<1x2048xf32>
    %cst_13 = arith.constant 1.000000e+00 : f32
    %62 = vector.broadcast %cst_13 : f32 to vector<1x2048xf32>
    %63 = arith.mulf %61, %62 : vector<1x2048xf32>
    %cst_14 = arith.constant 1.000000e+00 : f32
    %64 = vector.broadcast %cst_14 : f32 to vector<1x2048xf32>
    %65 = arith.addf %63, %64 : vector<1x2048xf32>
    %c0_15 = arith.constant 0 : index
    %c0_16 = arith.constant 0 : index
    %66 = vector.load %arg2[%c0_15, %c0_16] : memref<1x2048xf32, #tpu.memory_space<vmem>>, vector<1x2048xf32>
    %67 = arith.mulf %66, %65 : vector<1x2048xf32>
    %c0_17 = arith.constant 0 : index
    %c0_18 = arith.constant 0 : index
    %68 = vector.load %arg3[%c0_17, %c0_18] : memref<1x2048xf32, #tpu.memory_space<vmem>>, vector<1x2048xf32>
    tpu.vector_store %arg3[%c0_17, %c0_18], %67 {strides = array<i32>} : memref<1x2048xf32, #tpu.memory_space<vmem>>, vector<1x2048xf32>,
    return
  }
  func.func @transform_0(%arg0: i32, %arg1: memref<1xi32, #tpu.memory_space<smem>>) -> (i32, i32) {
    %c0_i32 = arith.constant 0 : i32
    %c0_i32_0 = arith.constant 0 : i32
    return %arg0, %c0_i32 : i32, i32
  }
  func.func @transform_1(%arg0: i32, %arg1: memref<1xi32, #tpu.memory_space<smem>>) -> (i32, i32) {
    %c0_i32 = arith.constant 0 : i32
    %c0_i32_0 = arith.constant 0 : i32
    return %arg0, %c0_i32 : i32, i32
  }
}

</mosaic_0001>

<bundles_post_ra>
// kernel: tpu_custom_call.1
= control target key start
LH: loop header
LB: loop body
LE: loop exit
PB: predicated region body
PF: predicated region fallthrough
CT: control target
= control target key end

     0   :  { %8 = vsyncpa [#allocation5], 0  ;;  %s5154_s0 = inlined_call_operand.<no memory space> [shape: s32[1], index: 0, kind: input, shape index: {}]   ;;  %s5155_s1 = inlined_call_operand.hbm [shape: f32[1,2048], index: 1, kind: input, shape index: {}]   ;;  %s5156_s2 = inlined_call_operand.hbm [shape: f32[1,2048], index: 2, kind: output, shape index: {}]  }
   0x1   :  { %9 = vsyncpa [#allocation6], 0  ;;  %s2942_s9 = smov [#allocation4]  }
   0x2   :  { %s16_s10 = sshll.u32 %s2942_s9, 4  ;;  %s17_s10 = int_to_ptr.vmem [resolvable:$true] %s16_s10 }
   0x3   :  { %s2906_s11 = scalar_lea.vmem %s17_s10, 256  ;;  %p2911_p1 = scmp.lt.s32.totalorder %s17_s10, %s17_s10 }
   0x4   :  { %p2907_p0 = scmp.ne.s32.totalorder %s17_s10, %s2906_s11  ;;  %p2912_p2 = scmp.lt.s32.totalorder %s2906_s11, %s2906_s11 }
   0x6   :  { %p2913_p3 = por %p2912_p2, %p2911_p1 }
   0x8   :  { %p2914_p4 = pnand %p2913_p3, %p2907_p0 }
   0xa   :  { %2917 = shalt.err (!%p2914_p4)
}
   0xb   :  { %19 = dma.hbm_to_vmem [thread:$0]  %s5155_s1, 256, %s17_s10, [#allocation5]  }
   0xc   :  { %2938 = dma.done.wait [#allocation5], 256  }
   0xd   :  { %2939 = vsyncadd [#allocation5], 4294967040  ;;  %v24_v0 = vlaneseq  ;;  %s62_s16 = smul.u32 2654435769, %s5154_s0  ;;  %s2950_s0 = smov [#allocation7]  }
   0xe   :  { %s2624_s1 = sshll.u32 %s2950_s0, 4  ;;  %s2625_s1 = int_to_ptr.vmem [resolvable:$true] %s2624_s1 }
   0xf   :  { %v2969_v1 = vshrl.u32 %v24_v0, 7  ;;  %v27_v2 = vand.u32 127, %v24_v0  ;;  %v63_v11 = vstv %s62_s16  ;;  %s2918_s17 = scalar_lea.vmem %s2625_s1, 256  ;;  %p2923_p6 = scmp.lt.s32.totalorder %s2625_s1, %s2625_s1 }
  0x10   :  { %p2919_p5 = scmp.ne.s32.totalorder %s2625_s1, %s2918_s17  ;;  %p2924_p7 = scmp.lt.s32.totalorder %s2918_s17, %s2918_s17 }
  0x11   :  { %5207 = vst [vmem:[#allocation10_spill] sm:$0xff] %v2969_v1  ;;  %v28_v3 = vadd.s32 128, %v27_v2  ;;  %v45_v4 = vmul.u32 2048, %v2969_v1  ;;  %v29_v5 = vadd.s32 256, %v27_v2  ;;  %v30_v6 = vadd.s32 384, %v27_v2 }
  0x12   :  { %v31_v7 = vadd.s32 512, %v27_v2  ;;  %v32_v8 = vadd.s32 640, %v27_v2  ;;  %v33_v9 = vadd.s32 768, %v27_v2  ;;  %v34_v10 = vadd.s32 896, %v27_v2  ;;  %p2925_p8 = por %p2924_p7, %p2923_p6 }
  0x13   :  { %v35_v12 = vadd.s32 1024, %v27_v2  ;;  %v36_v13 = vadd.s32 1152, %v27_v2  ;;  %v46_v14 = vadd.s32 %v45_v4, %v27_v2  ;;  %v47_v15 = vadd.s32 %v45_v4, %v28_v3 }
  0x14   :  { %v37_v16 = vadd.s32 1280, %v27_v2  ;;  %v38_v17 = vadd.s32 1408, %v27_v2  ;;  %v48_v18 = vadd.s32 %v45_v4, %v29_v5  ;;  %v49_v19 = vadd.s32 %v45_v4, %v30_v6  ;;  %p2926_p9 = pnand %p2925_p8, %p2919_p5 }
  0x15   :  { %v39_v20 = vadd.s32 1536, %v27_v2  ;;  %v40_v21 = vadd.s32 1664, %v27_v2  ;;  %v50_v22 = vadd.s32 %v45_v4, %v31_v7  ;;  %v51_v23 = vadd.s32 %v45_v4, %v32_v8 }
  0x16   :  { %v41_v24 = vadd.s32 1792, %v27_v2  ;;  %v42_v25 = vadd.s32 1920, %v27_v2  ;;  %v52_v26 = vadd.s32 %v45_v4, %v33_v9  ;;  %v53_v27 = vadd.s32 %v45_v4, %v34_v10 }
  0x17   :  { %v54_v28 = vadd.s32 %v45_v4, %v35_v12  ;;  %v55_v29 = vadd.s32 %v45_v4, %v36_v13  ;;  %v64_v30 = vadd.s32 %v63_v11, %v46_v14  ;;  %v65_v31 = vadd.s32 %v63_v11, %v47_v15 }
  0x18   :  { %v56_v32 = vadd.s32 %v45_v4, %v37_v16  ;;  %v57_v33 = vadd.s32 %v45_v4, %v38_v17  ;;  %v66_v34 = vadd.s32 %v63_v11, %v48_v18  ;;  %v67_v35 = vadd.s32 %v63_v11, %v49_v19 }
  0x19   :  { %v58_v36 = vadd.s32 %v45_v4, %v39_v20  ;;  %v59_v37 = vadd.s32 %v45_v4, %v40_v21  ;;  %v68_v38 = vadd.s32 %v63_v11, %v50_v22  ;;  %v69_v39 = vadd.s32 %v63_v11, %v51_v23 }
  0x1a   :  { %v60_v40 = vadd.s32 %v45_v4, %v41_v24  ;;  %v61_v41 = vadd.s32 %v45_v4, %v42_v25  ;;  %v70_v42 = vadd.s32 %v63_v11, %v52_v26  ;;  %v71_v43 = vadd.s32 %v63_v11, %v53_v27 }
  0x1b   :  { %v72_v44 = vadd.s32 %v63_v11, %v54_v28  ;;  %v73_v45 = vadd.s32 %v63_v11, %v55_v29  ;;  %v80_v46 = vadd.s32 1, %v64_v30  ;;  %v81_v47 = vadd.s32 1, %v65_v31 }
  0x1c   :  { %v74_v48 = vadd.s32 %v63_v11, %v56_v32  ;;  %v75_v49 = vadd.s32 %v63_v11, %v57_v33  ;;  %v82_v50 = vadd.s32 1, %v66_v34  ;;  %v83_v51 = vadd.s32 1, %v67_v35 }
  0x1d   :  { %v76_v52 = vadd.s32 %v63_v11, %v58_v36  ;;  %v77_v53 = vadd.s32 %v63_v11, %v59_v37  ;;  %v84_v54 = vadd.s32 1, %v68_v38  ;;  %v85_v55 = vadd.s32 1, %v69_v39 }
  0x1e   :  { %v78_v56 = vadd.s32 %v63_v11, %v60_v40  ;;  %v79_v57 = vadd.s32 %v63_v11, %v61_v41  ;;  %v86_v58 = vadd.s32 1, %v70_v42  ;;  %v87_v59 = vadd.s32 1, %v71_v43 }
  0x1f   :  { %v88_v60 = vadd.s32 1, %v72_v44  ;;  %v89_v61 = vadd.s32 1, %v73_v45  ;;  %v96_v62 = vshrl.u32 %v80_v46, 16  ;;  %v97_v63 = vshrl.u32 %v81_v47, 16 }
  0x20   :  { %v90_v0 = vadd.s32 1, %v74_v48  ;;  %v91_v2 = vadd.s32 1, %v75_v49  ;;  %v98_v3 = vshrl.u32 %v82_v50, 16  ;;  %v99_v4 = vshrl.u32 %v83_v51, 16 }
  0x21   :  { %v92_v5 = vadd.s32 1, %v76_v52  ;;  %v93_v6 = vadd.s32 1, %v77_v53  ;;  %v100_v7 = vshrl.u32 %v84_v54, 16  ;;  %v101_v8 = vshrl.u32 %v85_v55, 16 }
  0x22   :  { %v94_v9 = vadd.s32 1, %v78_v56  ;;  %v95_v10 = vadd.s32 1, %v79_v57  ;;  %v102_v12 = vshrl.u32 %v86_v58, 16  ;;  %v103_v13 = vshrl.u32 %v87_v59, 16 }
  0x23   :  { %v104_v14 = vshrl.u32 %v88_v60, 16  ;;  %v105_v11 = vshrl.u32 %v89_v61, 16  ;;  %v112_v15 = vxor.u32 %v96_v62, %v80_v46  ;;  %v113_v16 = vxor.u32 %v97_v63, %v81_v47 }
  0x24   :  { %v106_v17 = vshrl.u32 %v90_v0, 16  ;;  %v107_v18 = vshrl.u32 %v91_v2, 16  ;;  %v114_v19 = vxor.u32 %v98_v3, %v82_v50  ;;  %v115_v20 = vxor.u32 %v99_v4, %v83_v51 }
  0x25   :  { %v108_v21 = vshrl.u32 %v92_v5, 16  ;;  %v109_v22 = vshrl.u32 %v93_v6, 16  ;;  %v116_v23 = vxor.u32 %v100_v7, %v84_v54  ;;  %v117_v24 = vxor.u32 %v101_v8, %v85_v55 }
  0x26   :  { %v110_v25 = vshrl.u32 %v94_v9, 16  ;;  %v111_v26 = vshrl.u32 %v95_v10, 16  ;;  %v118_v27 = vxor.u32 %v102_v12, %v86_v58  ;;  %v119_v28 = vxor.u32 %v103_v13, %v87_v59 }
  0x27   :  { %v120_v29 = vxor.u32 %v104_v14, %v88_v60  ;;  %v121_v30 = vxor.u32 %v105_v11, %v89_v61  ;;  %v128_v31 = vmul.u32 2246822507, %v112_v15  ;;  %v129_v32 = vmul.u32 2246822507, %v113_v16 }
  0x28   :  { %v122_v33 = vxor.u32 %v106_v17, %v90_v0  ;;  %v123_v34 = vxor.u32 %v107_v18, %v91_v2  ;;  %v130_v35 = vmul.u32 2246822507, %v114_v19  ;;  %v131_v36 = vmul.u32 2246822507, %v115_v20 }
  0x29   :  { %v124_v37 = vxor.u32 %v108_v21, %v92_v5  ;;  %v125_v38 = vxor.u32 %v109_v22, %v93_v6  ;;  %v132_v39 = vmul.u32 2246822507, %v116_v23  ;;  %v133_v40 = vmul.u32 2246822507, %v117_v24 }
  0x2a   :  { %v126_v41 = vxor.u32 %v110_v25, %v94_v9  ;;  %v127_v42 = vxor.u32 %v111_v26, %v95_v10  ;;  %v134_v43 = vmul.u32 2246822507, %v118_v27  ;;  %v135_v44 = vmul.u32 2246822507, %v119_v28 }
  0x2b   :  { %v136_v45 = vmul.u32 2246822507, %v120_v29  ;;  %v137_v46 = vmul.u32 2246822507, %v121_v30  ;;  %v144_v47 = vshrl.u32 %v128_v31, 13  ;;  %v145_v48 = vshrl.u32 %v129_v32, 13 }
  0x2c   :  { %v138_v49 = vmul.u32 2246822507, %v122_v33  ;;  %v139_v50 = vmul.u32 2246822507, %v123_v34  ;;  %v146_v51 = vshrl.u32 %v130_v35, 13  ;;  %v147_v52 = vshrl.u32 %v131_v36, 13 }
  0x2d   :  { %v140_v53 = vmul.u32 2246822507, %v124_v37  ;;  %v141_v54 = vmul.u32 2246822507, %v125_v38  ;;  %v148_v55 = vshrl.u32 %v132_v39, 13  ;;  %v149_v56 = vshrl.u32 %v133_v40, 13 }
  0x2e   :  { %v142_v57 = vmul.u32 2246822507, %v126_v41  ;;  %v143_v58 = vmul.u32 2246822507, %v127_v42  ;;  %v150_v59 = vshrl.u32 %v134_v43, 13  ;;  %v151_v60 = vshrl.u32 %v135_v44, 13 }
  0x2f   :  { %v152_v61 = vshrl.u32 %v136_v45, 13  ;;  %v153_v62 = vshrl.u32 %v137_v46, 13  ;;  %v160_v63 = vxor.u32 %v144_v47, %v128_v31  ;;  %v161_v0 = vxor.u32 %v145_v48, %v129_v32 }
  0x30   :  { %v154_v2 = vshrl.u32 %v138_v49, 13  ;;  %v155_v3 = vshrl.u32 %v139_v50, 13  ;;  %v162_v4 = vxor.u32 %v146_v51, %v130_v35  ;;  %v163_v5 = vxor.u32 %v147_v52, %v131_v36 }
  0x31   :  { %v156_v6 = vshrl.u32 %v140_v53, 13  ;;  %v157_v7 = vshrl.u32 %v141_v54, 13  ;;  %v164_v8 = vxor.u32 %v148_v55, %v132_v39  ;;  %v165_v9 = vxor.u32 %v149_v56, %v133_v40 }
  0x32   :  { %v158_v10 = vshrl.u32 %v142_v57, 13  ;;  %v159_v12 = vshrl.u32 %v143_v58, 13  ;;  %v166_v13 = vxor.u32 %v150_v59, %v134_v43  ;;  %v167_v14 = vxor.u32 %v151_v60, %v135_v44 }
  0x33   :  { %v168_v11 = vxor.u32 %v152_v61, %v136_v45  ;;  %v169_v15 = vxor.u32 %v153_v62, %v137_v46  ;;  %v176_v16 = vmul.u32 3266489909, %v160_v63  ;;  %v177_v17 = vmul.u32 3266489909, %v161_v0 }
  0x34   :  { %v170_v18 = vxor.u32 %v154_v2, %v138_v49  ;;  %v171_v19 = vxor.u32 %v155_v3, %v139_v50  ;;  %v178_v20 = vmul.u32 3266489909, %v162_v4  ;;  %v179_v21 = vmul.u32 3266489909, %v163_v5 }
  0x35   :  { %v172_v22 = vxor.u32 %v156_v6, %v140_v53  ;;  %v173_v23 = vxor.u32 %v157_v7, %v141_v54  ;;  %v180_v24 = vmul.u32 3266489909, %v164_v8  ;;  %v181_v25 = vmul.u32 3266489909, %v165_v9 }
  0x36   :  { %v174_v26 = vxor.u32 %v158_v10, %v142_v57  ;;  %v182_v27 = vmul.u32 3266489909, %v166_v13  ;;  %v183_v28 = vmul.u32 3266489909, %v167_v14  ;;  %v175_v29 = vxor.u32 %v159_v12, %v143_v58 }
  0x37   :  { %v184_v30 = vmul.u32 3266489909, %v168_v11  ;;  %v185_v31 = vmul.u32 3266489909, %v169_v15  ;;  %v192_v36 = vshrl.u32 %v176_v16, 16  ;;  %v193_v37 = vshrl.u32 %v177_v17, 16 }
  0x38   :  { %v186_v32 = vmul.u32 3266489909, %v170_v18  ;;  %v187_v33 = vmul.u32 3266489909, %v171_v19  ;;  %v194_v39 = vshrl.u32 %v178_v20, 16  ;;  %v195_v40 = vshrl.u32 %v179_v21, 16 }
  0x39   :  { %v188_v34 = vmul.u32 3266489909, %v172_v22  ;;  %v189_v35 = vmul.u32 3266489909, %v173_v23  ;;  %v196_v41 = vshrl.u32 %v180_v24, 16  ;;  %v197_v43 = vshrl.u32 %v181_v25, 16 }
  0x3a   :  { %v190_v38 = vmul.u32 3266489909, %v174_v26  ;;  %v191_v42 = vmul.u32 3266489909, %v175_v29  ;;  %v198_v44 = vshrl.u32 %v182_v27, 16  ;;  %v199_v45 = vshrl.u32 %v183_v28, 16 }
  0x3b   :  { %v200_v46 = vshrl.u32 %v184_v30, 16  ;;  %v201_v47 = vshrl.u32 %v185_v31, 16  ;;  %v202_v48 = vshrl.u32 %v186_v32, 16  ;;  %v203_v49 = vshrl.u32 %v187_v33, 16 }
  0x3c   :  { %v204_v50 = vshrl.u32 %v188_v34, 16  ;;  %v205_v51 = vshrl.u32 %v189_v35, 16  ;;  %v2975_v52 = vxor.u32 %v192_v36, %v176_v16  ;;  %v2977_v53 = vxor.u32 %v193_v37, %v177_v17 }
  0x3d   :  { %v206_v54 = vshrl.u32 %v190_v38, 16  ;;  %v2979_v55 = vxor.u32 %v194_v39, %v178_v20  ;;  %v2981_v56 = vxor.u32 %v195_v40, %v179_v21  ;;  %v2983_v57 = vxor.u32 %v196_v41, %v180_v24 }
  0x3e   :  { %v207_v58 = vshrl.u32 %v191_v42, 16  ;;  %v2985_v59 = vxor.u32 %v197_v43, %v181_v25  ;;  %v2987_v60 = vxor.u32 %v198_v44, %v182_v27  ;;  %v2989_v61 = vxor.u32 %v199_v45, %v183_v28 }
  0x3f   :  { %v2991_v62 = vxor.u32 %v200_v46, %v184_v30  ;;  %v2993_v63 = vxor.u32 %v201_v47, %v185_v31  ;;  %v2995_v0 = vxor.u32 %v202_v48, %v186_v32  ;;  %v2997_v2 = vxor.u32 %v203_v49, %v187_v33 }
  0x40   :  { %v2999_v3 = vxor.u32 %v204_v50, %v188_v34  ;;  %v3001_v4 = vxor.u32 %v205_v51, %v189_v35  ;;  %v224_v5 = vxor.u32 2654435769, %v2975_v52  ;;  %v225_v6 = vxor.u32 2654435769, %v2977_v53 }
  0x41   :  { %v3005_v7 = vxor.u32 %v206_v54, %v190_v38  ;;  %v226_v8 = vxor.u32 2654435769, %v2979_v55  ;;  %v227_v9 = vxor.u32 2654435769, %v2981_v56  ;;  %v228_v10 = vxor.u32 2654435769, %v2983_v57 }
  0x42   :  { %v3010_v12 = vxor.u32 %v207_v58, %v191_v42  ;;  %v229_v13 = vxor.u32 2654435769, %v2985_v59  ;;  %v230_v14 = vxor.u32 2654435769, %v2987_v60  ;;  %v231_v11 = vxor.u32 2654435769, %v2989_v61 }
  0x43   :  { %v232_v15 = vxor.u32 2654435769, %v2991_v62  ;;  %v233_v16 = vxor.u32 2654435769, %v2993_v63  ;;  %v234_v17 = vxor.u32 2654435769, %v2995_v0 }
  0x44   :  { %5208 = vst [vmem:[#allocation11_spill] sm:$0xff] %v3010_v12  ;;  %v235_v18 = vxor.u32 2654435769, %v2997_v2  ;;  %v236_v19 = vxor.u32 2654435769, %v2999_v3  ;;  %v240_v20 = vshrl.u32 %v224_v5, 16 }
  0x45   :  { %v241_v21 = vshrl.u32 %v225_v6, 16  ;;  %v237_v22 = vxor.u32 2654435769, %v3001_v4  ;;  %v238_v23 = vxor.u32 2654435769, %v3005_v7  ;;  %v242_v24 = vshrl.u32 %v226_v8, 16 }
  0x46   :  { %v243_v25 = vshrl.u32 %v227_v9, 16  ;;  %v239_v26 = vxor.u32 2654435769, %v3010_v12  ;;  %v244_v27 = vshrl.u32 %v228_v10, 16  ;;  %v245_v28 = vshrl.u32 %v229_v13, 16 }
  0x47   :  { %v246_v29 = vshrl.u32 %v230_v14, 16  ;;  %v247_v30 = vshrl.u32 %v231_v11, 16  ;;  %v248_v31 = vshrl.u32 %v232_v15, 16  ;;  %v249_v32 = vshrl.u32 %v233_v16, 16 }
  0x48   :  { %v250_v33 = vshrl.u32 %v234_v17, 16  ;;  %v251_v34 = vshrl.u32 %v235_v18, 16  ;;  %v252_v35 = vshrl.u32 %v236_v19, 16  ;;  %v256_v36 = vxor.u32 %v240_v20, %v224_v5 }
  0x49   :  { %v257_v37 = vxor.u32 %v241_v21, %v225_v6  ;;  %v253_v38 = vshrl.u32 %v237_v22, 16  ;;  %v254_v39 = vshrl.u32 %v238_v23, 16  ;;  %v258_v40 = vxor.u32 %v242_v24, %v226_v8 }
  0x4a   :  { %v259_v41 = vxor.u32 %v243_v25, %v227_v9  ;;  %v255_v42 = vshrl.u32 %v239_v26, 16  ;;  %v260_v43 = vxor.u32 %v244_v27, %v228_v10  ;;  %v261_v44 = vxor.u32 %v245_v28, %v229_v13 }
  0x4b   :  { %v262_v45 = vxor.u32 %v246_v29, %v230_v14  ;;  %v263_v46 = vxor.u32 %v247_v30, %v231_v11  ;;  %v264_v47 = vxor.u32 %v248_v31, %v232_v15  ;;  %v265_v48 = vxor.u32 %v249_v32, %v233_v16 }
  0x4c   :  { %v266_v49 = vxor.u32 %v250_v33, %v234_v17  ;;  %v267_v50 = vxor.u32 %v251_v34, %v235_v18  ;;  %v268_v51 = vxor.u32 %v252_v35, %v236_v19  ;;  %v272_v54 = vmul.u32 2246822507, %v256_v36 }
  0x4d   :  { %v273_v58 = vmul.u32 2246822507, %v257_v37  ;;  %v269_v1 = vxor.u32 %v253_v38, %v237_v22  ;;  %v270_v12 = vxor.u32 %v254_v39, %v238_v23  ;;  %v274_v5 = vmul.u32 2246822507, %v258_v40 }
  0x4e   :  { %v275_v6 = vmul.u32 2246822507, %v259_v41  ;;  %v271_v20 = vxor.u32 %v255_v42, %v239_v26  ;;  %v276_v21 = vmul.u32 2246822507, %v260_v43  ;;  %v368_v9 = vshrl.u32 %v2975_v52, 8 }
  0x4f   :  { %v277_v8 = vmul.u32 2246822507, %v261_v44  ;;  %v278_v10 = vmul.u32 2246822507, %v262_v45  ;;  %v369_v14 = vshrl.u32 %v2977_v53, 8  ;;  %v370_v11 = vshrl.u32 %v2979_v55, 8 }
  0x50   :  { %v279_v13 = vmul.u32 2246822507, %v263_v46  ;;  %v280_v15 = vmul.u32 2246822507, %v264_v47  ;;  %v288_v17 = vshrl.u32 %v272_v54, 13  ;;  %v289_v18 = vshrl.u32 %v273_v58, 13 }
  0x51   :  { %v281_v16 = vmul.u32 2246822507, %v265_v48  ;;  %v282_v19 = vmul.u32 2246822507, %v266_v49  ;;  %v290_v23 = vshrl.u32 %v274_v5, 13  ;;  %v291_v24 = vshrl.u32 %v275_v6, 13 }
  0x52   :  { %v283_v22 = vmul.u32 2246822507, %v267_v50  ;;  %v284_v25 = vmul.u32 2246822507, %v268_v51  ;;  %v292_v27 = vshrl.u32 %v276_v21, 13  ;;  %v293_v28 = vshrl.u32 %v277_v8, 13 }
  0x53   :  { %v285_v26 = vmul.u32 2246822507, %v269_v1  ;;  %v286_v29 = vmul.u32 2246822507, %v270_v12  ;;  %v294_v31 = vshrl.u32 %v278_v10, 13  ;;  %v295_v32 = vshrl.u32 %v279_v13, 13 }
  0x54   :  { %v287_v30 = vmul.u32 2246822507, %v271_v20  ;;  %v296_v33 = vshrl.u32 %v280_v15, 13  ;;  %v297_v34 = vshrl.u32 %v281_v16, 13  ;;  %v304_v35 = vxor.u32 %v288_v17, %v272_v54 }
  0x55   :  { %v305_v36 = vxor.u32 %v289_v18, %v273_v58  ;;  %v298_v37 = vshrl.u32 %v282_v19, 13  ;;  %v299_v38 = vshrl.u32 %v283_v22, 13  ;;  %v306_v39 = vxor.u32 %v290_v23, %v274_v5 }
  0x56   :  { %v307_v40 = vxor.u32 %v291_v24, %v275_v6  ;;  %v300_v41 = vshrl.u32 %v284_v25, 13  ;;  %v301_v42 = vshrl.u32 %v285_v26, 13  ;;  %v308_v43 = vxor.u32 %v292_v27, %v276_v21 }
  0x57   :  { %v309_v44 = vxor.u32 %v293_v28, %v277_v8  ;;  %v302_v45 = vshrl.u32 %v286_v29, 13  ;;  %v303_v1 = vshrl.u32 %v287_v30, 13  ;;  %v310_v46 = vxor.u32 %v294_v31, %v278_v10 }
  0x58   :  { %v311_v47 = vxor.u32 %v295_v32, %v279_v13  ;;  %v312_v12 = vxor.u32 %v296_v33, %v280_v15  ;;  %v313_v48 = vxor.u32 %v297_v34, %v281_v16  ;;  %v320_v49 = vmul.u32 3266489909, %v304_v35 }
  0x59   :  { %v321_v50 = vmul.u32 3266489909, %v305_v36  ;;  %v314_v51 = vxor.u32 %v298_v37, %v282_v19  ;;  %v315_v20 = vxor.u32 %v299_v38, %v283_v22  ;;  %v322_v54 = vmul.u32 3266489909, %v306_v39 }
  0x5a   :  { %v323_v58 = vmul.u32 3266489909, %v307_v40  ;;  %v316_v17 = vxor.u32 %v300_v41, %v284_v25  ;;  %v317_v18 = vxor.u32 %v301_v42, %v285_v26  ;;  %v324_v5 = vmul.u32 3266489909, %v308_v43 }
  0x5b   :  { %v325_v6 = vmul.u32 3266489909, %v309_v44  ;;  %v318_v23 = vxor.u32 %v302_v45, %v286_v29  ;;  %v319_v24 = vxor.u32 %v303_v1, %v287_v30  ;;  %v326_v21 = vmul.u32 3266489909, %v310_v46 }
  0x5c   :  { %v327_v8 = vmul.u32 3266489909, %v311_v47  ;;  %v328_v27 = vmul.u32 3266489909, %v312_v12  ;;  %v371_v10 = vshrl.u32 %v2981_v56, 8  ;;  %v372_v13 = vshrl.u32 %v2983_v57, 8 }
  0x5d   :  { %v329_v28 = vmul.u32 3266489909, %v313_v48  ;;  %v330_v15 = vmul.u32 3266489909, %v314_v51  ;;  %v373_v19 = vshrl.u32 %v2985_v59, 8  ;;  %v374_v22 = vshrl.u32 %v2987_v60, 8 }
  0x5e   :  { %v331_v16 = vmul.u32 3266489909, %v315_v20  ;;  %v332_v25 = vmul.u32 3266489909, %v316_v17  ;;  %v336_v31 = vshrl.u32 %v320_v49, 16  ;;  %v337_v32 = vshrl.u32 %v321_v50, 16 }
  0x5f   :  { %v333_v26 = vmul.u32 3266489909, %v317_v18  ;;  %v334_v29 = vmul.u32 3266489909, %v318_v23  ;;  %v338_v33 = vshrl.u32 %v322_v54, 16  ;;  %v339_v34 = vshrl.u32 %v323_v58, 16 }
  0x60   :  { %v335_v30 = vmul.u32 3266489909, %v319_v24  ;;  %v340_v35 = vshrl.u32 %v324_v5, 16  ;;  %v341_v36 = vshrl.u32 %v325_v6, 16  ;;  %v342_v37 = vshrl.u32 %v326_v21, 16 }
  0x61   :  { %v343_v56 = vshrl.u32 %v327_v8, 16  ;;  %v344_v38 = vshrl.u32 %v328_v27, 16  ;;  %v345_v57 = vshrl.u32 %v329_v28, 16  ;;  %v346_v39 = vshrl.u32 %v330_v15, 16 }
  0x62   :  { %v347_v40 = vshrl.u32 %v331_v16, 16  ;;  %v348_v41 = vshrl.u32 %v332_v25, 16  ;;  %v349_v42 = vshrl.u32 %v333_v26, 16  ;;  %v3030_v43 = vxor.u32 %v336_v31, %v320_v49 }
  0x63   :  { %v3032_v44 = vxor.u32 %v337_v32, %v321_v50  ;;  %v350_v45 = vshrl.u32 %v334_v29, 16  ;;  %v351_v1 = vshrl.u32 %v335_v30, 16  ;;  %v3034_v46 = vxor.u32 %v338_v33, %v322_v54 }
  0x64   :  { %v3036_v47 = vxor.u32 %v339_v34, %v323_v58  ;;  %v3038_v12 = vxor.u32 %v340_v35, %v324_v5  ;;  %v3040_v48 = vxor.u32 %v341_v36, %v325_v6  ;;  %v3042_v51 = vxor.u32 %v342_v37, %v326_v21 }
  0x65   :  { %v384_v20 = vshrl.u32 %v368_v9, 16  ;;  %v3046_v17 = vxor.u32 %v343_v56, %v327_v8  ;;  %v3048_v49 = vxor.u32 %v344_v38, %v328_v27  ;;  %v3050_v50 = vxor.u32 %v345_v57, %v329_v28  ;;  %v5209_v57 = vld [vmem:[#allocation11_spill] sm:$0xff] }
  0x66   :  { %v390_v54 = vshrl.u32 %v369_v14, 16  ;;  %v3054_v58 = vxor.u32 %v346_v39, %v330_v15  ;;  %v3056_v18 = vxor.u32 %v347_v40, %v331_v16  ;;  %v396_v5 = vshrl.u32 %v370_v11, 16 }
  0x67   :  { %v402_v6 = vshrl.u32 %v371_v10, 16  ;;  %v3060_v23 = vxor.u32 %v348_v41, %v332_v25  ;;  %v3062_v24 = vxor.u32 %v349_v42, %v333_v26  ;;  %v3064_v21 = vxor.u32 %v350_v45, %v334_v29 }
  0x68   :  { %v3066_v8 = vxor.u32 %v351_v1, %v335_v30  ;;  %v375_v27 = vshrl.u32 %v2989_v61, 8  ;;  %v385_v28 = vand.u32 65535, %v368_v9  ;;  %v386_v15 = vcvt.s32.f32 %v384_v20 }
  0x69   :  { %v408_v16 = vshrl.u32 %v372_v13, 16  ;;  %v391_v31 = vand.u32 65535, %v369_v14  ;;  %v392_v32 = vcvt.s32.f32 %v390_v54  ;;  %v397_v25 = vand.u32 65535, %v370_v11 }
  0x6a   :  { %v403_v26 = vand.u32 65535, %v371_v10  ;;  %v376_v29 = vshrl.u32 %v2991_v62, 8  ;;  %v377_v30 = vshrl.u32 %v2993_v63, 8  ;;  %v398_v33 = vcvt.s32.f32 %v396_v5 }
  0x6b   :  { %v404_v34 = vcvt.s32.f32 %v402_v6  ;;  %v378_v61 = vshrl.u32 %v2995_v0, 8  ;;  %v379_v52 = vshrl.u32 %v2997_v2, 8  ;;  %v380_v9 = vshrl.u32 %v2999_v3, 8 }
  0x6c   :  { %v414_v53 = vshrl.u32 %v373_v19, 16  ;;  %v387_v14 = vmul.f32 65536.0, %v386_v15  ;;  %v388_v35 = vcvt.s32.f32 %v385_v28  ;;  %v409_v55 = vand.u32 65535, %v372_v13 }
  0x6d   :  { %v410_v11 = vcvt.s32.f32 %v408_v16  ;;  %v393_v10 = vmul.f32 65536.0, %v392_v32  ;;  %v394_v36 = vcvt.s32.f32 %v391_v31  ;;  %v400_v62 = vcvt.s32.f32 %v397_v25 }
  0x6e   :  { %v406_v37 = vcvt.s32.f32 %v403_v26  ;;  %v399_v63 = vmul.f32 65536.0, %v398_v33  ;;  %v405_v56 = vmul.f32 65536.0, %v404_v34  ;;  %v415_v0 = vand.u32 65535, %v373_v19 }
  0x6f   :  { %v420_v2 = vshrl.u32 %v374_v22, 16  ;;  %v381_v3 = vshrl.u32 %v3001_v4, 8  ;;  %v382_v38 = vshrl.u32 %v3005_v7, 8  ;;  %v383_v39 = vshrl.u32 %v5209_v57, 8 }
  0x70   :  { %v416_v13 = vcvt.s32.f32 %v414_v53  ;;  %v3089_v40 = vadd.f32 %v388_v35, %v387_v14  ;;  %v411_v41 = vmul.f32 65536.0, %v410_v11  ;;  %v412_v42 = vcvt.s32.f32 %v409_v55 }
  0x71   :  { %v421_v45 = vand.u32 65535, %v374_v22  ;;  %v3093_v1 = vadd.f32 %v394_v36, %v393_v10  ;;  %v426_v59 = vshrl.u32 %v375_v27, 16  ;;  %v427_v19 = vand.u32 65535, %v375_v27 }
  0x72   :  { %v432_v20 = vshrl.u32 %v376_v29, 16  ;;  %v401_v54 = vadd.f32 %v400_v62, %v399_v63  ;;  %v3095_v5 = vadd.f32 %v406_v37, %v405_v56  ;;  %v418_v4 = vcvt.s32.f32 %v415_v0 }
  0x73   :  { %v422_v7 = vcvt.s32.f32 %v420_v2  ;;  %v417_v6 = vmul.f32 65536.0, %v416_v13  ;;  %v433_v28 = vand.u32 65535, %v376_v29  ;;  %v438_v15 = vshrl.u32 %v377_v30, 16 }
  0x74   :  { %v444_v16 = vshrl.u32 %v378_v61, 16  ;;  %v413_v31 = vadd.f32 %v412_v42, %v411_v41  ;;  %v424_v32 = vcvt.s32.f32 %v421_v45  ;;  %v450_v25 = vshrl.u32 %v379_v52, 16 }
  0x75   :  { %v456_v26 = vshrl.u32 %v380_v9, 16  ;;  %v428_v60 = vcvt.s32.f32 %v426_v59  ;;  %v430_v22 = vcvt.s32.f32 %v427_v19  ;;  %v434_v33 = vcvt.s32.f32 %v432_v20 }
  0x76   :  { %v462_v34 = vshrl.u32 %v381_v3, 16  ;;  %v423_v53 = vmul.f32 65536.0, %v422_v7  ;;  %v439_v27 = vand.u32 65535, %v377_v30  ;;  %v445_v14 = vand.u32 65535, %v378_v61 }
  0x77   :  { %v468_v35 = vshrl.u32 %v382_v38, 16  ;;  %v436_v55 = vcvt.s32.f32 %v433_v28  ;;  %v440_v11 = vcvt.s32.f32 %v438_v15  ;;  %v446_v10 = vcvt.s32.f32 %v444_v16 }
  0x78   :  { %v474_v36 = vshrl.u32 %v383_v39, 16  ;;  %v451_v62 = vand.u32 65535, %v379_v52  ;;  %v452_v29 = vcvt.s32.f32 %v450_v25  ;;  %v457_v37 = vand.u32 65535, %v380_v9 }
  0x79   :  { %v458_v63 = vcvt.s32.f32 %v456_v26  ;;  %v429_v56 = vmul.f32 65536.0, %v428_v60  ;;  %v435_v0 = vmul.f32 65536.0, %v434_v33  ;;  %v463_v2 = vand.u32 65535, %v381_v3 }
  0x7a   :  { %v464_v57 = vcvt.s32.f32 %v462_v34  ;;  %v442_v13 = vcvt.s32.f32 %v439_v27  ;;  %v448_v41 = vcvt.s32.f32 %v445_v14  ;;  %v469_v42 = vand.u32 65535, %v382_v38 }
  0x7b   :  { %v470_v45 = vcvt.s32.f32 %v468_v35  ;;  %v441_v59 = vmul.f32 65536.0, %v440_v11  ;;  %v447_v30 = vmul.f32 65536.0, %v446_v10  ;;  %v475_v61 = vand.u32 65535, %v383_v39 }
  0x7c   :  { %v476_v19 = vcvt.s32.f32 %v474_v36  ;;  %v453_v20 = vmul.f32 65536.0, %v452_v29  ;;  %v454_v7 = vcvt.s32.f32 %v451_v62  ;;  %v459_v28 = vmul.f32 65536.0, %v458_v63 }
  0x7d   :  { %v460_v15 = vcvt.s32.f32 %v457_v37  ;;  %v419_v52 = vadd.f32 %v418_v4, %v417_v6  ;;  %v465_v16 = vmul.f32 65536.0, %v464_v57  ;;  %v466_v9 = vcvt.s32.f32 %v463_v2 }
  0x7e   :  { %v512_v25 = vshrl.u32 %v3030_v43, 8  ;;  %v425_v26 = vadd.f32 %v424_v32, %v423_v53  ;;  %v431_v3 = vadd.f32 %v430_v22, %v429_v56  ;;  %v471_v60 = vmul.f32 65536.0, %v470_v45 }
  0x7f   :  { %v472_v33 = vcvt.s32.f32 %v469_v42  ;;  %v437_v34 = vadd.f32 %v436_v55, %v435_v0  ;;  %v443_v38 = vadd.f32 %v442_v13, %v441_v59  ;;  %v477_v27 = vmul.f32 65536.0, %v476_v19 }
  0x80   :  { %v478_v14 = vcvt.s32.f32 %v475_v61  ;;  %v449_v35 = vadd.f32 %v448_v41, %v447_v30  ;;  %v455_v39 = vadd.f32 %v454_v7, %v453_v20  ;;  %v461_v11 = vadd.f32 %v460_v15, %v459_v28 }
  0x81   :  { %v480_v10 = vadd.f32 0.5, %v3089_v40  ;;  %v467_v36 = vadd.f32 %v466_v9, %v465_v16  ;;  %v481_v4 = vadd.f32 0.5, %v3093_v1  ;;  %v482_v6 = vadd.f32 0.5, %v401_v54 }
  0x82   :  { %v528_v62 = vshrl.u32 %v512_v25, 16  ;;  %v473_v29 = vadd.f32 %v472_v33, %v471_v60  ;;  %v483_v43 = vadd.f32 0.5, %v3095_v5  ;;  %v484_v32 = vadd.f32 0.5, %v413_v31 }
  0x83   :  { %v485_v22 = vadd.f32 0.5, %v419_v52  ;;  %v479_v53 = vadd.f32 %v478_v14, %v477_v27  ;;  %v486_v55 = vadd.f32 0.5, %v425_v26  ;;  %v487_v37 = vadd.f32 0.5, %v431_v3 }
  0x84   :  { %v488_v63 = vadd.f32 0.5, %v437_v34  ;;  %v489_v56 = vadd.f32 0.5, %v443_v38  ;;  %v490_v0 = vadd.f32 0.5, %v449_v35  ;;  %v491_v2 = vadd.f32 0.5, %v455_v39 }
  0x85   :  { %v492_v57 = vadd.f32 0.5, %v461_v11  ;;  %v493_v13 = vadd.f32 0.5, %v467_v36  ;;  %v3101_v40 = vmul.f32 5.9604645e-08, %v480_v10  ;;  %v529_v41 = vand.u32 65535, %v512_v25 }
  0x86   :  { %v530_v1 = vcvt.s32.f32 %v528_v62  ;;  %v494_v54 = vadd.f32 0.5, %v473_v29  ;;  %v3103_v42 = vmul.f32 5.9604645e-08, %v481_v4  ;;  %v3105_v45 = vmul.f32 5.9604645e-08, %v482_v6 }
  0x87   :  { %v513_v5 = vshrl.u32 %v3032_v44, 8  ;;  %v495_v31 = vadd.f32 0.5, %v479_v53  ;;  %v3108_v59 = vmul.f32 5.9604645e-08, %v483_v43  ;;  %v514_v30 = vshrl.u32 %v3034_v46, 8 }
  0x88   :  { %v515_v61 = vshrl.u32 %v3036_v47, 8  ;;  %v3112_v19 = vmul.f32 5.9604645e-08, %v484_v32  ;;  %v3114_v20 = vmul.f32 5.9604645e-08, %v485_v22  ;;  %v3116_v7 = vmul.f32 5.9604645e-08, %v486_v55 }
  0x89   :  { %v516_v28 = vshrl.u32 %v3038_v12, 8  ;;  %v3119_v15 = vmul.f32 5.9604645e-08, %v487_v37  ;;  %v3121_v52 = vmul.f32 5.9604645e-08, %v488_v63  ;;  %v531_v44 = vmul.f32 65536.0, %v530_v1 }
  0x8a   :  { %v532_v16 = vcvt.s32.f32 %v529_v41  ;;  %v3123_v9 = vmul.f32 5.9604645e-08, %v489_v56  ;;  %v3125_v25 = vmul.f32 5.9604645e-08, %v490_v0  ;;  %v517_v46 = vshrl.u32 %v3040_v48, 8 }
  0x8b   :  { %v534_v47 = vshrl.u32 %v513_v5, 16  ;;  %v3128_v26 = vmul.f32 5.9604645e-08, %v491_v2  ;;  %v3130_v3 = vmul.f32 5.9604645e-08, %v492_v57  ;;  %v540_v60 = vshrl.u32 %v514_v30, 16 }
  0x8c   :  { %v546_v33 = vshrl.u32 %v515_v61, 16  ;;  %v3132_v12 = vmul.f32 5.9604645e-08, %v493_v13  ;;  %v3134_v34 = vmul.f32 5.9604645e-08, %v494_v54  ;;  %v3136_v38 = vmul.f32 5.9604645e-08, %v495_v31 }
  0x8d   :  { %v552_v27 = vshrl.u32 %v516_v28, 16  ;;  %v518_v14 = vshrl.u32 %v3042_v51, 8  ;;  %v519_v35 = vshrl.u32 %v3046_v17, 8  ;;  %v533_v39 = vadd.f32 %v532_v16, %v531_v44 }
  0x8e   :  { %v535_v48 = vand.u32 65535, %v513_v5  ;;  %v520_v11 = vshrl.u32 %v3048_v49, 8  ;;  %v536_v10 = vcvt.s32.f32 %v534_v47  ;;  %v541_v36 = vand.u32 65535, %v514_v30 }
  0x8f   :  { %v558_v4 = vshrl.u32 %v517_v46, 16  ;;  %v542_v6 = vcvt.s32.f32 %v540_v60  ;;  %v547_v62 = vand.u32 65535, %v515_v61  ;;  %v548_v29 = vcvt.s32.f32 %v546_v33 }
  0x90   :  { %v553_v43 = vand.u32 65535, %v516_v28  ;;  %v521_v32 = vshrl.u32 %v3050_v50, 8  ;;  %v522_v22 = vshrl.u32 %v3054_v58, 8  ;;  %v523_v53 = vshrl.u32 %v3056_v18, 8 }
  0x91   :  { %v554_v51 = vcvt.s32.f32 %v552_v27  ;;  %v524_v17 = vshrl.u32 %v3060_v23, 8  ;;  %v538_v55 = vcvt.s32.f32 %v535_v48  ;;  %v564_v37 = vshrl.u32 %v518_v14, 16 }
  0x92   :  { %v624_v63 = vmul.f32 5.9604645e-08, %v533_v39  ;;  %v537_v49 = vmul.f32 65536.0, %v536_v10  ;;  %v544_v56 = vcvt.s32.f32 %v541_v36  ;;  %v559_v0 = vand.u32 65535, %v517_v46 }
  0x93   :  { %v560_v2 = vcvt.s32.f32 %v558_v4  ;;  %v543_v57 = vmul.f32 65536.0, %v542_v6  ;;  %v549_v13 = vmul.f32 65536.0, %v548_v29  ;;  %v550_v41 = vcvt.s32.f32 %v547_v62 }
  0x94   :  { %v556_v1 = vcvt.s32.f32 %v553_v43  ;;  %v555_v54 = vmul.f32 65536.0, %v554_v51  ;;  %v565_v50 = vand.u32 65535, %v518_v14  ;;  %v570_v5 = vshrl.u32 %v519_v35, 16 }
  0x95   :  { %v576_v58 = vshrl.u32 %v520_v11, 16  ;;  %v525_v18 = vshrl.u32 %v3062_v24, 8  ;;  %v526_v31 = vshrl.u32 %v3064_v21, 8  ;;  %v566_v23 = vcvt.s32.f32 %v564_v37 }
  0x96   :  { %v3147_v30 = vmul.f32 6.2831855, %v624_v63  ;;  %v527_v61 = vshrl.u32 %v3066_v8, 8  ;;  %v561_v28 = vmul.f32 65536.0, %v560_v2  ;;  %v562_v44 = vcvt.s32.f32 %v559_v0 }
  0x97   :  { %v571_v16 = vand.u32 65535, %v519_v35  ;;  %v539_v46 = vadd.f32 %v538_v55, %v537_v49  ;;  %v3150_v47 = vadd.f32 %v544_v56, %v543_v57  ;;  %v3152_v60 = vadd.f32 %v550_v41, %v549_v13 }
  0x98   :  { %v577_v33 = vand.u32 65535, %v520_v11  ;;  %v3154_v27 = vadd.f32 %v556_v1, %v555_v54  ;;  %v568_v14 = vcvt.s32.f32 %v565_v50  ;;  %v572_v24 = vcvt.s32.f32 %v570_v5 }
  0x99   :  { %v578_v39 = vcvt.s32.f32 %v576_v58  ;;  %v567_v21 = vmul.f32 65536.0, %v566_v23  ;;  %v582_v48 = vshrl.u32 %v521_v32, 16  ;;  %v588_v10 = vshrl.u32 %v522_v22, 16 }
  0x9a   :  { %v819_v36 = vand.u32 2139095040, %v3147_v30  ;;  %v563_v8 = vadd.f32 %v562_v44, %v561_v28  ;;  %v574_v4 = vcvt.s32.f32 %v571_v16  ;;  %v594_v6 = vshrl.u32 %v523_v53, 16 }
  0x9b   :  { %v600_v35 = vshrl.u32 %v524_v17, 16  ;;  %v580_v62 = vcvt.s32.f32 %v577_v33  ;;  %v583_v29 = vand.u32 65535, %v521_v32  ;;  %v606_v43 = vshrl.u32 %v525_v18, 16 }
  0x9c   :  { %v612_v51 = vshrl.u32 %v526_v31, 16  ;;  %v573_v55 = vmul.f32 65536.0, %v572_v24  ;;  %v579_v11 = vmul.f32 65536.0, %v578_v39  ;;  %v589_v37 = vand.u32 65535, %v522_v22 }
  0x9d   :  { %v618_v63 = vshrl.u32 %v527_v61, 16  ;;  %v569_v49 = vadd.f32 %v568_v14, %v567_v21  ;;  %v584_v56 = vcvt.s32.f32 %v582_v48  ;;  %v590_v0 = vcvt.s32.f32 %v588_v10 }
  0x9e   :  { %v820_v2 = vshrl.u32 %v819_v36, 23  ;;  %v595_v57 = vand.u32 65535, %v523_v53  ;;  %v596_v13 = vcvt.s32.f32 %v594_v6  ;;  %v601_v41 = vand.u32 65535, %v524_v17 }
  0x9f   :  { %v602_v1 = vcvt.s32.f32 %v600_v35  ;;  %v607_v54 = vand.u32 65535, %v525_v18  ;;  %v608_v50 = vcvt.s32.f32 %v606_v43  ;;  %v613_v5 = vand.u32 65535, %v526_v31 }
  0xa0   :  { %v614_v58 = vcvt.s32.f32 %v612_v51  ;;  %v575_v23 = vadd.f32 %v574_v4, %v573_v55  ;;  %v586_v32 = vcvt.s32.f32 %v583_v29  ;;  %v619_v28 = vand.u32 65535, %v527_v61 }
  0xa1   :  { %v620_v44 = vcvt.s32.f32 %v618_v63  ;;  %v585_v16 = vmul.f32 65536.0, %v584_v56  ;;  %v591_v33 = vmul.f32 65536.0, %v590_v0  ;;  %v592_v22 = vcvt.s32.f32 %v589_v37 }
  0xa2   :  { %v2633_v24 = vadd.s32 4294967169, %v820_v2  ;;  %v597_v14 = vmul.f32 65536.0, %v596_v13  ;;  %v598_v39 = vcvt.s32.f32 %v595_v57  ;;  %v603_v21 = vmul.f32 65536.0, %v602_v1 }
  0xa3   :  { %v604_v48 = vcvt.s32.f32 %v601_v41  ;;  %v609_v53 = vmul.f32 65536.0, %v608_v50  ;;  %v610_v10 = vcvt.s32.f32 %v607_v54  ;;  %v615_v17 = vmul.f32 65536.0, %v614_v58 }
  0xa4   :  { %v616_v36 = vcvt.s32.f32 %v613_v5  ;;  %v581_v18 = vadd.f32 %v580_v62, %v579_v11  ;;  %v621_v6 = vmul.f32 65536.0, %v620_v44  ;;  %v622_v31 = vcvt.s32.f32 %v619_v28 }
  0xa5   :  { %2770 = vlog2.f32 %v3101_v40  ;;  %v587_v4 = vadd.f32 %v586_v32, %v585_v16  ;;  %v593_v61 = vadd.f32 %v592_v22, %v591_v33  ;;  %v826_v35 = vadd.s32 1, %v2633_v24 }
  0xa6   :  { %2772 = vlog2.f32 %v3103_v42  ;;  %v599_v29 = vadd.f32 %v598_v39, %v597_v14  ;;  %v605_v43 = vadd.f32 %v604_v48, %v603_v21  ;;  %v625_v51 = vmul.f32 5.9604645e-08, %v539_v46 }
  0xa7   :  { %2774 = vlog2.f32 %v3105_v45  ;;  %v611_v55 = vadd.f32 %v610_v10, %v609_v53  ;;  %v617_v37 = vadd.f32 %v616_v36, %v615_v17  ;;  %v626_v63 = vmul.f32 5.9604645e-08, %v3150_v47 }
  0xa8   :  { %v627_v62 = vmul.f32 5.9604645e-08, %v3152_v60  ;;  %v623_v11 = vadd.f32 %v622_v31, %v621_v6  ;;  %v628_v56 = vmul.f32 5.9604645e-08, %v3154_v27  ;;  %v629_v40 = vmul.f32 5.9604645e-08, %v563_v8 }
  0xa9   :  { %v630_v0 = vmul.f32 5.9604645e-08, %v569_v49  ;;  %v631_v2 = vmul.f32 5.9604645e-08, %v575_v23  ;;  %v632_v57 = vmul.f32 5.9604645e-08, %v581_v18  ;;  %v5160_v42 = vand.u32 2147483647, %v3147_v30 }
  0xaa   :  { %vm827_vm0 = vcmp.gt.s32.totalorder %v826_v35, 0  ;;  %v633_v13 = vmul.f32 5.9604645e-08, %v587_v4  ;;  %v634_v46 = vmul.f32 5.9604645e-08, %v593_v61  ;;  %v635_v41 = vmul.f32 5.9604645e-08, %v599_v29 }
  0xab   :  { %2776 = vlog2.f32 %v3108_v59  ;;  %v636_v45 = vmul.f32 5.9604645e-08, %v605_v43  ;;  %v637_v1 = vmul.f32 5.9604645e-08, %v611_v55  ;;  %v638_v47 = vmul.f32 5.9604645e-08, %v617_v37 }
  0xac   :  { %2778 = vlog2.f32 %v3112_v19  ;;  %v639_v60 = vmul.f32 5.9604645e-08, %v623_v11  ;;  %v3166_v54 = vmul.f32 6.2831855, %v625_v51  ;;  %v3168_v27 = vmul.f32 6.2831855, %v626_v63 }
  0xad   :  { %v828_v8 = vsel %vm827_vm0, %v826_v35, 0  ;;  %2780 = vlog2.f32 %v3114_v20  ;;  %v3171_v49 = vmul.f32 6.2831855, %v627_v62  ;;  %v3173_v50 = vmul.f32 6.2831855, %v628_v56 }
  0xae   :  { %5210 = vst [vmem:[#allocation11_spill] sm:$0xff] %v3168_v27  ;;  %v823_v59 = vand.u32 8388607, %v5160_v42  ;;  %2782 = vlog2.f32 %v3116_v7  ;;  %v3178_v5 = vmul.f32 6.2831855, %v629_v40  ;;  %v830_v32 = vand.u32 31, %v828_v8 }
  0xaf   :  { %5211 = vst [vmem:[#allocation12_spill] sm:$0xff] %v3171_v49  ;;  %v3180_v19 = vmul.f32 6.2831855, %v630_v0  ;;  %v3182_v58 = vmul.f32 6.2831855, %v631_v2  ;;  %2784 = vlog2.f32 %v3119_v15  ;;  %v3216_v35 = vshrl.u32 %v828_v8, 5 }
  0xb0   :  { %v3185_v23 = vmul.f32 6.2831855, %v632_v57  ;;  %v3187_v20 = vmul.f32 6.2831855, %v633_v13  ;;  %2786 = vlog2.f32 %v3121_v52  ;;  %v3190_v28 = vmul.f32 6.2831855, %v634_v46 }
  0xb1   :  { %5212 = vst [vmem:[#allocation13_spill] sm:$0xff] %v3180_v19  ;;  %5213 = vst [vmem:[#allocation14_spill] sm:$0xff] %v3182_v58  ;;  %v3192_v44 = vmul.f32 6.2831855, %v635_v41  ;;  %v3194_v7 = vmul.f32 6.2831855, %v636_v45  ;;  %2788 = vlog2.f32 %v3123_v9 }
  0xb2   :  { %5214 = vst [vmem:[#allocation15_spill] sm:$0xff] %v3185_v23  ;;  %5215 = vst [vmem:[#allocation16_spill] sm:$0xff] %v3187_v20  ;;  %v2771_v16 = vpop.eup %2770  ;;  %v3197_v33 = vmul.f32 6.2831855, %v637_v1  ;;  %v3199_v22 = vmul.f32 6.2831855, %v638_v47  ;;  %2790 = vlog2.f32 %v3125_v25 }
  0xb3   :  { %5216 = vst [vmem:[#allocation17_spill] sm:$0xff] %v3190_v28  ;;  %5217 = vst [vmem:[#allocation18_spill] sm:$0xff] %v3192_v44  ;;  %v824_v15 = vor.u32 8388608, %v823_v59  ;;  %v2773_v24 = vpop.eup %2772  ;;  %v3202_v14 = vmul.f32 6.2831855, %v639_v60  ;;  %v922_v52 = vand.u32 2139095040, %v3166_v54  ;;  %2792 = vlog2.f32 %v3128_v26 }
  0xb4   :  { %5218 = vst [vmem:[#allocation19_spill] sm:$0xff] %v3194_v7  ;;  %5219 = vst [vmem:[#allocation20_spill] sm:$0xff] %v3197_v33  ;;  %v2775_v39 = vpop.eup %2774  ;;  %v831_v21 = vsub.s32 32, %v830_v32  ;;  %2794 = vlog2.f32 %v3130_v3  ;;  %v641_v48 = vmul.f32 0.6931472, %v2771_v16  ;;  %vm848_vm1 = vcmp.lt.s32.totalorder %v3216_v35, 1 }
  0xb5   :  { %5220 = vst [vmem:[#allocation21_spill] sm:$0xff] %v3199_v22  ;;  %5221 = vst [vmem:[#allocation22_spill] sm:$0xff] %v3202_v14  ;;  %2796 = vlog2.f32 %v3132_v12  ;;  %v3208_v9 = vshll.u32 %v824_v15, 8  ;;  %v5159_v53 = vand.u32 2147483647, %v3166_v54  ;;  %v923_v25 = vshrl.u32 %v922_v52, 23 }
  0xb6   :  { %v643_v10 = vmul.f32 0.6931472, %v2773_v24  ;;  %v645_v17 = vmul.f32 0.6931472, %v2775_v39  ;;  %2798 = vlog2.f32 %v3134_v34  ;;  %v5171_v18 = vmov 683565275  }
  0xb7   :  { %v833_v6 = vshll.u32 %v5171_v18, %v830_v32  ;;  %v5161_v26 = vmov 2475754826   ;;  %v5163_v4 = vmov 2131351028   ;;  %v5165_v43 = vmov 2102212464  }
  0xb8   :  { %v2777_v36 = vpop.eup %2776  ;;  %v834_v31 = vshrl.u32 %v5161_v26, %v831_v21  ;;  %v836_v3 = vshll.u32 %v5161_v26, %v830_v32  ;;  %v837_v12 = vshrl.u32 %v5163_v4, %v831_v21  ;;  %v839_v29 = vshll.u32 %v5163_v4, %v830_v32 }
  0xb9   :  { %v2779_v61 = vpop.eup %2778  ;;  %v840_v34 = vshrl.u32 %v5165_v43, %v831_v21  ;;  %v842_v51 = vshll.u32 %v5165_v43, %v830_v32  ;;  %2800 = vlog2.f32 %v3136_v38  ;;  %v3222_v55 = vmul.f32 -2.0, %v641_v48 }
  0xba   :  { %v5167_v37 = vmov 920167782   ;;  %v3227_v62 = vand.u32 8388607, %v5159_v53  ;;  %v2781_v11 = vpop.eup %2780  ;;  %v647_v56 = vmul.f32 0.6931472, %v2777_v36  ;;  %v835_v41 = vor.u32 %v834_v31, %v833_v6 }
  0xbb   :  { %v843_v63 = vshrl.u32 %v5167_v37, %v831_v21  ;;  %v845_v40 = vshll.u32 %v5167_v37, %v830_v32  ;;  %v5169_v0 = vmov 1326507024   ;;  %v2637_v57 = vadd.s32 4294967169, %v923_v25  ;;  %v2783_v13 = vpop.eup %2782 }
  0xbc   :  { %v846_v2 = vshrl.u32 %v5169_v0, %v831_v21  ;;  %v649_v46 = vmul.f32 0.6931472, %v2779_v61  ;;  %v3231_v38 = vmul.f32 -2.0, %v643_v10  ;;  %v838_v45 = vor.u32 %v837_v12, %v836_v3  ;;  %v2785_v1 = vpop.eup %2784 }
  0xbd   :  { %v3233_v47 = vmul.f32 -2.0, %v645_v17  ;;  %v841_v60 = vor.u32 %v840_v34, %v839_v29  ;;  %v844_v8 = vor.u32 %v843_v63, %v842_v51  ;;  %v2787_v59 = vpop.eup %2786  ;;  %2802 = vrsqrt.f32 %v3222_v55 }
  0xbe   :  { %v832_v32 = vshrl.u32 %v5171_v18, %v831_v21  ;;  %v847_v16 = vor.u32 %v846_v2, %v845_v40  ;;  %vm851_vm2 = vcmp.lt.s32.totalorder %v3216_v35, 4  ;;  %v2789_v15 = vpop.eup %2788  ;;  %v651_v24 = vmul.f32 0.6931472, %v2781_v11 }
  0xbf   :  { %v3239_v52 = vmul.f32 -2.0, %v647_v56  ;;  %vm850_vm3 = vcmp.lt.s32.totalorder %v3216_v35, 3  ;;  %v853_v39 = vsel %vm851_vm2, %v841_v60, 2102212464  ;;  %v2791_v48 = vpop.eup %2790  ;;  %v653_v10 = vmul.f32 0.6931472, %v2783_v13 }
  0xc0   :  { %vm849_vm4 = vcmp.lt.s32.totalorder %v3216_v35, 2  ;;  %v856_v21 = vsel %vm848_vm1, %v835_v41, %v838_v45  ;;  %v3248_v25 = vpop.eup %2792  ;;  %v3250_v36 = vmul.f32 -2.0, %v649_v46  ;;  %2804 = vrsqrt.f32 %v3231_v38 }
  0xc1   :  { %v857_v6 = vsel %vm851_vm2, %v844_v8, 920167782  ;;  %v860_v31 = vsel %vm848_vm1, %v838_v45, %v841_v60  ;;  %v3257_v3 = vpop.eup %2794  ;;  %v852_v12 = vsel %vm848_vm1, %v832_v32, %v835_v41  ;;  %v854_v61 = vsel %vm850_vm3, %v838_v45, %v853_v39 }
  0xc2   :  { %v858_v29 = vsel %vm850_vm3, %v841_v60, %v857_v6  ;;  %v861_v34 = vsel %vm851_vm2, %v847_v16, 1326507024  ;;  %v3267_v51 = vpop.eup %2796  ;;  %v655_v63 = vmul.f32 0.6931472, %v2785_v1  ;;  %v3269_v11 = vmul.f32 -2.0, %v651_v24 }
  0xc3   :  { %v859_v56 = vsel %vm849_vm4, %v856_v21, %v858_v29  ;;  %v862_v40 = vsel %vm850_vm3, %v844_v8, %v861_v34  ;;  %v3275_v2 = vpop.eup %2798  ;;  %v929_v45 = vadd.s32 1, %v2637_v57  ;;  %v657_v1 = vmul.f32 0.6931472, %v2787_v59 }
  0xc4   :  { %5222 = vst [vmem:[#allocation23_spill] sm:$0xff] %v3275_v2  ;;  %v863_v13 = vsel %vm849_vm4, %v860_v31, %v862_v40  ;;  %v3280_v46 = vmul.u32.u64.low %v3208_v9, %v859_v56  ;;  %v3281_v41 = vmul.u32.u64.high %v3208_v9, %v859_v56, %v3280_v46  ;;  %v855_v60 = vsel %vm849_vm4, %v852_v12, %v854_v61 }
  0xc5   :  { %v3287_v32 = vmul.u32.u64.low %v3208_v9, %v863_v13  ;;  %v3288_v16 = vmul.u32.u64.high %v3208_v9, %v863_v13, %v3287_v32  ;;  %v3290_v8 = vmul.f32 -2.0, %v653_v10  ;;  %2806 = vrsqrt.f32 %v3233_v47 }
  0xc6   :  { %vm930_vm5 = vcmp.gt.s32.totalorder %v929_v45, 0  ;;  %v3294_v39 = vpop.eup %2800  ;;  %v659_v21 = vmul.f32 0.6931472, %v2789_v15  ;;  %v3296_v6 = vmul.f32 -2.0, %v655_v63  ;;  %v3299_v59 = vmul.f32 0.6931472, %v2791_v48 }
  0xc7   :  { %5223 = vst [vmem:[#allocation24_spill] sm:$0xff] %v3294_v39  ;;  %v931_v35 = vsel %vm930_vm5, %v929_v45, 0  ;;  %v871_v31 = vmul.u32 %v3208_v9, %v855_v60  ;;  %v874_v10 = vadd.s32 1, %v3281_v41  ;;  %v3303_v61 = vmul.f32 -2.0, %v657_v1 }
  0xc8   :  { %v933_v12 = vand.u32 31, %v931_v35  ;;  %vm873_vm6 = vc.u32 %v3288_v16, %v3280_v46  ;;  %v932_v29 = vshrl.u32 %v931_v35, 5  ;;  %v1025_v15 = vand.u32 2139095040, %v3168_v27 }
  0xc9   :  { %v875_v34 = vsel %vm873_vm6, %v874_v10, %v3281_v41  ;;  %v927_v9 = vor.u32 8388608, %v3227_v62  ;;  %vm690_vm11 = vcmp.eq.f32.partialorder %v3222_v55, inf  ;;  %2808 = vrsqrt.f32 %v3239_v52 }
  0xca   :  { %v934_v63 = vsub.s32 32, %v933_v12  ;;  %v936_v56 = vshll.u32 %v5171_v18, %v933_v12  ;;  %v939_v48 = vshll.u32 %v5161_v26, %v933_v12  ;;  %v2803_v40 = vpop.eup %2802  ;;  %v942_v13 = vshll.u32 %v5163_v4, %v933_v12 }
  0xcb   :  { %v945_v45 = vshll.u32 %v5165_v43, %v933_v12  ;;  %v948_v1 = vshll.u32 %v5167_v37, %v933_v12  ;;  %v3315_v60 = vadd.s32 %v875_v34, %v871_v31  ;;  %vm951_vm7 = vcmp.lt.s32.totalorder %v932_v29, 1 }
  0xcc   :  { %v937_v32 = vshrl.u32 %v5161_v26, %v934_v63  ;;  %v940_v41 = vshrl.u32 %v5163_v4, %v934_v63  ;;  %v943_v35 = vshrl.u32 %v5165_v43, %v934_v63  ;;  %v935_v10 = vshrl.u32 %v5171_v18, %v934_v63 }
  0xcd   :  { %v946_v53 = vshrl.u32 %v5167_v37, %v934_v63  ;;  %v949_v62 = vshrl.u32 %v5169_v0, %v934_v63  ;;  %v3323_v42 = vpop.eup %2804  ;;  %v1026_v31 = vshrl.u32 %v1025_v15, 23  ;;  %vm953_vm8 = vcmp.lt.s32.totalorder %v932_v29, 3 }
  0xce   :  { %v938_v57 = vor.u32 %v937_v32, %v936_v56  ;;  %v941_v24 = vor.u32 %v940_v41, %v939_v48  ;;  %v944_v12 = vor.u32 %v943_v35, %v942_v13  ;;  %v967_v26 = vshll.u32 %v927_v9, 8 }
  0xcf   :  { %v947_v34 = vor.u32 %v946_v53, %v945_v45  ;;  %v950_v17 = vor.u32 %v949_v62, %v948_v1  ;;  %v877_v4 = vadd.s32 536870912, %v3315_v60  ;;  %vm952_vm9 = vcmp.lt.s32.totalorder %v932_v29, 2 }
  0xd0   :  { %vm954_vm10 = vcmp.lt.s32.totalorder %v932_v29, 4  ;;  %v959_v43 = vsel %vm951_vm7, %v938_v57, %v941_v24  ;;  %v955_v37 = vsel %vm951_vm7, %v935_v10, %v938_v57  ;;  %v963_v18 = vsel %vm951_vm7, %v941_v24, %v944_v12 }
  0xd1   :  { %v956_v63 = vsel %vm954_vm10, %v944_v12, 2102212464  ;;  %v960_v0 = vsel %vm954_vm10, %v947_v34, 920167782  ;;  %v964_v56 = vsel %vm954_vm10, %v950_v17, 1326507024  ;;  %2810 = vrsqrt.f32 %v3250_v36 }
  0xd2   :  { %v957_v15 = vsel %vm953_vm8, %v941_v24, %v956_v63  ;;  %v961_v53 = vsel %vm953_vm8, %v944_v12, %v960_v0  ;;  %v2641_v48 = vadd.s32 4294967169, %v1026_v31  ;;  %v3332_v9 = vpop.eup %2806  ;;  %v663_v13 = vmul.f32 0.6931472, %v3248_v25 }
  0xd3   :  { %v3335_v45 = vmul.f32 -2.0, %v659_v21  ;;  %v962_v57 = vsel %vm952_vm9, %v959_v43, %v961_v53  ;;  %v665_v1 = vmul.f32 0.6931472, %v3257_v3  ;;  %v965_v32 = vsel %vm953_vm8, %v947_v34, %v964_v56 }
  0xd4   :  { %v3341_v41 = vmul.u32.u64.low %v967_v26, %v962_v57  ;;  %v3342_v24 = vmul.u32.u64.high %v967_v26, %v962_v57, %v3341_v41  ;;  %v3346_v17 = vshrl.u32 %v877_v4, 30  ;;  %v958_v25 = vsel %vm952_vm9, %v955_v37, %v957_v15 }
  0xd5   :  { %v966_v21 = vsel %vm952_vm9, %v963_v18, %v965_v32  ;;  %v667_v35 = vmul.f32 0.6931472, %v3267_v51  ;;  %vm692_vm12 = vcmp.eq.f32.partialorder %v3222_v55, 0.0  ;;  %v1032_v10 = vadd.s32 1, %v2641_v48 }
  0xd6   :  { %v3352_v43 = vmul.u32.u64.low %v967_v26, %v966_v21  ;;  %v3353_v3 = vmul.u32.u64.high %v967_v26, %v966_v21, %v3352_v43  ;;  %v3356_v62 = vmul.f32 -2.0, %v3299_v59  ;;  %v3358_v12 = vmul.f32 -2.0, %v663_v13 }
  0xd7   :  { %v3362_v37 = vmul.f32 -2.0, %v665_v1  ;;  %v974_v18 = vmul.u32 %v967_v26, %v958_v25  ;;  %v977_v51 = vadd.s32 1, %v3342_v24  ;;  %vm1033_vm13 = vcmp.gt.s32.totalorder %v1032_v10, 0  ;;  %v2809_v1 = vpop.eup %2808 }
  0xd8   :  { %v689_v29 = vmul.f32 %v2803_v40, %v3222_v55  ;;  %2812 = vrsqrt.f32 %v3269_v11  ;;  %v879_v31 = vshll.u32 %v3346_v17, 30  ;;  %v1034_v59 = vsel %vm1033_vm13, %v1032_v10, 0 }
  0xd9   :  { %v3368_v34 = vmul.f32 -2.0, %v667_v35  ;;  %vm976_vm14 = vc.u32 %v3353_v3, %v3341_v41  ;;  %v5173_v63 = vand.u32 2147483647, %v3168_v27  ;;  %v1036_v15 = vand.u32 31, %v1034_v59 }
  0xda   :  { %2814 = vrsqrt.f32 %v3290_v8  ;;  %v978_v40 = vsel %vm976_vm14, %v977_v51, %v3342_v24  ;;  %v691_v57 = vsel %vm690_vm11, %v3222_v55, %v689_v29  ;;  %vm697_vm15 = vcmp.eq.f32.partialorder %v3231_v38, inf }
  0xdb   :  { %5224 = vst [vmem:[#allocation25_spill] sm:$0xff] %v3368_v34  ;;  %2816 = vrsqrt.f32 %v3296_v6  ;;  %v979_v48 = vadd.s32 %v978_v40, %v974_v18  ;;  %v1037_v13 = vsub.s32 32, %v1036_v15  ;;  %v3386_v32 = vsub.s32 %v3315_v60, %v879_v31 }
  0xdc   :  { %2818 = vrsqrt.f32 %v3303_v61  ;;  %v1029_v25 = vand.u32 8388607, %v5173_v63  ;;  %v3390_v21 = vshrl.u32 %v1034_v59, 5  ;;  %v5225_v35 = vmov 683565275  }
  0xdd   :  { %v980_v24 = vadd.s32 536870912, %v979_v48  ;;  %v1039_v43 = vshll.u32 %v5225_v35, %v1036_v15  ;;  %v5226_v10 = vmov 2475754826   ;;  %v5227_v29 = vmov 2131351028  }
  0xde   :  { %v1040_v18 = vshrl.u32 %v5226_v10, %v1037_v13  ;;  %v1042_v51 = vshll.u32 %v5226_v10, %v1036_v15  ;;  %v1043_v40 = vshrl.u32 %v5227_v29, %v1037_v13  ;;  %v5228_v56 = vmov 2102212464  }
  0xdf   :  { %v1048_v53 = vshll.u32 %v5228_v56, %v1036_v15  ;;  %vm699_vm0 = vcmp.eq.f32.partialorder %v3231_v38, 0.0  ;;  %v3398_v60 = vshrl.u32 %v980_v24, 30  ;;  %v1045_v31 = vshll.u32 %v5227_v29, %v1036_v15 }
  0xe0   :  { %v1046_v59 = vshrl.u32 %v5228_v56, %v1037_v13  ;;  %v5230_v63 = vmov 920167782   ;;  %v5231_v4 = vand.u32 2147483648, %v3222_v55  ;;  %v696_v39 = vmul.f32 %v3323_v42, %v3231_v38 }
  0xe1   :  { %5229 = vst [vmem:[#allocation26_spill] sm:$0xff] %v3398_v60  ;;  %v1049_v26 = vshrl.u32 %v5230_v63, %v1037_v13  ;;  %2820 = vrsqrt.f32 %v3335_v45  ;;  %v882_v24 = vsub.s32 0, %v3386_v32  ;;  %vm704_vm1 = vcmp.eq.f32.partialorder %v3233_v47, inf }
  0xe2   :  { %v3407_v0 = vsel %vm692_vm12, %v5231_v4, %v691_v57  ;;  %v982_v2 = vshll.u32 %v3398_v60, 30  ;;  %v1030_v14 = vor.u32 8388608, %v1029_v25  ;;  %v1051_v22 = vshll.u32 %v5230_v63, %v1036_v15 }
  0xe3   :  { %5232 = vst [vmem:[#allocation27_spill] sm:$0xff] %v3407_v0  ;;  %v5233_v33 = vmov 1326507024   ;;  %v1041_v44 = vor.u32 %v1040_v18, %v1039_v43  ;;  %v1044_v55 = vor.u32 %v1043_v40, %v1042_v51  ;;  %v1050_v4 = vor.u32 %v1049_v26, %v1048_v53  ;;  %v2811_v0 = vpop.eup %2810 }
  0xe4   :  { %v1052_v7 = vshrl.u32 %v5233_v33, %v1037_v13  ;;  %v1128_v57 = vand.u32 2139095040, %v3171_v49  ;;  %v3418_v42 = vsub.s32 %v979_v48, %v982_v2  ;;  %v1038_v28 = vshrl.u32 %v5225_v35, %v1037_v13 }
  0xe5   :  { %v1047_v20 = vor.u32 %v1046_v59, %v1045_v31  ;;  %vm1054_vm2 = vcmp.lt.s32.totalorder %v3390_v21, 1  ;;  %vm706_vm3 = vcmp.eq.f32.partialorder %v3233_v47, 0.0  ;;  %vm711_vm4 = vcmp.eq.f32.partialorder %v3239_v52, inf  ;;  %v2813_v53 = vpop.eup %2812 }
  0xe6   :  { %2822 = vrsqrt.f32 %v3356_v62  ;;  %v2634_v26 = vmin.u32 %v882_v24, %v3386_v32  ;;  %vm1057_vm5 = vcmp.lt.s32.totalorder %v3390_v21, 4  ;;  %v985_v2 = vsub.s32 0, %v3418_v42 }
  0xe7   :  { %v1053_v48 = vor.u32 %v1052_v7, %v1051_v22  ;;  %vm1056_vm6 = vcmp.lt.s32.totalorder %v3390_v21, 3  ;;  %v1059_v13 = vsel %vm1057_vm5, %v1047_v20, 2102212464  ;;  %vm1055_vm7 = vcmp.lt.s32.totalorder %v3390_v21, 2  ;;  %v2815_v51 = vpop.eup %2814 }
  0xe8   :  { %v1062_v25 = vsel %vm1054_vm2, %v1041_v44, %v1044_v55  ;;  %v1063_v43 = vsel %vm1057_vm5, %v1050_v4, 920167782  ;;  %v1070_v18 = vshll.u32 %v1030_v14, 8  ;;  %v698_v40 = vsel %vm697_vm15, %v3231_v38, %v696_v39  ;;  %v2817_v59 = vpop.eup %2816 }
  0xe9   :  { %v703_v7 = vmul.f32 %v3332_v9, %v3233_v47  ;;  %vm713_vm8 = vcmp.eq.f32.partialorder %v3239_v52, 0.0  ;;  %v1058_v22 = vsel %vm1054_vm2, %v1038_v28, %v1041_v44  ;;  %v1129_v31 = vshrl.u32 %v1128_v57, 23  ;;  %v2819_v15 = vpop.eup %2818 }
  0xea   :  { %vm718_vm9 = vcmp.eq.f32.partialorder %v3250_v36, inf  ;;  %vm725_vm10 = vcmp.eq.f32.partialorder %v3269_v11, inf  ;;  %v2638_v14 = vmin.u32 %v985_v2, %v3418_v42  ;;  %v1060_v24 = vsel %vm1056_vm6, %v1044_v55, %v1059_v13 }
  0xeb   :  { %v1064_v39 = vsel %vm1056_vm6, %v1047_v20, %v1063_v43  ;;  %v1066_v9 = vsel %vm1054_vm2, %v1044_v55, %v1047_v20  ;;  %v884_v44 = vclz %v2634_v26  ;;  %v1067_v23 = vsel %vm1057_vm5, %v1053_v48, 1326507024 }
  0xec   :  { %v1065_v57 = vsel %vm1055_vm7, %v1062_v25, %v1064_v39  ;;  %v5234_v2 = vand.u32 2147483648, %v3231_v38  ;;  %v1068_v43 = vsel %vm1056_vm6, %v1050_v4, %v1067_v23  ;;  %v710_v26 = vmul.f32 %v2809_v1, %v3239_v52 }
  0xed   :  { %v3467_v20 = vmul.u32.u64.low %v1070_v18, %v1065_v57  ;;  %v3468_v55 = vmul.u32.u64.high %v1070_v18, %v1065_v57, %v3467_v20  ;;  %v1061_v25 = vsel %vm1055_vm7, %v1058_v22, %v1060_v24  ;;  %v1069_v48 = vsel %vm1055_vm7, %v1066_v9, %v1068_v43 }
  0xee   :  { %v3463_v13 = vsel %vm699_vm0, %v5234_v2, %v698_v40  ;;  %v2645_v39 = vadd.s32 4294967169, %v1129_v31  ;;  %v705_v38 = vsel %vm704_vm1, %v3233_v47, %v703_v7  ;;  %v987_v40 = vclz %v2638_v14  ;;  %v2821_v4 = vpop.eup %2820 }
  0xef   :  { %5235 = vst [vmem:[#allocation28_spill] sm:$0xff] %v3463_v13  ;;  %v3479_v2 = vmul.u32.u64.low %v1070_v18, %v1069_v48  ;;  %v3480_v23 = vmul.u32.u64.high %v1070_v18, %v1069_v48, %v3479_v2  ;;  %2824 = vrsqrt.f32 %v3358_v12  ;;  %v2635_v57 = vadd.s32 4294967294, %v884_v44 }
  0xf0   :  { %v1135_v28 = vadd.s32 1, %v2645_v39  ;;  %2826 = vrsqrt.f32 %v3362_v37  ;;  %v1077_v21 = vmul.u32 %v1070_v18, %v1061_v25  ;;  %v1080_v22 = vadd.s32 1, %v3468_v55 }
  0xf1   :  { %v5182_v31 = vand.u32 2147483647, %v3171_v49  ;;  %v5236_v7 = vand.u32 2147483648, %v3233_v47  ;;  %v712_v24 = vsel %vm711_vm4, %v3239_v52, %v710_v26  ;;  %v717_v9 = vmul.f32 %v2811_v0, %v3250_v36 }
  0xf2   :  { %v724_v44 = vmul.f32 %v2813_v53, %v3269_v11  ;;  %v2639_v43 = vadd.s32 4294967294, %v987_v40  ;;  %vm1079_vm11 = vc.u32 %v3480_v23, %v3467_v20  ;;  %vm1136_vm12 = vcmp.gt.s32.totalorder %v1135_v28, 0 }
  0xf3   :  { %v3491_v14 = vsel %vm706_vm3, %v5236_v7, %v705_v38  ;;  %v3501_v25 = vpop.eup %2822  ;;  %2828 = vrsqrt.f32 %v3368_v34  ;;  %vm2636_vm13 = vcmp.lt.s32.totalorder %v2635_v57, 0  ;;  %v1081_v47 = vsel %vm1079_vm11, %v1080_v22, %v3468_v55 }
  0xf4   :  { %5237 = vst [vmem:[#allocation29_spill] sm:$0xff] %v3491_v14  ;;  %v1137_v48 = vsel %vm1136_vm12, %v1135_v28, 0  ;;  %v5238_v26 = vand.u32 2147483648, %v3239_v52  ;;  %v1082_v53 = vadd.s32 %v1081_v47, %v1077_v21  ;;  %v3513_v39 = vand.u32 8388607, %v5182_v31 }
  0xf5   :  { %v1139_v38 = vand.u32 31, %v1137_v48  ;;  %v3518_v40 = vsel %vm718_vm9, %v3250_v36, %v717_v9  ;;  %v3523_v28 = vsel %vm725_vm10, %v3269_v11, %v724_v44  ;;  %v3526_v52 = vmul.f32 %v2815_v51, %v3290_v8 }
  0xf6   :  { %v3509_v0 = vsel %vm713_vm8, %v5238_v26, %v712_v24  ;;  %v3529_v2 = vsel %vm2636_vm13, 0, %v2635_v57  ;;  %vm2640_vm14 = vcmp.lt.s32.totalorder %v2639_v43, 0  ;;  %v1083_v21 = vadd.s32 536870912, %v1082_v53 }
  0xf7   :  { %5239 = vst [vmem:[#allocation30_spill] sm:$0xff] %v3509_v0  ;;  %v1140_v22 = vsub.s32 32, %v1139_v38  ;;  %v3532_v7 = vmul.f32 %v2817_v59, %v3296_v6  ;;  %v3535_v24 = vmul.f32 %v2819_v15, %v3303_v61  ;;  %v3538_v9 = vmul.f32 %v2821_v4, %v3335_v45 }
  0xf8   :  { %v872_v51 = vadd.s32 %v3280_v46, %v3288_v16  ;;  %v888_v44 = vsub.s32 32, %v3529_v2  ;;  %v975_v57 = vadd.s32 %v3341_v41, %v3353_v3  ;;  %v3545_v47 = vshrl.u32 %v1083_v21, 30 }
  0xf9   :  { %v1133_v26 = vor.u32 8388608, %v3513_v39  ;;  %v892_v59 = vsub.s32 4294967266, %v3529_v2  ;;  %v3549_v55 = vsel %vm2640_vm14, 0, %v2639_v43  ;;  %v3551_v15 = vshrl.u32 %v1137_v48, 5 }
  0xfa   :  { %5240 = vst [vmem:[#allocation31_spill] sm:$0xff] %v3545_v47  ;;  %v1142_v4 = vshll.u32 %v5225_v35, %v1139_v38  ;;  %v1085_v31 = vshll.u32 %v3545_v47, 30  ;;  %v1145_v46 = vshll.u32 %v5226_v10, %v1139_v38  ;;  %v1148_v16 = vshll.u32 %v5227_v29, %v1139_v38 }
  0xfb   :  { %v1149_v41 = vshrl.u32 %v5228_v56, %v1140_v22  ;;  %v1143_v3 = vshrl.u32 %v5226_v10, %v1140_v22  ;;  %v1146_v39 = vshrl.u32 %v5227_v29, %v1140_v22  ;;  %v1151_v21 = vshll.u32 %v5228_v56, %v1139_v38 }
  0xfc   :  { %v1152_v43 = vshrl.u32 %v5230_v63, %v1140_v22  ;;  %v3562_v48 = vpop.eup %2824  ;;  %v995_v18 = vsub.s32 4294967266, %v3549_v55  ;;  %v3565_v1 = vsub.s32 %v1082_v53, %v1085_v31  ;;  %v1154_v0 = vshll.u32 %v5230_v63, %v1139_v38 }
  0xfd   :  { %v1155_v14 = vshrl.u32 %v5233_v33, %v1140_v22  ;;  %v3569_v13 = vpop.eup %2826  ;;  %vm732_vm15 = vcmp.eq.f32.partialorder %v3290_v8, inf  ;;  %v889_v58 = vshll.u32 %v3386_v32, %v3529_v2  ;;  %v890_v49 = vshrl.u32 %v872_v51, %v888_v44 }
  0xfe   :  { %v893_v19 = vadd.s32 127, %v892_v59  ;;  %v1231_v27 = vand.u32 2139095040, %v3173_v50  ;;  %vm739_vm0 = vcmp.eq.f32.partialorder %v3296_v6, inf  ;;  %vm746_vm1 = vcmp.eq.f32.partialorder %v3303_v61, inf }
  0xff   :  { %vm753_vm2 = vcmp.eq.f32.partialorder %v3335_v45, inf  ;;  %v991_v31 = vsub.s32 32, %v3549_v55  ;;  %v1088_v53 = vsub.s32 0, %v3565_v1  ;;  %v1141_v38 = vshrl.u32 %v5225_v35, %v1140_v22 }
 0x100   :  { %v1150_v47 = vor.u32 %v1149_v41, %v1148_v16  ;;  %v1144_v60 = vor.u32 %v1143_v3, %v1142_v4  ;;  %v1147_v34 = vor.u32 %v1146_v39, %v1145_v46  ;;  %v1153_v32 = vor.u32 %v1152_v43, %v1151_v21  ;;  %v3582_v2 = vpop.eup %2828 }
 0x101   :  { %vm1160_vm3 = vcmp.lt.s32.totalorder %v3551_v15, 4  ;;  %v996_v51 = vadd.s32 127, %v995_v18  ;;  %v1156_v44 = vor.u32 %v1155_v14, %v1154_v0  ;;  %vm1157_vm4 = vcmp.lt.s32.totalorder %v3551_v15, 1 }
 0x102   :  { %v1162_v59 = vsel %vm1160_vm3, %v1150_v47, 2102212464  ;;  %v894_v33 = vshll.u32 %v893_v19, 23  ;;  %v2642_v63 = vmin.u32 %v1088_v53, %v3565_v1  ;;  %vm1159_vm5 = vcmp.lt.s32.totalorder %v3551_v15, 3 }
 0x103   :  { %v1232_v22 = vshrl.u32 %v1231_v27, 23  ;;  %vm720_vm6 = vcmp.eq.f32.partialorder %v3250_v36, 0.0  ;;  %vm727_vm7 = vcmp.eq.f32.partialorder %v3269_v11, 0.0  ;;  %v992_v4 = vshll.u32 %v3418_v42, %v3549_v55 }
 0x104   :  { %v993_v18 = vshrl.u32 %v975_v57, %v991_v31  ;;  %vm1158_vm8 = vcmp.lt.s32.totalorder %v3551_v15, 2  ;;  %v1173_v14 = vshll.u32 %v1133_v26, 8  ;;  %vm734_vm9 = vcmp.eq.f32.partialorder %v3290_v8, 0.0 }
 0x105   :  { %vm741_vm10 = vcmp.eq.f32.partialorder %v3296_v6, 0.0  ;;  %vm748_vm11 = vcmp.eq.f32.partialorder %v3303_v61, 0.0  ;;  %v1161_v27 = vsel %vm1157_vm4, %v1141_v38, %v1144_v60  ;;  %v1163_v19 = vsel %vm1159_vm5, %v1147_v34, %v1162_v59 }
 0x106   :  { %v1165_v0 = vsel %vm1157_vm4, %v1144_v60, %v1147_v34  ;;  %v1166_v42 = vsel %vm1160_vm3, %v1153_v32, 920167782  ;;  %vm755_vm12 = vcmp.eq.f32.partialorder %v3335_v45, 0.0  ;;  %v997_v55 = vshll.u32 %v996_v51, 23 }
 0x107   :  { %v1167_v57 = vsel %vm1159_vm5, %v1150_v47, %v1166_v42  ;;  %v1169_v26 = vsel %vm1157_vm4, %v1147_v34, %v1150_v47  ;;  %v1170_v46 = vsel %vm1160_vm3, %v1156_v44, 1326507024  ;;  %vm760_vm13 = vcmp.eq.f32.partialorder %v3356_v62, inf }
 0x108   :  { %v1090_v16 = vclz %v2642_v63  ;;  %v1168_v60 = vsel %vm1158_vm8, %v1165_v0, %v1167_v57  ;;  %v1171_v41 = vsel %vm1159_vm5, %v1153_v32, %v1170_v46  ;;  %v2649_v3 = vadd.s32 4294967169, %v1232_v22 }
 0x109   :  { %v1164_v39 = vsel %vm1158_vm8, %v1161_v27, %v1163_v19  ;;  %v1172_v21 = vsel %vm1158_vm8, %v1169_v26, %v1171_v41  ;;  %v3621_v34 = vmul.u32.u64.low %v1173_v14, %v1168_v60  ;;  %v3622_v47 = vmul.u32.u64.high %v1173_v14, %v1168_v60, %v3621_v34 }
 0x10a   :  { %v891_v43 = vor.u32 %v890_v49, %v889_v58  ;;  %v895_v31 = vor.u32 4788187, %v894_v33  ;;  %v3625_v63 = vmul.u32.u64.low %v1173_v14, %v1172_v21  ;;  %v3626_v53 = vmul.u32.u64.high %v1173_v14, %v1172_v21, %v3625_v63 }
 0x10b   :  { %v733_v38 = vsel %vm732_vm15, %v3290_v8, %v3526_v52  ;;  %v994_v32 = vor.u32 %v993_v18, %v992_v4  ;;  %v998_v51 = vor.u32 4788187, %v997_v55  ;;  %v1238_v44 = vadd.s32 1, %v2649_v3 }
 0x10c   :  { %v740_v15 = vsel %vm739_vm0, %v3296_v6, %v3532_v7  ;;  %v747_v49 = vsel %vm746_vm1, %v3303_v61, %v3535_v24  ;;  %v754_v58 = vsel %vm753_vm2, %v3335_v45, %v3538_v9  ;;  %v1180_v33 = vmul.u32 %v1173_v14, %v1164_v39 }
 0x10d   :  { %v759_v52 = vmul.f32 %v3501_v25, %v3356_v62  ;;  %v2643_v59 = vadd.s32 4294967294, %v1090_v16  ;;  %v1183_v22 = vadd.s32 1, %v3622_v47  ;;  %vm1239_vm14 = vcmp.gt.s32.totalorder %v1238_v44, 0 }
 0x10e   :  { %v896_v4 = vand.u32 2147483647, %v895_v31  ;;  %v898_v7 = vcvt.s32.f32 %v891_v43  ;;  %vm1182_vm15 = vc.u32 %v3626_v53, %v3621_v34  ;;  %v1240_v18 = vsel %vm1239_vm14, %v1238_v44, 0 }
 0x10f   :  { %v999_v24 = vand.u32 2147483647, %v998_v51  ;;  %v1001_v27 = vcvt.s32.f32 %v994_v32  ;;  %v1184_v19 = vsel %vm1182_vm15, %v1183_v22, %v3622_v47  ;;  %v5198_v9 = vand.u32 2147483647, %v3173_v50 }
 0x110   :  { %v5241_v14 = vand.u32 2147483648, %v3250_v36  ;;  %v5242_v0 = vand.u32 2147483648, %v3269_v11  ;;  %v1185_v55 = vadd.s32 %v1184_v19, %v1180_v33  ;;  %v1242_v57 = vand.u32 31, %v1240_v18 }
 0x111   :  { %v5243_v26 = vand.u32 2147483648, %v3290_v8  ;;  %v5244_v16 = vand.u32 2147483648, %v3296_v6  ;;  %vm2644_vm0 = vcmp.lt.s32.totalorder %v2643_v59, 0  ;;  %v3689_v60 = vmul.f32 %v898_v7, %v896_v4 }
 0x112   :  { %v3656_v25 = vsel %vm720_vm6, %v5241_v14, %v3518_v40  ;;  %v3663_v42 = vsel %vm727_vm7, %v5242_v0, %v3523_v28  ;;  %v5245_v40 = vand.u32 2147483648, %v3303_v61  ;;  %v5247_v28 = vand.u32 2147483648, %v3335_v45 }
 0x113   :  { %v3669_v46 = vsel %vm734_vm9, %v5243_v26, %v733_v38  ;;  %v3675_v36 = vsel %vm741_vm10, %v5244_v16, %v740_v15  ;;  %v1186_v41 = vadd.s32 536870912, %v1185_v55  ;;  %v1243_v3 = vsub.s32 32, %v1242_v57 }
 0x114   :  { %v3681_v11 = vsel %vm748_vm11, %v5245_v40, %v747_v49  ;;  %v3687_v8 = vsel %vm755_vm12, %v5247_v28, %v754_v58  ;;  %v3694_v6 = vsel %vm760_vm13, %v3356_v62, %v759_v52  ;;  %v3698_v61 = vmul.f32 %v3562_v48, %v3358_v12 }
 0x115   :  { %5246 = vst [vmem:[#allocation32_spill] sm:$0xff] %v3681_v11  ;;  %5248 = vst [vmem:[#allocation33_spill] sm:$0xff] %v3687_v8  ;;  %v3700_v39 = vmul.f32 %v1001_v27, %v999_v24  ;;  %v1235_v45 = vand.u32 8388607, %v5198_v9  ;;  %v3706_v21 = vmul.f32 %v3569_v13, %v3362_v37  ;;  %v902_v47 = vsub.s32 4, %v3346_v17 }
 0x116   :  { %v3709_v43 = vsel %vm2644_vm0, 0, %v2643_v59  ;;  %v3711_v31 = vshrl.u32 %v1186_v41, 30  ;;  %v1245_v63 = vshll.u32 %v5225_v35, %v1242_v57  ;;  %v1246_v48 = vshrl.u32 %v5226_v10, %v1243_v3 }
 0x117   :  { %v1248_v38 = vshll.u32 %v5226_v10, %v1242_v57  ;;  %v1249_v32 = vshrl.u32 %v5227_v29, %v1243_v3  ;;  %v900_v51 = vxor.u32 2147483648, %v3689_v60  ;;  %v1241_v44 = vshrl.u32 %v1240_v18, 5 }
 0x118   :  { %v1251_v13 = vshll.u32 %v5227_v29, %v1242_v57  ;;  %v1252_v15 = vshrl.u32 %v5228_v56, %v1243_v3  ;;  %v1003_v49 = vxor.u32 2147483648, %v3700_v39  ;;  %v1078_v58 = vadd.s32 %v3467_v20, %v3480_v23 }
 0x119   :  { %v1236_v33 = vor.u32 8388608, %v1235_v45  ;;  %v1334_v52 = vand.u32 2139095040, %v3178_v5  ;;  %vm767_vm1 = vcmp.eq.f32.partialorder %v3358_v12, inf  ;;  %vm818_vm2 = vcmp.lt.s32.totalorder %v3147_v30, 0 }
 0x11a   :  { %vm921_vm3 = vcmp.lt.s32.totalorder %v3166_v54, 0  ;;  %v1098_v59 = vsub.s32 4294967266, %v3709_v43  ;;  %v1188_v22 = vshll.u32 %v3711_v31, 30  ;;  %v1254_v4 = vshll.u32 %v5228_v56, %v1242_v57 }
 0x11b   :  { %v5249_v7 = vmov 920167782   ;;  %v1247_v24 = vor.u32 %v1246_v48, %v1245_v63  ;;  %v1250_v27 = vor.u32 %v1249_v32, %v1248_v38  ;;  %v5250_v23 = vmov 1326507024  }
 0x11c   :  { %v1255_v18 = vshrl.u32 %v5249_v7, %v1243_v3  ;;  %v1257_v20 = vshll.u32 %v5249_v7, %v1242_v57  ;;  %v1258_v19 = vshrl.u32 %v5250_v23, %v1243_v3  ;;  %vm774_vm4 = vcmp.eq.f32.partialorder %v3362_v37, inf }
 0x11d   :  { %v1244_v14 = vshrl.u32 %v5225_v35, %v1243_v3  ;;  %v1253_v0 = vor.u32 %v1252_v15, %v1251_v13  ;;  %vm1260_vm5 = vcmp.lt.s32.totalorder %v1241_v44, 1  ;;  %v5251_v16 = vand.u32 2147483647, %v3147_v30 }
 0x11e   :  { %v1256_v26 = vor.u32 %v1255_v18, %v1254_v4  ;;  %v1094_v28 = vsub.s32 32, %v3709_v43  ;;  %v1259_v41 = vor.u32 %v1258_v19, %v1257_v20  ;;  %vm1263_vm7 = vcmp.lt.s32.totalorder %v1241_v44, 4 }
 0x11f   :  { %vm3737_vm6 = vcmp.le.f32.partialorder %v5251_v16, 0.7853982  ;;  %v1335_v57 = vshrl.u32 %v1334_v52, 23  ;;  %v5254_v45 = vand.u32 2147483647, %v3166_v54  ;;  %v1095_v3 = vshll.u32 %v3565_v1, %v3709_v43  ;;  %v5257_v43 = vld [vmem:[#allocation25_spill] sm:$0xff] }
 0x120   :  { %v1099_v48 = vadd.s32 127, %v1098_v59  ;;  %v3750_v38 = vsub.s32 %v1185_v55, %v1188_v22  ;;  %vm1262_vm9 = vcmp.lt.s32.totalorder %v1241_v44, 3  ;;  %vm1261_vm10 = vcmp.lt.s32.totalorder %v1241_v44, 2 }
 0x121   :  { %vm3744_vm8 = vcmp.le.f32.partialorder %v5254_v45, 0.7853982  ;;  %v1265_v32 = vsel %vm1263_vm7, %v1253_v0, 2102212464  ;;  %v1268_v13 = vsel %vm1260_vm5, %v1247_v24, %v1250_v27  ;;  %v1276_v15 = vshll.u32 %v1236_v33, 8 }
 0x122   :  { %vm762_vm11 = vcmp.eq.f32.partialorder %v3356_v62, 0.0  ;;  %vm769_vm12 = vcmp.eq.f32.partialorder %v3358_v12, 0.0  ;;  %v1264_v52 = vsel %vm1260_vm5, %v1244_v14, %v1247_v24  ;;  %v1266_v4 = vsel %vm1262_vm9, %v1250_v27, %v1265_v32 }
 0x123   :  { %v1269_v1 = vsel %vm1263_vm7, %v1256_v26, 920167782  ;;  %v1272_v55 = vsel %vm1260_vm5, %v1250_v27, %v1253_v0  ;;  %vm776_vm13 = vcmp.eq.f32.partialorder %v3362_v37, 0.0  ;;  %vm781_vm14 = vcmp.eq.f32.partialorder %v5257_v43, inf }
 0x124   :  { %v1096_v59 = vshrl.u32 %v1078_v58, %v1094_v28  ;;  %v1270_v22 = vsel %vm1262_vm9, %v1253_v0, %v1269_v1  ;;  %v1273_v33 = vsel %vm1263_vm7, %v1259_v41, 1326507024  ;;  %v2653_v18 = vadd.s32 4294967169, %v1335_v57  ;;  %v5258_v58 = vld [vmem:[#allocation26_spill] sm:$0xff] }
 0x125   :  { %v1100_v20 = vshll.u32 %v1099_v48, 23  ;;  %v1191_v19 = vsub.s32 0, %v3750_v38  ;;  %v1271_v24 = vsel %vm1261_vm10, %v1268_v13, %v1270_v22  ;;  %v1274_v14 = vsel %vm1262_vm9, %v1256_v26, %v1273_v33 }
 0x126   :  { %v1267_v16 = vsel %vm1261_vm10, %v1264_v52, %v1266_v4  ;;  %v1275_v27 = vsel %vm1261_vm10, %v1272_v55, %v1274_v14  ;;  %v3769_v45 = vmul.u32.u64.low %v1276_v15, %v1271_v24  ;;  %v3770_v32 = vmul.u32.u64.high %v1276_v15, %v1271_v24, %v3769_v45 }
 0x127   :  { %v1005_v0 = vsub.s32 4, %v5258_v58  ;;  %v3774_v28 = vmul.u32.u64.low %v1276_v15, %v1275_v27  ;;  %v3775_v41 = vmul.u32.u64.high %v1276_v15, %v1275_v27, %v3774_v28  ;;  %v1341_v57 = vadd.s32 1, %v2653_v18 }
 0x128   :  { %v768_v48 = vsel %vm767_vm1, %v3358_v12, %v3698_v61  ;;  %v901_v44 = vsel %vm818_vm2, %v900_v51, %v3689_v60  ;;  %v1004_v26 = vsel %vm921_vm3, %v1003_v49, %v3700_v39  ;;  %v1097_v13 = vor.u32 %v1096_v59, %v1095_v3 }
 0x129   :  { %v1101_v52 = vor.u32 4788187, %v1100_v20  ;;  %v2646_v4 = vmin.u32 %v1191_v19, %v3750_v38  ;;  %v1283_v1 = vmul.u32 %v1276_v15, %v1267_v16  ;;  %vm1342_vm15 = vcmp.gt.s32.totalorder %v1341_v57, 0 }
 0x12a   :  { %v775_v55 = vsel %vm774_vm4, %v3362_v37, %v3706_v21  ;;  %v780_v61 = vmul.f32 %v3582_v2, %v5257_v43  ;;  %v1286_v60 = vadd.s32 1, %v3770_v32  ;;  %v1343_v51 = vsel %vm1342_vm15, %v1341_v57, 0 }
 0x12b   :  { %v3800_v39 = vsel %vm818_vm2, %v902_v47, %v3346_v17  ;;  %v904_v49 = vsel %vm3737_vm6, %v3147_v30, %v901_v44  ;;  %v3808_v21 = vsel %vm921_vm3, %v1005_v0, %v5258_v58  ;;  %vm1285_vm0 = vc.u32 %v3775_v41, %v3769_v45 }
 0x12c   :  { %v3815_v2 = vsel %vm3744_vm8, %v3166_v54, %v1004_v26  ;;  %v1287_v17 = vsel %vm1285_vm0, %v1286_v60, %v3770_v32  ;;  %v5197_v47 = vand.u32 2147483647, %v3178_v5  ;;  %v1345_v3 = vand.u32 31, %v1343_v51  ;;  %v5268_v32 = vld [vmem:[#allocation13_spill] sm:$0xff] }
 0x12d   :  { %v1102_v15 = vand.u32 2147483647, %v1101_v52  ;;  %v1104_v59 = vcvt.s32.f32 %v1097_v13  ;;  %v1193_v22 = vclz %v2646_v4  ;;  %v1288_v33 = vadd.s32 %v1287_v17, %v1283_v1 }
 0x12e   :  { %v5259_v18 = vand.u32 2147483648, %v3356_v62  ;;  %v5261_v19 = vand.u32 2147483648, %v3358_v12  ;;  %2830 = vcosq.f32 %v904_v49  ;;  %v1346_v14 = vsub.s32 32, %v1345_v3 }
 0x12f   :  { %v5263_v16 = vand.u32 2147483648, %v3362_v37  ;;  %v3841_v62 = vsel %vm781_vm14, %v5257_v43, %v780_v61  ;;  %2832 = vsinq.f32 %v904_v49  ;;  %v5266_v37 = vld [vmem:[#allocation31_spill] sm:$0xff]  ;;  %v3851_v0 = vmul.f32 %v1104_v59, %v1102_v15 }
 0x130   :  { %v3824_v20 = vsel %vm762_vm11, %v5259_v18, %v3694_v6  ;;  %v3830_v24 = vsel %vm769_vm12, %v5261_v19, %v768_v48  ;;  %5265 = vst [vmem:[#allocation36_spill] sm:$0xff] %v3841_v62  ;;  %v1289_v6 = vadd.s32 536870912, %v1288_v33  ;;  %2834 = vcosq.f32 %v3815_v2  ;;  %v5267_v59 = vld [vmem:[#allocation11_spill] sm:$0xff] }
 0x131   :  { %5260 = vst [vmem:[#allocation26_spill] sm:$0xff] %v3824_v20  ;;  %5262 = vst [vmem:[#allocation34_spill] sm:$0xff] %v3830_v24  ;;  %v3836_v27 = vsel %vm776_vm13, %v5263_v16, %v775_v55  ;;  %v2647_v28 = vadd.s32 4294967294, %v1193_v22  ;;  %v1338_v48 = vand.u32 8388607, %v5197_v47  ;;  %v1348_v44 = vshll.u32 %v5225_v35, %v1345_v3 }
 0x132   :  { %5264 = vst [vmem:[#allocation35_spill] sm:$0xff] %v3836_v27  ;;  %v3853_v57 = vshrl.u32 %v1289_v6, 30  ;;  %v1349_v26 = vshrl.u32 %v5226_v10, %v1346_v14  ;;  %v1351_v13 = vshll.u32 %v5226_v10, %v1345_v3  ;;  %v1352_v52 = vshrl.u32 %v5227_v29, %v1346_v14 }
 0x133   :  { %v1344_v1 = vshrl.u32 %v1343_v51, 5  ;;  %v1354_v55 = vshll.u32 %v5227_v29, %v1345_v3  ;;  %v1355_v61 = vshrl.u32 %v5228_v56, %v1346_v14  ;;  %v1181_v60 = vadd.s32 %v3621_v34, %v3626_v53 }
 0x134   :  { %v1291_v4 = vshll.u32 %v3853_v57, 30  ;;  %v1357_v49 = vshll.u32 %v5228_v56, %v1345_v3  ;;  %v1358_v17 = vshrl.u32 %v5249_v7, %v1346_v14  ;;  %v1360_v15 = vshll.u32 %v5249_v7, %v1345_v3 }
 0x135   :  { %vm1024_vm1 = vcmp.lt.s32.totalorder %v5267_v59, 0  ;;  %vm2648_vm2 = vcmp.lt.s32.totalorder %v2647_v28, 0  ;;  %v1339_v18 = vor.u32 8388608, %v1338_v48  ;;  %v1361_v51 = vshrl.u32 %v5250_v23, %v1346_v14 }
 0x136   :  { %v3870_v22 = vsub.s32 %v1288_v33, %v1291_v4  ;;  %v1106_v19 = vxor.u32 2147483648, %v3851_v0  ;;  %v1347_v16 = vshrl.u32 %v5225_v35, %v1346_v14  ;;  %v1350_v6 = vor.u32 %v1349_v26, %v1348_v44 }
 0x137   :  { %v1353_v34 = vor.u32 %v1352_v52, %v1351_v13  ;;  %v1356_v47 = vor.u32 %v1355_v61, %v1354_v55  ;;  %v1359_v9 = vor.u32 %v1358_v17, %v1357_v49  ;;  %vm1363_vm3 = vcmp.lt.s32.totalorder %v1344_v1, 1 }
 0x138   :  { %v1294_v53 = vsub.s32 0, %v3870_v22  ;;  %v1196_v3 = vsel %vm2648_vm2, 0, %v2647_v28  ;;  %v1362_v58 = vor.u32 %v1361_v51, %v1360_v15  ;;  %vm1366_vm4 = vcmp.lt.s32.totalorder %v1344_v1, 4 }
 0x139   :  { %v1437_v33 = vand.u32 2139095040, %v5268_v32  ;;  %v1197_v4 = vsub.s32 32, %v1196_v3  ;;  %vm1365_vm5 = vcmp.lt.s32.totalorder %v1344_v1, 3  ;;  %v1379_v12 = vshll.u32 %v1339_v18, 8 }
 0x13a   :  { %v2650_v48 = vmin.u32 %v1294_v53, %v3870_v22  ;;  %v5269_v27 = vand.u32 2147483647, %v5267_v59  ;;  %vm1364_vm9 = vcmp.lt.s32.totalorder %v1344_v1, 2  ;;  %v1367_v44 = vsel %vm1363_vm3, %v1347_v16, %v1350_v6 }
 0x13b   :  { %v1368_v28 = vsel %vm1366_vm4, %v1356_v47, 2102212464  ;;  %v1371_v26 = vsel %vm1363_vm3, %v1350_v6, %v1353_v34  ;;  %v3887_v13 = vpop.eup %2830  ;;  %v1372_v61 = vsel %vm1366_vm4, %v1359_v9, 920167782  ;;  %v1375_v49 = vsel %vm1363_vm3, %v1353_v34, %v1356_v47 }
 0x13c   :  { %vm3880_vm7 = vcmp.le.f32.partialorder %v5269_v27, 0.7853982  ;;  %v1296_v52 = vclz %v2650_v48  ;;  %v1369_v55 = vsel %vm1365_vm5, %v1353_v34, %v1368_v28  ;;  %v3892_v27 = vpop.eup %2832  ;;  %v1201_v17 = vsub.s32 4294967266, %v1196_v3 }
 0x13d   :  { %v1373_v15 = vsel %vm1365_vm5, %v1356_v47, %v1372_v61  ;;  %v1376_v18 = vsel %vm1366_vm4, %v1362_v58, 1326507024  ;;  %v1438_v51 = vshrl.u32 %v1437_v33, 23  ;;  %v3896_v16 = vpop.eup %2834  ;;  %v1370_v53 = vsel %vm1364_vm9, %v1367_v44, %v1369_v55 }
 0x13e   :  { %v2651_v6 = vadd.s32 4294967294, %v1296_v52  ;;  %v1374_v48 = vsel %vm1364_vm9, %v1371_v26, %v1373_v15  ;;  %v1377_v28 = vsel %vm1365_vm5, %v1359_v9, %v1376_v18  ;;  %2836 = vsinq.f32 %v3815_v2 }
 0x13f   :  { %v1378_v62 = vsel %vm1364_vm9, %v1375_v49, %v1377_v28  ;;  %v3902_v34 = vmul.u32.u64.low %v1379_v12, %v1374_v48  ;;  %v3903_v43 = vmul.u32.u64.high %v1379_v12, %v1374_v48, %v3902_v34  ;;  %v2657_v24 = vadd.s32 4294967169, %v1438_v51  ;;  %v5275_v28 = vld [vmem:[#allocation12_spill] sm:$0xff] }
 0x140   :  { %vm2652_vm10 = vcmp.lt.s32.totalorder %v2651_v6, 0  ;;  %v3907_v47 = vmul.u32.u64.low %v1379_v12, %v1378_v62  ;;  %v3908_v58 = vmul.u32.u64.high %v1379_v12, %v1378_v62, %v3907_v47  ;;  %v1107_v33 = vsel %vm1024_vm1, %v1106_v19, %v3851_v0 }
 0x141   :  { %v1202_v44 = vadd.s32 127, %v1201_v17  ;;  %v1299_v26 = vsel %vm2652_vm10, 0, %v2651_v6  ;;  %v1444_v9 = vadd.s32 1, %v2657_v24  ;;  %v1198_v1 = vshll.u32 %v3750_v38, %v1196_v3 }
 0x142   :  { %v1199_v52 = vshrl.u32 %v1181_v60, %v1197_v4  ;;  %v1304_v55 = vsub.s32 4294967266, %v1299_v26  ;;  %v1386_v61 = vmul.u32 %v1379_v12, %v1370_v53  ;;  %v1284_v49 = vadd.s32 %v3769_v45, %v3775_v41 }
 0x143   :  { %v1300_v2 = vsub.s32 32, %v1299_v26  ;;  %v1389_v15 = vadd.s32 1, %v3903_v43  ;;  %vm1445_vm11 = vcmp.gt.s32.totalorder %v1444_v9, 0  ;;  %v5272_v62 = vsel %vm3737_vm6, 0, %v3800_v39 }
 0x144   :  { %v3921_v0 = vand.u32 3, %v5272_v62  ;;  %v5273_v38 = vsel %vm3744_vm8, 0, %v3808_v21  ;;  %v1305_v12 = vadd.s32 127, %v1304_v55  ;;  %vm1388_vm12 = vc.u32 %v3908_v58, %v3902_v34 }
 0x145   :  { %v3927_v24 = vand.u32 3, %v5273_v38  ;;  %v5274_v45 = vsub.s32 4, %v5266_v37  ;;  %v1203_v41 = vshll.u32 %v1202_v44, 23  ;;  %v1390_v39 = vsel %vm1388_vm12, %v1389_v15, %v3903_v43 }
 0x146   :  { %v1446_v60 = vsel %vm1445_vm11, %v1444_v9, 0  ;;  %v1110_v63 = vsel %vm3880_vm7, %v5267_v59, %v1107_v33  ;;  %v1200_v21 = vor.u32 %v1199_v52, %v1198_v1  ;;  %v1391_v19 = vadd.s32 %v1390_v39, %v1386_v61 }
 0x147   :  { %v3936_v40 = vsel %vm1024_vm1, %v5274_v45, %v5266_v37  ;;  %v5200_v3 = vand.u32 2147483647, %v5268_v32  ;;  %v1301_v4 = vshll.u32 %v3870_v22, %v1299_v26  ;;  %v1302_v17 = vshrl.u32 %v1284_v49, %v1300_v2 }
 0x148   :  { %v1306_v18 = vshll.u32 %v1305_v12, 23  ;;  %v1448_v51 = vand.u32 31, %v1446_v60  ;;  %v1392_v53 = vadd.s32 536870912, %v1391_v19  ;;  %2838 = vcosq.f32 %v1110_v63 }
 0x149   :  { %vm1127_vm6 = vcmp.lt.s32.totalorder %v5275_v28, 0  ;;  %v1204_v47 = vor.u32 4788187, %v1203_v41  ;;  %2840 = vsinq.f32 %v1110_v63  ;;  %v1211_v22 = vsub.s32 4, %v3711_v31 }
 0x14a   :  { %v1449_v33 = vsub.s32 32, %v1448_v51  ;;  %v3952_v44 = vshrl.u32 %v1392_v53, 30  ;;  %v1441_v26 = vand.u32 8388607, %v5200_v3  ;;  %v1207_v9 = vcvt.s32.f32 %v1200_v21 }
 0x14b   :  { %v1303_v1 = vor.u32 %v1302_v17, %v1301_v4  ;;  %v1307_v52 = vor.u32 4788187, %v1306_v18  ;;  %v1451_v55 = vshll.u32 %v5225_v35, %v1448_v51  ;;  %v1454_v2 = vshll.u32 %v5226_v10, %v1448_v51  ;;  %v3961_v62 = vpop.eup %2836  ;;  %v5276_v4 = vld [vmem:[#allocation14_spill] sm:$0xff] }
 0x14c   :  { %v1394_v61 = vshll.u32 %v3952_v44, 30  ;;  %v1452_v49 = vshrl.u32 %v5226_v10, %v1449_v33  ;;  %v1455_v15 = vshrl.u32 %v5227_v29, %v1449_v33  ;;  %v1205_v38 = vand.u32 2147483647, %v1204_v47 }
 0x14d   :  { %v1447_v12 = vshrl.u32 %v1446_v60, 5  ;;  %v1457_v45 = vshll.u32 %v5227_v29, %v1448_v51  ;;  %v1458_v41 = vshrl.u32 %v5228_v56, %v1449_v33  ;;  %v1442_v63 = vor.u32 8388608, %v1441_v26 }
 0x14e   :  { %v3965_v39 = vsub.s32 %v1391_v19, %v1394_v61  ;;  %v1460_v21 = vshll.u32 %v5228_v56, %v1448_v51  ;;  %v1540_v17 = vand.u32 2139095040, %v5276_v4  ;;  %vm911_vm8 = vcmp.eq.s32.totalorder %v3921_v0, 0 }
 0x14f   :  { %vm914_vm13 = vcmp.eq.s32.totalorder %v3921_v0, 2  ;;  %v1308_v18 = vand.u32 2147483647, %v1307_v52  ;;  %v1310_v53 = vcvt.s32.f32 %v1303_v1  ;;  %v1461_v47 = vshrl.u32 %v5249_v7, %v1449_v33 }
 0x150   :  { %v1463_v60 = vshll.u32 %v5249_v7, %v1448_v51  ;;  %vm1014_vm14 = vcmp.eq.s32.totalorder %v3927_v24, 0  ;;  %vm1017_vm15 = vcmp.eq.s32.totalorder %v3927_v24, 2  ;;  %v1397_v19 = vsub.s32 0, %v3965_v39 }
 0x151   :  { %v1453_v26 = vor.u32 %v1452_v49, %v1451_v55  ;;  %v1456_v61 = vor.u32 %v1455_v15, %v1454_v2  ;;  %v1464_v3 = vshrl.u32 %v5250_v23, %v1449_v33  ;;  %v1015_v48 = vxor.u32 2147483648, %v3961_v62 }
 0x152   :  { %v1459_v43 = vor.u32 %v1458_v41, %v1457_v45  ;;  %v1462_v6 = vor.u32 %v1461_v47, %v1460_v21  ;;  %vm1466_vm0 = vcmp.lt.s32.totalorder %v1447_v12, 1  ;;  %v1208_v1 = vmul.f32 %v1207_v9, %v1205_v38 }
 0x153   :  { %v1212_v51 = vsel %vm1127_vm6, %v1211_v22, %v3711_v31  ;;  %vm1230_vm1 = vcmp.lt.s32.totalorder %v3173_v50, 0  ;;  %v1450_v52 = vshrl.u32 %v5225_v35, %v1449_v33  ;;  %v1482_v37 = vshll.u32 %v1442_v63, 8 }
 0x154   :  { %v5277_v55 = vand.u32 2147483647, %v5275_v28  ;;  %v1311_v2 = vmul.f32 %v1310_v53, %v1308_v18  ;;  %v1465_v15 = vor.u32 %v1464_v3, %v1463_v60  ;;  %vm1468_vm3 = vcmp.lt.s32.totalorder %v1447_v12, 3 }
 0x155   :  { %v1541_v45 = vshrl.u32 %v1540_v17, 23  ;;  %vm910_vm4 = vcmp.lt.s32.totalorder %v3921_v0, 2  ;;  %vm1013_vm5 = vcmp.lt.s32.totalorder %v3927_v24, 2  ;;  %v2654_v31 = vmin.u32 %v1397_v19, %v3965_v39  ;;  %v3994_v63 = vpop.eup %2838 }
 0x156   :  { %vm3985_vm2 = vcmp.le.f32.partialorder %v5277_v55, 0.7853982  ;;  %vm1467_vm9 = vcmp.lt.s32.totalorder %v1447_v12, 2  ;;  %vm1469_vm10 = vcmp.lt.s32.totalorder %v1447_v12, 4  ;;  %v1474_v33 = vsel %vm1466_vm0, %v1453_v26, %v1456_v61  ;;  %v4000_v53 = vpop.eup %2840 }
 0x157   :  { %v1471_v22 = vsel %vm1469_vm10, %v1459_v43, 2102212464  ;;  %v1475_v9 = vsel %vm1469_vm10, %v1462_v6, 920167782  ;;  %v1478_v38 = vsel %vm1466_vm0, %v1456_v61, %v1459_v43  ;;  %v1479_v41 = vsel %vm1469_vm10, %v1465_v15, 1326507024 }
 0x158   :  { %v1470_v3 = vsel %vm1466_vm0, %v1450_v52, %v1453_v26  ;;  %v1472_v21 = vsel %vm1468_vm3, %v1456_v61, %v1471_v22  ;;  %v1476_v17 = vsel %vm1468_vm3, %v1459_v43, %v1475_v9  ;;  %v1480_v18 = vsel %vm1468_vm3, %v1462_v6, %v1479_v41 }
 0x159   :  { %v1209_v47 = vxor.u32 2147483648, %v1208_v1  ;;  %v1477_v60 = vsel %vm1467_vm9, %v1474_v33, %v1476_v17  ;;  %v1481_v19 = vsel %vm1467_vm9, %v1478_v38, %v1480_v18  ;;  %v2661_v55 = vadd.s32 4294967169, %v1541_v45 }
 0x15a   :  { %v1312_v20 = vxor.u32 2147483648, %v1311_v2  ;;  %v1399_v15 = vclz %v2654_v31  ;;  %v4004_v8 = vmul.u32.u64.low %v1482_v37, %v1481_v19  ;;  %v4005_v11 = vmul.u32.u64.high %v1482_v37, %v1481_v19, %v4004_v8 }
 0x15b   :  { %v1473_v26 = vsel %vm1467_vm9, %v1470_v3, %v1472_v21  ;;  %v4008_v61 = vmul.u32.u64.low %v1482_v37, %v1477_v60  ;;  %v4009_v52 = vmul.u32.u64.high %v1482_v37, %v1477_v60, %v4008_v61  ;;  %v1547_v6 = vadd.s32 1, %v2661_v55 }
 0x15c   :  { %v5280_v43 = vxor.u32 2147483648, %v3892_v27  ;;  %v5281_v45 = vxor.u32 2147483648, %v3887_v13  ;;  %v5282_v8 = vsel %vm3880_vm7, 0, %v3936_v40  ;;  %v5283_v22 = vand.u32 2147483647, %v3173_v50 }
 0x15d   :  { %v4026_v12 = vand.u32 3, %v5282_v8  ;;  %v1016_v38 = vsel %vm1014_vm14, %v3896_v16, %v1015_v48  ;;  %vm1548_vm7 = vcmp.gt.s32.totalorder %v1547_v6, 0  ;;  %v1214_v40 = vsel %vm3985_vm2, 0, %v1212_v51 }
 0x15e   :  { %v913_v33 = vsel %vm911_vm8, %v3887_v13, %v5280_v43  ;;  %v916_v31 = vsel %vm914_vm13, %v5281_v45, %v3892_v27  ;;  %vm4030_vm11 = vcmp.le.f32.partialorder %v5283_v22, 0.7853982  ;;  %v5286_v13 = vxor.u32 2147483648, %v3896_v16  ;;  %v5287_v43 = vld [vmem:[#allocation15_spill] sm:$0xff] }
 0x15f   :  { %v1210_v27 = vsel %vm1127_vm6, %v1209_v47, %v1208_v1  ;;  %v2655_v41 = vadd.s32 4294967294, %v1399_v15  ;;  %v1489_v3 = vmul.u32 %v1482_v37, %v1473_v26  ;;  %vm1491_vm12 = vc.u32 %v4005_v11, %v4008_v61 }
 0x160   :  { %v1019_v14 = vsel %vm1017_vm15, %v5286_v13, %v3961_v62  ;;  %v1121_v48 = vxor.u32 2147483648, %v3994_v63  ;;  %v1313_v16 = vsel %vm1230_vm1, %v1312_v20, %v1311_v2  ;;  %v1492_v21 = vadd.s32 1, %v4009_v52 }
 0x161   :  { %v1549_v62 = vsel %vm1548_vm7, %v1547_v6, 0  ;;  %vm1120_vm8 = vcmp.eq.s32.totalorder %v4026_v12, 2  ;;  %v1213_v1 = vsel %vm3985_vm2, %v5275_v28, %v1210_v27  ;;  %v5201_v51 = vand.u32 2147483647, %v5276_v4 }
 0x162   :  { %v1551_v37 = vand.u32 31, %v1549_v62  ;;  %v4059_v17 = vsel %vm910_vm4, %v913_v33, %v916_v31  ;;  %v4063_v18 = vsel %vm1013_vm5, %v1016_v38, %v1019_v14  ;;  %v4065_v20 = vand.u32 3, %v1214_v40 }
 0x163   :  { %v1493_v2 = vsel %vm1491_vm12, %v1492_v21, %v4009_v52  ;;  %v1316_v49 = vsel %vm4030_vm11, %v3173_v50, %v1313_v16  ;;  %vm2656_vm6 = vcmp.lt.s32.totalorder %v2655_v41, 0  ;;  %v4073_v0 = vsel %vm1120_vm8, %v1121_v48, %v4000_v53 }
 0x164   :  { %v1494_v60 = vadd.s32 %v1493_v2, %v1489_v3  ;;  %2842 = vcosq.f32 %v1213_v1  ;;  %v1552_v19 = vsub.s32 32, %v1551_v37  ;;  %v1387_v55 = vadd.s32 %v3902_v34, %v3908_v58 }
 0x165   :  { %2844 = vsinq.f32 %v1213_v1  ;;  %v1544_v26 = vand.u32 8388607, %v5201_v51  ;;  %v4080_v52 = vsel %vm2656_vm6, 0, %v2655_v41  ;;  %v1554_v6 = vshll.u32 %v5225_v35, %v1551_v37 }
 0x166   :  { %v1495_v15 = vadd.s32 536870912, %v1494_v60  ;;  %2846 = vcosq.f32 %v1316_v49  ;;  %v1643_v33 = vand.u32 2139095040, %v5287_v43  ;;  %v1555_v31 = vshrl.u32 %v5226_v10, %v1552_v19 }
 0x167   :  { %v1557_v8 = vshll.u32 %v5226_v10, %v1551_v37  ;;  %v1558_v22 = vshrl.u32 %v5227_v29, %v1552_v19  ;;  %vm1117_vm13 = vcmp.eq.s32.totalorder %v4026_v12, 0  ;;  %v1550_v34 = vshrl.u32 %v1549_v62, 5 }
 0x168   :  { %v4084_v45 = vshrl.u32 %v1495_v15, 30  ;;  %v1560_v58 = vshll.u32 %v5227_v29, %v1551_v37  ;;  %v1561_v38 = vshrl.u32 %v5228_v56, %v1552_v19  ;;  %v1563_v13 = vshll.u32 %v5228_v56, %v1551_v37 }
 0x169   :  { %2848 = vsinq.f32 %v1316_v49  ;;  %v1403_v14 = vsub.s32 32, %v4080_v52  ;;  %v1545_v40 = vor.u32 8388608, %v1544_v26  ;;  %v1407_v41 = vsub.s32 4294967266, %v4080_v52 }
 0x16a   :  { %v1497_v27 = vshll.u32 %v4084_v45, 30  ;;  %v1564_v3 = vshrl.u32 %v5249_v7, %v1552_v19  ;;  %v1566_v48 = vshll.u32 %v5249_v7, %v1551_v37  ;;  %v1567_v16 = vshrl.u32 %v5250_v23, %v1552_v19 }
 0x16b   :  { %v1556_v62 = vor.u32 %v1555_v31, %v1554_v6  ;;  %v1559_v1 = vor.u32 %v1558_v22, %v1557_v8  ;;  %v1644_v2 = vshrl.u32 %v1643_v33, 23  ;;  %vm1116_vm14 = vcmp.lt.s32.totalorder %v4026_v12, 2 }
 0x16c   :  { %v4099_v21 = vsub.s32 %v1494_v60, %v1497_v27  ;;  %v1562_v49 = vor.u32 %v1561_v38, %v1560_v58  ;;  %v1565_v15 = vor.u32 %v1564_v3, %v1563_v13  ;;  %v1568_v51 = vor.u32 %v1567_v16, %v1566_v48 }
 0x16d   :  { %vm1569_vm15 = vcmp.lt.s32.totalorder %v1550_v34, 1  ;;  %v1404_v26 = vshll.u32 %v3965_v39, %v4080_v52  ;;  %v1553_v37 = vshrl.u32 %v5225_v35, %v1552_v19  ;;  %v4106_v47 = vshll.u32 %v1545_v40, 8 }
 0x16e   :  { %v1500_v24 = vsub.s32 0, %v4099_v21  ;;  %v1405_v60 = vshrl.u32 %v1387_v55, %v1403_v14  ;;  %v1408_v27 = vadd.s32 127, %v1407_v41  ;;  %vm1571_vm0 = vcmp.lt.s32.totalorder %v1550_v34, 3 }
 0x16f   :  { %vm1572_vm2 = vcmp.lt.s32.totalorder %v1550_v34, 4  ;;  %vm1570_vm3 = vcmp.lt.s32.totalorder %v1550_v34, 2  ;;  %v1577_v33 = vsel %vm1569_vm15, %v1556_v62, %v1559_v1  ;;  %v2665_v31 = vadd.s32 4294967169, %v1644_v2 }
 0x170   :  { %v2658_v6 = vmin.u32 %v1500_v24, %v4099_v21  ;;  %vm908_vm4 = vweird.f32 %v3147_v30  ;;  %vm1011_vm5 = vweird.f32 %v3166_v54  ;;  %v1574_v39 = vsel %vm1572_vm2, %v1562_v49, 2102212464 }
 0x171   :  { %v1578_v52 = vsel %vm1572_vm2, %v1565_v15, 920167782  ;;  %v1581_v19 = vsel %vm1569_vm15, %v1559_v1, %v1562_v49  ;;  %v1582_v8 = vsel %vm1572_vm2, %v1568_v51, 1326507024  ;;  %v2843_v22 = vpop.eup %2842  ;;  %vm1114_vm9 = vweird.f32 %v5267_v59 }
 0x172   :  { %v1573_v55 = vsel %vm1569_vm15, %v1553_v37, %v1556_v62  ;;  %v1575_v24 = vsel %vm1571_vm0, %v1559_v1, %v1574_v39  ;;  %v1579_v58 = vsel %vm1571_vm0, %v1562_v49, %v1578_v52  ;;  %v1583_v38 = vsel %vm1571_vm0, %v1565_v15, %v1582_v8  ;;  %v2845_v13 = vpop.eup %2844 }
 0x173   :  { %v1409_v14 = vshll.u32 %v1408_v27, 23  ;;  %v1502_v40 = vclz %v2658_v6  ;;  %v1580_v41 = vsel %vm1570_vm3, %v1577_v33, %v1579_v58  ;;  %v1584_v3 = vsel %vm1570_vm3, %v1581_v19, %v1583_v38  ;;  %v4120_v48 = vpop.eup %2846 }
 0x174   :  { %v5288_v51 = vxor.u32 2147483648, %v4000_v53  ;;  %v5289_v62 = vsub.s32 4, %v3853_v57  ;;  %v4133_v2 = vmul.u32.u64.low %v4106_v47, %v1584_v3  ;;  %v4134_v49 = vmul.u32.u64.high %v4106_v47, %v1584_v3, %v4133_v2 }
 0x175   :  { %v1576_v15 = vsel %vm1570_vm3, %v1573_v55, %v1575_v24  ;;  %v4138_v37 = vmul.u32.u64.low %v4106_v47, %v1580_v41  ;;  %v4139_v27 = vmul.u32.u64.high %v4106_v47, %v1580_v41, %v4138_v37  ;;  %v1650_v53 = vadd.s32 1, %v2665_v31 }
 0x176   :  { %v1119_v16 = vsel %vm1117_vm13, %v3994_v63, %v5288_v51  ;;  %v1315_v1 = vsel %vm1230_vm1, %v5289_v62, %v3853_v57  ;;  %vm1220_vm10 = vcmp.eq.s32.totalorder %v4065_v20, 0  ;;  %v1221_v63 = vxor.u32 2147483648, %v2845_v13  ;;  %v4144_v33 = vpop.eup %2848 }
 0x177   :  { %vm1223_vm7 = vcmp.eq.s32.totalorder %v4065_v20, 2  ;;  %v1224_v6 = vxor.u32 2147483648, %v2843_v22  ;;  %v1406_v57 = vor.u32 %v1405_v60, %v1404_v26  ;;  %v1410_v39 = vor.u32 4788187, %v1409_v14 }
 0x178   :  { %v2659_v52 = vadd.s32 4294967294, %v1502_v40  ;;  %vm1651_vm1 = vcmp.gt.s32.totalorder %v1650_v53, 0  ;;  %v1123_v34 = vsel %vm1116_vm14, %v1119_v16, %v4073_v0  ;;  %vm1219_vm12 = vcmp.lt.s32.totalorder %v4065_v20, 2 }
 0x179   :  { %v1317_v31 = vsel %vm4030_vm11, 0, %v1315_v1  ;;  %v1592_v19 = vmul.u32 %v4106_v47, %v1576_v15  ;;  %vm1594_vm8 = vc.u32 %v4134_v49, %v4138_v37  ;;  %v1595_v8 = vadd.s32 1, %v4139_v27 }
 0x17a   :  { %v1640_v26 = vand.u32 2147483647, %v5287_v43  ;;  %v1652_v60 = vsel %vm1651_vm1, %v1650_v53, 0  ;;  %v1222_v55 = vsel %vm1220_vm10, %v2843_v22, %v1221_v63  ;;  %v1225_v12 = vsel %vm1223_vm7, %v1224_v6, %v2845_v13 }
 0x17b   :  { %v1417_v0 = vsub.s32 4, %v3952_v44  ;;  %v1654_v9 = vand.u32 31, %v1652_v60  ;;  %v1411_v24 = vand.u32 2147483647, %v1410_v39  ;;  %v1413_v58 = vcvt.s32.f32 %v1406_v57 }
 0x17c   :  { %vm2660_vm11 = vcmp.lt.s32.totalorder %v2659_v52, 0  ;;  %v1596_v47 = vsel %vm1594_vm8, %v1595_v8, %v4139_v27  ;;  %v4166_v38 = vsel %vm908_vm4, nan, %v4059_v17  ;;  %v4171_v22 = vsel %vm1011_vm5, nan, %v4063_v18 }
 0x17d   :  { %vm1333_vm6 = vcmp.lt.s32.totalorder %v3178_v5, 0  ;;  %v1597_v13 = vadd.s32 %v1596_v47, %v1592_v19  ;;  %v4176_v14 = vsel %vm1114_vm9, nan, %v1123_v34  ;;  %v4178_v40 = vand.u32 3, %v1317_v31  ;;  %v5290_v31 = vld [vmem:[#allocation16_spill] sm:$0xff] }
 0x17e   :  { %v1647_v41 = vand.u32 8388607, %v1640_v26  ;;  %v1655_v30 = vsub.s32 32, %v1654_v9  ;;  %v4184_v17 = vsel %vm1219_vm12, %v1222_v55, %v1225_v12  ;;  %v4189_v54 = vsel %vm1333_vm6, %v1417_v0, %v3952_v44 }
 0x17f   :  { %v4191_v18 = vsel %vm2660_vm11, 0, %v2659_v52  ;;  %v1598_v59 = vadd.s32 536870912, %v1597_v13  ;;  %v1327_v3 = vxor.u32 2147483648, %v4120_v48  ;;  %v4194_v51 = vmul.f32 %v1413_v58, %v1411_v24 }
 0x180   :  { %v1490_v16 = vadd.s32 %v4008_v61, %v4005_v11  ;;  %v1657_v62 = vshll.u32 %v5225_v35, %v1654_v9  ;;  %v1658_v1 = vshrl.u32 %v5226_v10, %v1655_v30  ;;  %v1660_v2 = vshll.u32 %v5226_v10, %v1654_v9 }
 0x181   :  { %v4199_v20 = vshrl.u32 %v1598_v59, 30  ;;  %v1661_v44 = vshrl.u32 %v5227_v29, %v1655_v30  ;;  %v1324_v15 = vxor.u32 2147483648, %v4144_v33  ;;  %v1510_v27 = vsub.s32 4294967266, %v4191_v18 }
 0x182   :  { %v1648_v53 = vor.u32 8388608, %v1647_v41  ;;  %v1653_v63 = vshrl.u32 %v1652_v60, 5  ;;  %v1663_v11 = vshll.u32 %v5227_v29, %v1654_v9  ;;  %v1664_v61 = vshrl.u32 %v5228_v56, %v1655_v30 }
 0x183   :  { %v1600_v6 = vshll.u32 %v4199_v20, 30  ;;  %v1666_v57 = vshll.u32 %v5228_v56, %v1654_v9  ;;  %v1667_v39 = vshrl.u32 %v5249_v7, %v1655_v30  ;;  %v1669_v52 = vshll.u32 %v5249_v7, %v1654_v9 }
 0x184   :  { %v1670_v34 = vshrl.u32 %v5250_v23, %v1655_v30  ;;  %v1746_v19 = vand.u32 2139095040, %v5290_v31  ;;  %v1415_v8 = vxor.u32 2147483648, %v4194_v51  ;;  %v1659_v60 = vor.u32 %v1658_v1, %v1657_v62 }
 0x185   :  { %v4215_v55 = vsub.s32 %v1597_v13, %v1600_v6  ;;  %v1662_v12 = vor.u32 %v1661_v44, %v1660_v2  ;;  %v5291_v0 = vand.u32 2147483647, %v3178_v5  ;;  %v1506_v58 = vsub.s32 32, %v4191_v18 }
 0x186   :  { %v1656_v9 = vshrl.u32 %v5225_v35, %v1655_v30  ;;  %v1668_v47 = vor.u32 %v1667_v39, %v1666_v57  ;;  %vm1672_vm14 = vcmp.lt.s32.totalorder %v1653_v63, 1  ;;  %vm1323_vm15 = vcmp.eq.s32.totalorder %v4178_v40, 0 }
 0x187   :  { %vm4219_vm13 = vcmp.le.f32.partialorder %v5291_v0, 0.7853982  ;;  %vm1326_vm0 = vcmp.eq.s32.totalorder %v4178_v40, 2  ;;  %v1511_v13 = vadd.s32 127, %v1510_v27  ;;  %v1603_v41 = vsub.s32 0, %v4215_v55 }
 0x188   :  { %v1665_v59 = vor.u32 %v1664_v61, %v1663_v11  ;;  %v1688_v62 = vshll.u32 %v1648_v53, 8  ;;  %v1671_v1 = vor.u32 %v1670_v34, %v1669_v52  ;;  %vm1674_vm2 = vcmp.lt.s32.totalorder %v1653_v63, 3 }
 0x189   :  { %vm1675_vm3 = vcmp.lt.s32.totalorder %v1653_v63, 4  ;;  %v1747_v2 = vshrl.u32 %v1746_v19, 23  ;;  %vm1436_vm4 = vcmp.lt.s32.totalorder %v5268_v32, 0  ;;  %v1507_v30 = vshll.u32 %v4099_v21, %v4191_v18 }
 0x18a   :  { %v2662_v44 = vmin.u32 %v1603_v41, %v4215_v55  ;;  %vm1673_vm5 = vcmp.lt.s32.totalorder %v1653_v63, 2  ;;  %v1680_v6 = vsel %vm1672_vm14, %v1659_v60, %v1662_v12  ;;  %v1508_v57 = vshrl.u32 %v1490_v16, %v1506_v58 }
 0x18b   :  { %v1676_v27 = vsel %vm1672_vm14, %v1656_v9, %v1659_v60  ;;  %v1677_v11 = vsel %vm1675_vm3, %v1665_v59, 2102212464  ;;  %v1681_v53 = vsel %vm1675_vm3, %v1668_v47, 920167782  ;;  %vm1217_vm9 = vweird.f32 %v5275_v28 }
 0x18c   :  { %v1605_v61 = vclz %v2662_v44  ;;  %v1678_v39 = vsel %vm1674_vm2, %v1662_v12, %v1677_v11  ;;  %v1682_v52 = vsel %vm1674_vm2, %v1665_v59, %v1681_v53  ;;  %v1684_v21 = vsel %vm1672_vm14, %v1662_v12, %v1665_v59 }
 0x18d   :  { %vm1322_vm10 = vcmp.lt.s32.totalorder %v4178_v40, 2  ;;  %v1512_v18 = vshll.u32 %v1511_v13, 23  ;;  %v1683_v16 = vsel %vm1673_vm5, %v1680_v6, %v1682_v52  ;;  %v1685_v34 = vsel %vm1675_vm3, %v1671_v1, 1326507024 }
 0x18e   :  { %v2669_v19 = vadd.s32 4294967169, %v1747_v2  ;;  %v2663_v60 = vadd.s32 4294967294, %v1605_v61  ;;  %v1686_v0 = vsel %vm1674_vm2, %v1668_v47, %v1685_v34  ;;  %v5294_v41 = vand.u32 2147483647, %v5268_v32  ;;  %v5297_v34 = vld [vmem:[#allocation17_spill] sm:$0xff] }
 0x18f   :  { %v4244_v58 = vmul.u32.u64.low %v1688_v62, %v1683_v16  ;;  %v4245_v9 = vmul.u32.u64.high %v1688_v62, %v1683_v16, %v4244_v58  ;;  %v1520_v12 = vsub.s32 4, %v4084_v45  ;;  %v1679_v13 = vsel %vm1673_vm5, %v1676_v27, %v1678_v39 }
 0x190   :  { %vm4250_vm7 = vcmp.le.f32.partialorder %v5294_v41, 0.7853982  ;;  %v1687_v59 = vsel %vm1673_vm5, %v1684_v21, %v1686_v0  ;;  %v1753_v1 = vadd.s32 1, %v2669_v19  ;;  %v1420_v47 = vsel %vm4219_vm13, 0, %v4189_v54 }
 0x191   :  { %vm2664_vm1 = vcmp.lt.s32.totalorder %v2663_v60, 0  ;;  %v4260_v2 = vmul.u32.u64.low %v1688_v62, %v1687_v59  ;;  %v4261_v6 = vmul.u32.u64.high %v1688_v62, %v1687_v59, %v4260_v2  ;;  %v1416_v11 = vsel %vm1333_vm6, %v1415_v8, %v4194_v51 }
 0x192   :  { %v1509_v53 = vor.u32 %v1508_v57, %v1507_v30  ;;  %v1608_v61 = vsel %vm2664_vm1, 0, %v2663_v60  ;;  %vm1754_vm12 = vcmp.gt.s32.totalorder %v1753_v1, 0  ;;  %v1513_v52 = vor.u32 4788187, %v1512_v18 }
 0x193   :  { %v1613_v27 = vsub.s32 4294967266, %v1608_v61  ;;  %v1695_v63 = vmul.u32 %v1688_v62, %v1679_v13  ;;  %v1698_v39 = vadd.s32 1, %v4245_v9  ;;  %v1325_v54 = vsel %vm1323_vm15, %v4120_v48, %v1324_v15 }
 0x194   :  { %v1328_v51 = vsel %vm1326_vm0, %v1327_v3, %v4144_v33  ;;  %v4280_v8 = vsel %vm1436_vm4, %v1520_v12, %v4084_v45  ;;  %v1755_v62 = vsel %vm1754_vm12, %v1753_v1, 0  ;;  %v1419_v30 = vsel %vm4219_vm13, %v3178_v5, %v1416_v11 }
 0x195   :  { %v1593_v57 = vadd.s32 %v4138_v37, %v4134_v49  ;;  %vm1697_vm8 = vc.u32 %v4261_v6, %v4244_v58  ;;  %v1743_v48 = vand.u32 2147483647, %v5290_v31  ;;  %v1609_v15 = vsub.s32 32, %v1608_v61 }
 0x196   :  { %v1614_v33 = vadd.s32 127, %v1613_v27  ;;  %v1699_v3 = vsel %vm1697_vm8, %v1698_v39, %v4245_v9  ;;  %v1757_v21 = vand.u32 31, %v1755_v62  ;;  %v1514_v45 = vand.u32 2147483647, %v1513_v52 }
 0x197   :  { %v1516_v18 = vcvt.s32.f32 %v1509_v53  ;;  %v1700_v16 = vadd.s32 %v1699_v3, %v1695_v63  ;;  %v1849_v19 = vand.u32 2139095040, %v5297_v34  ;;  %v4295_v24 = vsel %vm1217_vm9, nan, %v4184_v17 }
 0x198   :  { %2850 = vcosq.f32 %v1419_v30  ;;  %v4297_v49 = vand.u32 3, %v1420_v47  ;;  %v1758_v37 = vsub.s32 32, %v1757_v21  ;;  %v4301_v60 = vsel %vm1322_vm10, %v1325_v54, %v1328_v51 }
 0x199   :  { %2852 = vsinq.f32 %v1419_v30  ;;  %v1523_v0 = vsel %vm4250_vm7, 0, %v4280_v8  ;;  %v1701_v9 = vadd.s32 536870912, %v1700_v16  ;;  %v1610_v41 = vshll.u32 %v4215_v55, %v1608_v61 }
 0x19a   :  { %v1611_v12 = vshrl.u32 %v1593_v57, %v1609_v15  ;;  %v1615_v28 = vshll.u32 %v1614_v33, 23  ;;  %v1750_v17 = vand.u32 8388607, %v1743_v48  ;;  %v1517_v13 = vmul.f32 %v1516_v18, %v1514_v45 }
 0x19b   :  { %v4309_v59 = vshrl.u32 %v1701_v9, 30  ;;  %v1756_v1 = vshrl.u32 %v1755_v62, 5  ;;  %v1850_v40 = vshrl.u32 %v1849_v19, 23  ;;  %v1760_v47 = vshll.u32 %v5225_v35, %v1757_v21 }
 0x19c   :  { %v1761_v2 = vshrl.u32 %v5226_v10, %v1758_v37  ;;  %v1763_v11 = vshll.u32 %v5226_v10, %v1757_v21  ;;  %v1764_v53 = vshrl.u32 %v5227_v29, %v1758_v37  ;;  %v1766_v61 = vshll.u32 %v5227_v29, %v1757_v21 }
 0x19d   :  { %v1703_v55 = vshll.u32 %v4309_v59, 30  ;;  %v1767_v52 = vshrl.u32 %v5228_v56, %v1758_v37  ;;  %v1769_v27 = vshll.u32 %v5228_v56, %v1757_v21  ;;  %v1612_v63 = vor.u32 %v1611_v12, %v1610_v41 }
 0x19e   :  { %v1616_v39 = vor.u32 4788187, %v1615_v28  ;;  %v1770_v54 = vshrl.u32 %v5249_v7, %v1758_v37  ;;  %v1772_v51 = vshll.u32 %v5249_v7, %v1757_v21  ;;  %vm1320_vm11 = vweird.f32 %v3173_v50 }
 0x19f   :  { %v1518_v62 = vxor.u32 2147483648, %v1517_v13  ;;  %v4322_v30 = vsub.s32 %v1700_v16, %v1703_v55  ;;  %v1751_v57 = vor.u32 8388608, %v1750_v17  ;;  %v1773_v15 = vshrl.u32 %v5250_v23, %v1758_v37 }
 0x1a0   :  { %v1759_v33 = vshrl.u32 %v5225_v35, %v1758_v37  ;;  %v1762_v3 = vor.u32 %v1761_v2, %v1760_v47  ;;  %v1765_v45 = vor.u32 %v1764_v53, %v1763_v11  ;;  %v2673_v18 = vadd.s32 4294967169, %v1850_v40 }
 0x1a1   :  { %v1706_v19 = vsub.s32 0, %v4322_v30  ;;  %v1768_v9 = vor.u32 %v1767_v52, %v1766_v61  ;;  %v1771_v41 = vor.u32 %v1770_v54, %v1769_v27  ;;  %vm1775_vm6 = vcmp.lt.s32.totalorder %v1756_v1, 1 }
 0x1a2   :  { %v1617_v12 = vand.u32 2147483647, %v1616_v39  ;;  %v1619_v21 = vcvt.s32.f32 %v1612_v63  ;;  %v1774_v28 = vor.u32 %v1773_v15, %v1772_v51  ;;  %vm1778_vm13 = vcmp.lt.s32.totalorder %v1756_v1, 4 }
 0x1a3   :  { %v1519_v16 = vsel %vm1436_vm4, %v1518_v62, %v1517_v13  ;;  %v2666_v17 = vmin.u32 %v1706_v19, %v4322_v30  ;;  %vm1777_vm14 = vcmp.lt.s32.totalorder %v1756_v1, 3  ;;  %v1791_v55 = vshll.u32 %v1751_v57, 8 }
 0x1a4   :  { %vm1539_vm15 = vcmp.lt.s32.totalorder %v5276_v4, 0  ;;  %vm1776_vm0 = vcmp.lt.s32.totalorder %v1756_v1, 2  ;;  %v1779_v37 = vsel %vm1775_vm6, %v1759_v33, %v1762_v3  ;;  %v1780_v40 = vsel %vm1778_vm13, %v1768_v9, 2102212464 }
 0x1a5   :  { %v1783_v47 = vsel %vm1775_vm6, %v1762_v3, %v1765_v45  ;;  %v4334_v2 = vpop.eup %2850  ;;  %v1708_v11 = vclz %v2666_v17  ;;  %v1781_v53 = vsel %vm1777_vm14, %v1765_v45, %v1780_v40  ;;  %v1784_v13 = vsel %vm1778_vm13, %v1771_v41, 920167782 }
 0x1a6   :  { %v1787_v61 = vsel %vm1775_vm6, %v1765_v45, %v1768_v9  ;;  %v4339_v52 = vpop.eup %2852  ;;  %v1620_v27 = vmul.f32 %v1619_v21, %v1617_v12  ;;  %v1785_v63 = vsel %vm1777_vm14, %v1768_v9, %v1784_v13  ;;  %v1788_v39 = vsel %vm1778_vm13, %v1774_v28, 1326507024 }
 0x1a7   :  { %v1856_v54 = vadd.s32 1, %v2673_v18  ;;  %v2667_v51 = vadd.s32 4294967294, %v1708_v11  ;;  %v1782_v62 = vsel %vm1776_vm0, %v1779_v37, %v1781_v53  ;;  %v1786_v57 = vsel %vm1776_vm0, %v1783_v47, %v1785_v63 }
 0x1a8   :  { %v1789_v15 = vsel %vm1777_vm14, %v1771_v41, %v1788_v39  ;;  %v4347_v3 = vmul.u32.u64.low %v1791_v55, %v1786_v57  ;;  %v4348_v19 = vmul.u32.u64.high %v1791_v55, %v1786_v57, %v4347_v3  ;;  %v5298_v45 = vand.u32 2147483647, %v5276_v4 }
 0x1a9   :  { %v1790_v33 = vsel %vm1776_vm0, %v1787_v61, %v1789_v15  ;;  %vm1857_vm2 = vcmp.gt.s32.totalorder %v1856_v54, 0  ;;  %vm2668_vm4 = vcmp.lt.s32.totalorder %v2667_v51, 0  ;;  %v4363_v1 = vsel %vm1320_vm11, nan, %v4301_v60 }
 0x1aa   :  { %vm4353_vm3 = vcmp.le.f32.partialorder %v5298_v45, 0.7853982  ;;  %v4357_v18 = vmul.u32.u64.low %v1791_v55, %v1790_v33  ;;  %v4358_v12 = vmul.u32.u64.high %v1791_v55, %v1790_v33, %v4357_v18  ;;  %v1858_v21 = vsel %vm1857_vm2, %v1856_v54, 0 }
 0x1ab   :  { %v1711_v41 = vsel %vm2668_vm4, 0, %v2667_v51  ;;  %v5202_v28 = vand.u32 2147483647, %v5297_v34  ;;  %v1860_v17 = vand.u32 31, %v1858_v21  ;;  %v1522_v37 = vsel %vm4250_vm7, %v5268_v32, %v1519_v16 }
 0x1ac   :  { %v1621_v40 = vxor.u32 2147483648, %v1620_v27  ;;  %v1716_v47 = vsub.s32 4294967266, %v1711_v41  ;;  %v1798_v11 = vmul.u32 %v1791_v55, %v1782_v62  ;;  %v1427_v53 = vxor.u32 2147483648, %v4339_v52 }
 0x1ad   :  { %v1430_v13 = vxor.u32 2147483648, %v4334_v2  ;;  %v4375_v50 = vand.u32 3, %v1523_v0  ;;  %v1801_v60 = vadd.s32 1, %v4348_v19  ;;  %v1696_v61 = vadd.s32 %v4244_v58, %v4261_v6 }
 0x1ae   :  { %v1712_v63 = vsub.s32 32, %v1711_v41  ;;  %vm1800_vm5 = vc.u32 %v4358_v12, %v4347_v3  ;;  %v1861_v16 = vsub.s32 32, %v1860_v17  ;;  %2854 = vcosq.f32 %v1522_v37 }
 0x1af   :  { %v1623_v55 = vsub.s32 4, %v4199_v20  ;;  %v1717_v39 = vadd.s32 127, %v1716_v47  ;;  %v1802_v44 = vsel %vm1800_vm5, %v1801_v60, %v4348_v19  ;;  %v1622_v8 = vsel %vm1539_vm15, %v1621_v40, %v1620_v27 }
 0x1b0   :  { %v1803_v0 = vadd.s32 %v1802_v44, %v1798_v11  ;;  %v1853_v54 = vand.u32 8388607, %v5202_v28  ;;  %v4388_v51 = vshrl.u32 %v1858_v21, 5  ;;  %v1713_v58 = vshll.u32 %v4322_v30, %v1711_v41 }
 0x1b1   :  { %v1863_v6 = vshll.u32 %v5225_v35, %v1860_v17  ;;  %v1866_v62 = vshll.u32 %v5226_v10, %v1860_v17  ;;  %v1872_v57 = vshll.u32 %v5228_v56, %v1860_v17  ;;  %vm1426_vm9 = vcmp.eq.s32.totalorder %v4297_v49, 0 }
 0x1b2   :  { %vm1429_vm10 = vcmp.eq.s32.totalorder %v4297_v49, 2  ;;  %v1714_v15 = vshrl.u32 %v1696_v61, %v1712_v63  ;;  %v1804_v27 = vadd.s32 536870912, %v1803_v0  ;;  %v1864_v33 = vshrl.u32 %v5226_v10, %v1861_v16 }
 0x1b3   :  { %v1867_v19 = vshrl.u32 %v5227_v29, %v1861_v16  ;;  %v1718_v45 = vshll.u32 %v1717_v39, 23  ;;  %v1869_v18 = vshll.u32 %v5227_v29, %v1860_v17  ;;  %v1870_v30 = vshrl.u32 %v5228_v56, %v1861_v16 }
 0x1b4   :  { %v1873_v21 = vshrl.u32 %v5249_v7, %v1861_v16  ;;  %2856 = vsinq.f32 %v1522_v37  ;;  %v1624_v41 = vsel %vm1539_vm15, %v1623_v55, %v4199_v20  ;;  %v4404_v40 = vshrl.u32 %v1804_v27, 30 }
 0x1b5   :  { %v1854_v47 = vor.u32 8388608, %v1853_v54  ;;  %v1625_v11 = vsel %vm4353_vm3, %v5276_v4, %v1622_v8  ;;  %v1875_v61 = vshll.u32 %v5249_v7, %v1860_v17  ;;  %v1876_v63 = vshrl.u32 %v5250_v23, %v1861_v16 }
 0x1b6   :  { %v1874_v60 = vor.u32 %v1873_v21, %v1872_v57  ;;  %vm1425_vm7 = vcmp.lt.s32.totalorder %v4297_v49, 2  ;;  %v1715_v39 = vor.u32 %v1714_v15, %v1713_v58  ;;  %v1806_v37 = vshll.u32 %v4404_v40, 30 }
 0x1b7   :  { %v1865_v44 = vor.u32 %v1864_v33, %v1863_v6  ;;  %v1868_v28 = vor.u32 %v1867_v19, %v1866_v62  ;;  %v1719_v20 = vor.u32 4788187, %v1718_v45  ;;  %v1871_v55 = vor.u32 %v1870_v30, %v1869_v18 }
 0x1b8   :  { %vm1878_vm1 = vcmp.lt.s32.totalorder %v4388_v51, 1  ;;  %vm1881_vm12 = vcmp.lt.s32.totalorder %v4388_v51, 4  ;;  %2858 = vcosq.f32 %v1625_v11  ;;  %v4415_v8 = vsub.s32 %v1803_v0, %v1806_v37 }
 0x1b9   :  { %v1862_v17 = vshrl.u32 %v5225_v35, %v1861_v16  ;;  %vm1880_vm8 = vcmp.lt.s32.totalorder %v4388_v51, 3  ;;  %2860 = vsinq.f32 %v1625_v11  ;;  %v1877_v54 = vor.u32 %v1876_v63, %v1875_v61 }
 0x1ba   :  { %v1883_v58 = vsel %vm1881_vm12, %v1871_v55, 2102212464  ;;  %v1887_v6 = vsel %vm1881_vm12, %v1874_v60, 920167782  ;;  %v1809_v62 = vsub.s32 0, %v4415_v8  ;;  %vm1879_vm11 = vcmp.lt.s32.totalorder %v4388_v51, 2 }
 0x1bb   :  { %v1886_v0 = vsel %vm1878_vm1, %v1865_v44, %v1868_v28  ;;  %v1894_v57 = vshll.u32 %v1854_v47, 8  ;;  %v1626_v16 = vsel %vm4353_vm3, 0, %v1624_v41  ;;  %v1720_v15 = vand.u32 2147483647, %v1719_v20  ;;  %v2855_v19 = vpop.eup %2854 }
 0x1bc   :  { %v1722_v27 = vcvt.s32.f32 %v1715_v39  ;;  %v1888_v33 = vsel %vm1880_vm8, %v1871_v55, %v1887_v6  ;;  %vm1642_vm6 = vcmp.lt.s32.totalorder %v5287_v43, 0  ;;  %v2670_v45 = vmin.u32 %v1809_v62, %v4415_v8 }
 0x1bd   :  { %v1882_v18 = vsel %vm1878_vm1, %v1862_v17, %v1865_v44  ;;  %v1884_v30 = vsel %vm1880_vm8, %v1868_v28, %v1883_v58  ;;  %v1890_v9 = vsel %vm1878_vm1, %v1868_v28, %v1871_v55  ;;  %v1428_v21 = vsel %vm1426_vm9, %v4334_v2, %v1427_v53  ;;  %v5303_v55 = vld [vmem:[#allocation18_spill] sm:$0xff] }
 0x1be   :  { %v1431_v41 = vsel %vm1429_vm10, %v1430_v13, %v4339_v52  ;;  %v1889_v47 = vsel %vm1879_vm11, %v1886_v0, %v1888_v33  ;;  %v1891_v11 = vsel %vm1881_vm12, %v1877_v54, 1326507024  ;;  %v1811_v61 = vclz %v2670_v45 }
 0x1bf   :  { %v1892_v28 = vsel %vm1880_vm8, %v1874_v60, %v1891_v11  ;;  %v4455_v63 = vmul.u32.u64.low %v1894_v57, %v1889_v47  ;;  %v4456_v39 = vmul.u32.u64.high %v1894_v57, %v1889_v47, %v4455_v63  ;;  %v4459_v53 = vand.u32 3, %v1626_v16 }
 0x1c0   :  { %vm4463_vm13 = vcmp.le.f32.partialorder %v1640_v26, 0.7853982  ;;  %v1723_v52 = vmul.f32 %v1722_v27, %v1720_v15  ;;  %v1885_v13 = vsel %vm1879_vm11, %v1882_v18, %v1884_v30  ;;  %v1893_v37 = vsel %vm1879_vm11, %v1890_v9, %v1892_v28 }
 0x1c1   :  { %v2671_v60 = vadd.s32 4294967294, %v1811_v61  ;;  %v4471_v44 = vmul.u32.u64.low %v1894_v57, %v1893_v37  ;;  %v4472_v20 = vmul.u32.u64.high %v1894_v57, %v1893_v37, %v4471_v44  ;;  %v1952_v17 = vand.u32 2139095040, %v5303_v55  ;;  %v2857_v54 = vpop.eup %2856 }
 0x1c2   :  { %vm1423_vm14 = vweird.f32 %v3178_v5  ;;  %v1432_v26 = vsel %vm1425_vm7, %v1428_v21, %v1431_v41  ;;  %vm1528_vm15 = vcmp.lt.s32.totalorder %v4375_v50, 2  ;;  %vm1529_vm0 = vcmp.eq.s32.totalorder %v4375_v50, 0 }
 0x1c3   :  { %vm1532_vm2 = vcmp.eq.s32.totalorder %v4375_v50, 2  ;;  %v1533_v51 = vxor.u32 2147483648, %v2855_v19  ;;  %v1799_v58 = vadd.s32 %v4347_v3, %v4358_v12  ;;  %vm2672_vm3 = vcmp.lt.s32.totalorder %v2671_v60, 0 }
 0x1c4   :  { %v1904_v6 = vadd.s32 1, %v4456_v39  ;;  %v1953_v62 = vshrl.u32 %v1952_v17, 23  ;;  %vm1632_vm4 = vcmp.eq.s32.totalorder %v4459_v53, 0  ;;  %vm1635_vm5 = vcmp.eq.s32.totalorder %v4459_v53, 2 }
 0x1c5   :  { %v1724_v49 = vxor.u32 2147483648, %v1723_v52  ;;  %v1814_v0 = vsel %vm2672_vm3, 0, %v2671_v60  ;;  %v1901_v16 = vmul.u32 %v1894_v57, %v1885_v13  ;;  %v1530_v15 = vxor.u32 2147483648, %v2857_v54  ;;  %v2859_v18 = vpop.eup %2858  ;;  %v5304_v13 = vld [vmem:[#allocation19_spill] sm:$0xff] }
 0x1c6   :  { %v1726_v27 = vsub.s32 4, %v4309_v59  ;;  %v1815_v33 = vsub.s32 32, %v1814_v0  ;;  %v1819_v45 = vsub.s32 4294967266, %v1814_v0  ;;  %v1534_v3 = vsel %vm1532_vm2, %v1533_v51, %v2857_v54  ;;  %v2861_v9 = vpop.eup %2860 }
 0x1c7   :  { %vm1745_vm9 = vcmp.lt.s32.totalorder %v5290_v31, 0  ;;  %v1816_v12 = vshll.u32 %v4415_v8, %v1814_v0  ;;  %vm1903_vm10 = vc.u32 %v4472_v20, %v4455_v63  ;;  %v2677_v30 = vadd.s32 4294967169, %v1953_v62 }
 0x1c8   :  { %v1817_v21 = vshrl.u32 %v1799_v58, %v1815_v33  ;;  %v1820_v57 = vadd.s32 127, %v1819_v45  ;;  %v1905_v41 = vsel %vm1903_vm10, %v1904_v6, %v4456_v39  ;;  %v5204_v47 = vand.u32 2147483647, %v5303_v55 }
 0x1c9   :  { %v1725_v11 = vsel %vm1642_vm6, %v1724_v49, %v1723_v52  ;;  %v1906_v61 = vadd.s32 %v1905_v41, %v1901_v16  ;;  %v1959_v28 = vadd.s32 1, %v2677_v30  ;;  %v2055_v37 = vand.u32 2139095040, %v5304_v13 }
 0x1ca   :  { %v1531_v8 = vsel %vm1529_vm0, %v2855_v19, %v1530_v15  ;;  %v1636_v60 = vxor.u32 2147483648, %v2859_v18  ;;  %v4503_v44 = vsel %vm1642_vm6, %v1726_v27, %v4309_v59  ;;  %v1821_v17 = vshll.u32 %v1820_v57, 23 }
 0x1cb   :  { %v1633_v39 = vxor.u32 2147483648, %v2861_v9  ;;  %v1818_v54 = vor.u32 %v1817_v21, %v1816_v12  ;;  %v1907_v51 = vadd.s32 536870912, %v1906_v61  ;;  %vm1960_vm7 = vcmp.gt.s32.totalorder %v1959_v28, 0 }
 0x1cc   :  { %v1728_v52 = vsel %vm4463_vm13, %v5287_v43, %v1725_v11  ;;  %v1822_v58 = vor.u32 4788187, %v1821_v17  ;;  %v1829_v6 = vsub.s32 4, %v4404_v40  ;;  %v1961_v62 = vsel %vm1960_vm7, %v1959_v28, 0 }
 0x1cd   :  { %v4509_v19 = vshrl.u32 %v1907_v51, 30  ;;  %v1956_v49 = vand.u32 8388607, %v5204_v47  ;;  %v1963_v59 = vand.u32 31, %v1961_v62  ;;  %v2056_v0 = vshrl.u32 %v2055_v37, 23 }
 0x1ce   :  { %v4515_v16 = vsel %vm1423_vm14, nan, %v1432_v26  ;;  %v4519_v15 = vsel %vm1528_vm15, %v1531_v8, %v1534_v3  ;;  %v4523_v27 = vsel %vm1635_vm5, %v1636_v60, %v2861_v9  ;;  %v1729_v33 = vsel %vm4463_vm13, 0, %v4503_v44 }
 0x1cf   :  { %v1823_v45 = vand.u32 2147483647, %v1822_v58  ;;  %v1825_v12 = vcvt.s32.f32 %v1818_v54  ;;  %v1909_v30 = vshll.u32 %v4509_v19, 30  ;;  %v1964_v21 = vsub.s32 32, %v1963_v59 }
 0x1d0   :  { %v4531_v5 = vsel %vm1632_vm4, %v2859_v18, %v1633_v39  ;;  %2862 = vcosq.f32 %v1728_v52  ;;  %v4536_v50 = vsel %vm1745_vm9, %v1829_v6, %v4404_v40  ;;  %v5203_v26 = vand.u32 2147483647, %v5304_v13 }
 0x1d1   :  { %2864 = vsinq.f32 %v1728_v52  ;;  %v4539_v3 = vsub.s32 %v1906_v61, %v1909_v30  ;;  %v1957_v9 = vor.u32 8388608, %v1956_v49  ;;  %v2681_v57 = vadd.s32 4294967169, %v2056_v0 }
 0x1d2   :  { %v1966_v41 = vshll.u32 %v5225_v35, %v1963_v59  ;;  %v1967_v11 = vshrl.u32 %v5226_v10, %v1964_v21  ;;  %v1969_v18 = vshll.u32 %v5226_v10, %v1963_v59  ;;  %v1970_v28 = vshrl.u32 %v5227_v29, %v1964_v21 }
 0x1d3   :  { %v1826_v37 = vmul.f32 %v1825_v12, %v1823_v45  ;;  %v1912_v8 = vsub.s32 0, %v4539_v3  ;;  %v1972_v40 = vshll.u32 %v5227_v29, %v1963_v59  ;;  %v1973_v60 = vshrl.u32 %v5228_v56, %v1964_v21 }
 0x1d4   :  { %v1902_v61 = vadd.s32 %v4455_v63, %v4472_v20  ;;  %v1962_v17 = vshrl.u32 %v1961_v62, 5  ;;  %v1975_v39 = vshll.u32 %v5228_v56, %v1963_v59  ;;  %v4553_v54 = vand.u32 8388607, %v5203_v26 }
 0x1d5   :  { %vm1631_vm1 = vcmp.lt.s32.totalorder %v4459_v53, 2  ;;  %v2674_v51 = vmin.u32 %v1912_v8, %v4539_v3  ;;  %v1965_v52 = vshrl.u32 %v5225_v35, %v1964_v21  ;;  %v4558_v58 = vshll.u32 %v1957_v9, 8 }
 0x1d6   :  { %v2062_v6 = vadd.s32 1, %v2681_v57  ;;  %v1968_v49 = vor.u32 %v1967_v11, %v1966_v41  ;;  %v1971_v0 = vor.u32 %v1970_v28, %v1969_v18  ;;  %v1974_v45 = vor.u32 %v1973_v60, %v1972_v40 }
 0x1d7   :  { %v1976_v63 = vshrl.u32 %v5249_v7, %v1964_v21  ;;  %vm4563_vm12 = vcmp.le.f32.partialorder %v1743_v48, 0.7853982  ;;  %v1827_v62 = vxor.u32 2147483648, %v1826_v37  ;;  %v1914_v12 = vclz %v2674_v51 }
 0x1d8   :  { %v1978_v30 = vshll.u32 %v5249_v7, %v1963_v59  ;;  %v1979_v8 = vshrl.u32 %v5250_v23, %v1964_v21  ;;  %vm1526_vm8 = vweird.f32 %v5268_v32  ;;  %vm1629_vm11 = vweird.f32 %v5276_v4 }
 0x1d9   :  { %v1977_v9 = vor.u32 %v1976_v63, %v1975_v39  ;;  %vm1981_vm6 = vcmp.lt.s32.totalorder %v1962_v17, 1  ;;  %vm1982_vm14 = vcmp.lt.s32.totalorder %v1962_v17, 2  ;;  %vm1983_vm15 = vcmp.lt.s32.totalorder %v1962_v17, 3 }
 0x1da   :  { %v2675_v57 = vadd.s32 4294967294, %v1914_v12  ;;  %v1980_v41 = vor.u32 %v1979_v8, %v1978_v30  ;;  %vm1984_vm0 = vcmp.lt.s32.totalorder %v1962_v17, 4  ;;  %v1985_v48 = vsel %vm1981_vm6, %v1965_v52, %v1968_v49 }
 0x1db   :  { %v1986_v11 = vsel %vm1984_vm0, %v1974_v45, 2102212464  ;;  %v1989_v18 = vsel %vm1981_vm6, %v1968_v49, %v1971_v0  ;;  %v1990_v28 = vsel %vm1984_vm0, %v1977_v9, 920167782  ;;  %v1993_v40 = vsel %vm1981_vm6, %v1971_v0, %v1974_v45 }
 0x1dc   :  { %vm2676_vm2 = vcmp.lt.s32.totalorder %v2675_v57, 0  ;;  %v1987_v59 = vsel %vm1983_vm15, %v1971_v0, %v1986_v11  ;;  %v1991_v60 = vsel %vm1983_vm15, %v1974_v45, %v1990_v28  ;;  %v1994_v21 = vsel %vm1984_vm0, %v1980_v41, 1326507024 }
 0x1dd   :  { %v1917_v51 = vsel %vm2676_vm2, 0, %v2675_v57  ;;  %v1992_v26 = vsel %vm1982_vm14, %v1989_v18, %v1991_v60  ;;  %v1995_v47 = vsel %vm1983_vm15, %v1977_v9, %v1994_v21  ;;  %vm2063_vm3 = vcmp.gt.s32.totalorder %v2062_v6, 0  ;;  %v4572_v39 = vpop.eup %2862 }
 0x1de   :  { %v1918_v63 = vsub.s32 32, %v1917_v51  ;;  %v1922_v12 = vsub.s32 4294967266, %v1917_v51  ;;  %v1988_v30 = vsel %vm1982_vm14, %v1985_v48, %v1987_v59  ;;  %v1996_v52 = vsel %vm1982_vm14, %v1993_v40, %v1995_v47  ;;  %v4576_v49 = vpop.eup %2864 }
 0x1df   :  { %v4579_v8 = vmul.u32.u64.low %v4558_v58, %v1996_v52  ;;  %v4580_v0 = vmul.u32.u64.high %v4558_v58, %v1996_v52, %v4579_v8  ;;  %v4583_v45 = vmul.u32.u64.low %v4558_v58, %v1992_v26  ;;  %v4584_v57 = vmul.u32.u64.high %v4558_v58, %v1992_v26, %v4583_v45 }
 0x1e0   :  { %v4591_v9 = vand.u32 3, %v1729_v33  ;;  %v1828_v47 = vsel %vm1745_vm9, %v1827_v62, %v1826_v37  ;;  %v1923_v17 = vadd.s32 127, %v1922_v12  ;;  %v2064_v41 = vsel %vm2063_vm3, %v2062_v6, 0 }
 0x1e1   :  { %v1638_v48 = vsel %vm1631_vm1, %v4531_v5, %v4523_v27  ;;  %v1832_v26 = vsel %vm4563_vm12, 0, %v4536_v50  ;;  %v2060_v2 = vor.u32 8388608, %v4553_v54  ;;  %v2066_v11 = vand.u32 31, %v2064_v41 }
 0x1e2   :  { %v1919_v44 = vshll.u32 %v4539_v3, %v1917_v51  ;;  %v1920_v33 = vshrl.u32 %v1902_v61, %v1918_v63  ;;  %v1924_v18 = vshll.u32 %v1923_v17, 23  ;;  %v2004_v37 = vmul.u32 %v4558_v58, %v1988_v30 }
 0x1e3   :  { %v1831_v6 = vsel %vm4563_vm12, %v5290_v31, %v1828_v47  ;;  %vm2006_vm13 = vc.u32 %v4580_v0, %v4583_v45  ;;  %v2007_v53 = vadd.s32 1, %v4584_v57  ;;  %v2067_v27 = vsub.s32 32, %v2066_v11 }
 0x1e4   :  { %v4614_v5 = vsel %vm1526_vm8, nan, %v4519_v15  ;;  %v4618_v50 = vsel %vm1629_vm11, nan, %v1638_v48  ;;  %vm1735_vm4 = vcmp.eq.s32.totalorder %v4591_v9, 0  ;;  %vm1738_vm5 = vcmp.eq.s32.totalorder %v4591_v9, 2 }
 0x1e5   :  { %v1739_v3 = vxor.u32 2147483648, %v4572_v39  ;;  %v4623_v61 = vand.u32 3, %v1832_v26  ;;  %v2008_v54 = vsel %vm2006_vm13, %v2007_v53, %v4584_v57  ;;  %v4626_v58 = vshll.u32 %v2060_v2, 8 }
 0x1e6   :  { %2866 = vcosq.f32 %v1831_v6  ;;  %v1921_v32 = vor.u32 %v1920_v33, %v1919_v44  ;;  %v1925_v15 = vor.u32 4788187, %v1924_v18  ;;  %v2009_v20 = vadd.s32 %v2008_v54, %v2004_v37 }
 0x1e7   :  { %vm1734_vm9 = vcmp.lt.s32.totalorder %v4591_v9, 2  ;;  %2868 = vsinq.f32 %v1831_v6  ;;  %v2069_v4 = vshll.u32 %v5225_v35, %v2066_v11  ;;  %v2070_v62 = vshrl.u32 %v5226_v10, %v2067_v27 }
 0x1e8   :  { %v2072_v28 = vshll.u32 %v5226_v10, %v2066_v11  ;;  %v2010_v40 = vadd.s32 536870912, %v2009_v20  ;;  %v2073_v59 = vshrl.u32 %v5227_v29, %v2067_v27  ;;  %v2075_v60 = vshll.u32 %v5227_v29, %v2066_v11 }
 0x1e9   :  { %v2076_v21 = vshrl.u32 %v5228_v56, %v2067_v27  ;;  %v1736_v51 = vxor.u32 2147483648, %v4576_v49  ;;  %vm1848_vm10 = vcmp.lt.s32.totalorder %v5297_v34, 0  ;;  %v2065_v63 = vshrl.u32 %v2064_v41, 5 }
 0x1ea   :  { %v2078_v12 = vshll.u32 %v5228_v56, %v2066_v11  ;;  %v2079_v30 = vshrl.u32 %v5249_v7, %v2067_v27  ;;  %v1926_v52 = vand.u32 2147483647, %v1925_v15  ;;  %v1928_v8 = vcvt.s32.f32 %v1921_v32  ;;  %v5310_v15 = vld [vmem:[#allocation20_spill] sm:$0xff] }
 0x1eb   :  { %v4639_v57 = vshrl.u32 %v2010_v40, 30  ;;  %v2081_v47 = vshll.u32 %v5249_v7, %v2066_v11  ;;  %vm1732_vm7 = vweird.f32 %v5287_v43  ;;  %v1740_v17 = vsel %vm1738_vm5, %v1739_v3, %v4576_v49 }
 0x1ec   :  { %v2068_v48 = vshrl.u32 %v5225_v35, %v2067_v27  ;;  %v2071_v26 = vor.u32 %v2070_v62, %v2069_v4  ;;  %v2082_v41 = vshrl.u32 %v5250_v23, %v2067_v27  ;;  %v2074_v44 = vor.u32 %v2073_v59, %v2072_v28 }
 0x1ed   :  { %v2012_v2 = vshll.u32 %v4639_v57, 30  ;;  %v2077_v33 = vor.u32 %v2076_v21, %v2075_v60  ;;  %v2080_v18 = vor.u32 %v2079_v30, %v2078_v12  ;;  %v5307_v37 = vand.u32 2147483647, %v5297_v34 }
 0x1ee   :  { %v1932_v6 = vsub.s32 4, %v4509_v19  ;;  %v2083_v53 = vor.u32 %v2082_v41, %v2081_v47  ;;  %vm2084_vm12 = vcmp.lt.s32.totalorder %v2065_v63, 1  ;;  %vm2087_vm8 = vcmp.lt.s32.totalorder %v2065_v63, 4 }
 0x1ef   :  { %vm4651_vm1 = vcmp.le.f32.partialorder %v5307_v37, 0.7853982  ;;  %v1929_v49 = vmul.f32 %v1928_v8, %v1926_v52  ;;  %v4656_v3 = vsub.s32 %v2009_v20, %v2012_v2  ;;  %vm2086_vm11 = vcmp.lt.s32.totalorder %v2065_v63, 3 }
 0x1f0   :  { %v2089_v27 = vsel %vm2087_vm8, %v2077_v33, 2102212464  ;;  %v1737_v54 = vsel %vm1735_vm4, %v4572_v39, %v1736_v51  ;;  %vm2085_vm6 = vcmp.lt.s32.totalorder %v2065_v63, 2  ;;  %v2088_v32 = vsel %vm2084_vm12, %v2068_v48, %v2071_v26 }
 0x1f1   :  { %v2158_v4 = vand.u32 2139095040, %v5310_v15  ;;  %v2015_v62 = vsub.s32 0, %v4656_v3  ;;  %v2090_v28 = vsel %vm2086_vm11, %v2074_v44, %v2089_v27  ;;  %v2092_v40 = vsel %vm2084_vm12, %v2071_v26, %v2074_v44 }
 0x1f2   :  { %v2093_v20 = vsel %vm2087_vm8, %v2080_v18, 920167782  ;;  %vm1838_vm14 = vcmp.eq.s32.totalorder %v4623_v61, 0  ;;  %vm1841_vm15 = vcmp.eq.s32.totalorder %v4623_v61, 2  ;;  %v2096_v39 = vsel %vm2084_vm12, %v2074_v44, %v2077_v33 }
 0x1f3   :  { %v2094_v59 = vsel %vm2086_vm11, %v2077_v33, %v2093_v20  ;;  %v2097_v60 = vsel %vm2087_vm8, %v2083_v53, 1326507024  ;;  %v1741_v21 = vsel %vm1734_vm9, %v1737_v54, %v1740_v17  ;;  %v1930_v51 = vxor.u32 2147483648, %v1929_v49  ;;  %v2867_v52 = vpop.eup %2866 }
 0x1f4   :  { %v1933_v12 = vsel %vm1848_vm10, %v1932_v6, %v4509_v19  ;;  %v2678_v30 = vmin.u32 %v2015_v62, %v4656_v3  ;;  %v2091_v8 = vsel %vm2085_vm6, %v2088_v32, %v2090_v28  ;;  %v2095_v47 = vsel %vm2085_vm6, %v2092_v40, %v2094_v59  ;;  %v2869_v41 = vpop.eup %2868 }
 0x1f5   :  { %v2098_v48 = vsel %vm2086_vm11, %v2080_v18, %v2097_v60  ;;  %v2159_v26 = vshrl.u32 %v2158_v4, 23  ;;  %vm1837_vm0 = vcmp.lt.s32.totalorder %v4623_v61, 2  ;;  %vm1951_vm2 = vcmp.lt.s32.totalorder %v5303_v55, 0 }
 0x1f6   :  { %v2017_v9 = vclz %v2678_v30  ;;  %v2099_v17 = vsel %vm2085_vm6, %v2096_v39, %v2098_v48  ;;  %v4685_v2 = vmul.u32.u64.low %v4626_v58, %v2095_v47  ;;  %v4686_v44 = vmul.u32.u64.high %v4626_v58, %v2095_v47, %v4685_v2 }
 0x1f7   :  { %v4691_v19 = vmul.u32.u64.low %v4626_v58, %v2099_v17  ;;  %v4692_v33 = vmul.u32.u64.high %v4626_v58, %v2099_v17, %v4691_v19  ;;  %v5206_v18 = vand.u32 2147483647, %v5310_v15  ;;  %v2685_v37 = vadd.s32 4294967169, %v2159_v26 }
 0x1f8   :  { %v4697_v6 = vsel %vm1732_vm7, nan, %v1741_v21  ;;  %v1935_v63 = vsel %vm4651_vm1, 0, %v1933_v12  ;;  %v2005_v53 = vadd.s32 %v4583_v45, %v4580_v0  ;;  %v2679_v27 = vadd.s32 4294967294, %v2017_v9 }
 0x1f9   :  { %v1839_v54 = vxor.u32 2147483648, %v2869_v41  ;;  %v1842_v32 = vxor.u32 2147483648, %v2867_v52  ;;  %v2107_v4 = vmul.u32 %v4626_v58, %v2091_v8  ;;  %v2165_v62 = vadd.s32 1, %v2685_v37  ;;  %v5314_v58 = vld [vmem:[#allocation21_spill] sm:$0xff] }
 0x1fa   :  { %v1931_v28 = vsel %vm1848_vm10, %v1930_v51, %v1929_v49  ;;  %v5311_v40 = vand.u32 2147483647, %v5303_v55  ;;  %vm2680_vm13 = vcmp.lt.s32.totalorder %v2679_v27, 0  ;;  %v2035_v20 = vsub.s32 4, %v4639_v57 }
 0x1fb   :  { %v2110_v0 = vadd.s32 1, %v4686_v44  ;;  %v2020_v45 = vsel %vm2680_vm13, 0, %v2679_v27  ;;  %vm2109_vm4 = vc.u32 %v4692_v33, %v4685_v2  ;;  %vm2166_vm5 = vcmp.gt.s32.totalorder %v2165_v62, 0 }
 0x1fc   :  { %vm4708_vm3 = vcmp.le.f32.partialorder %v5311_v40, 0.7853982  ;;  %v2261_v59 = vand.u32 2139095040, %v5314_v58  ;;  %v2021_v39 = vsub.s32 32, %v2020_v45  ;;  %v2022_v49 = vshll.u32 %v4656_v3, %v2020_v45 }
 0x1fd   :  { %v2025_v60 = vsub.s32 4294967266, %v2020_v45  ;;  %v2111_v21 = vsel %vm2109_vm4, %v2110_v0, %v4686_v44  ;;  %v1843_v51 = vsel %vm1841_vm15, %v1842_v32, %v2869_v41  ;;  %v2162_v30 = vand.u32 8388607, %v5206_v18 }
 0x1fe   :  { %v2112_v12 = vadd.s32 %v2111_v21, %v2107_v4  ;;  %v2167_v8 = vsel %vm2166_vm5, %v2165_v62, 0  ;;  %v1840_v47 = vsel %vm1838_vm14, %v2867_v52, %v1839_v54  ;;  %v1934_v48 = vsel %vm4651_vm1, %v5297_v34, %v1931_v28 }
 0x1ff   :  { %v2023_v26 = vshrl.u32 %v2005_v53, %v2021_v39  ;;  %v2026_v3 = vadd.s32 127, %v2025_v60  ;;  %v4728_v9 = vand.u32 3, %v1935_v63  ;;  %v2169_v44 = vand.u32 31, %v2167_v8 }
 0x200   :  { %v2113_v17 = vadd.s32 536870912, %v2112_v12  ;;  %v2262_v19 = vshrl.u32 %v2261_v59, 23  ;;  %v4733_v27 = vsel %vm1951_vm2, %v2035_v20, %v4639_v57  ;;  %v5205_v52 = vand.u32 2147483647, %v5314_v58 }
 0x201   :  { %v2024_v41 = vor.u32 %v2023_v26, %v2022_v49  ;;  %v2027_v37 = vshll.u32 %v2026_v3, 23  ;;  %v4738_v11 = vsel %vm1837_vm0, %v1840_v47, %v1843_v51  ;;  %2870 = vcosq.f32 %v1934_v48 }
 0x202   :  { %v4740_v53 = vshrl.u32 %v2113_v17, 30  ;;  %v2170_v63 = vsub.s32 32, %v2169_v44  ;;  %2872 = vsinq.f32 %v1934_v48  ;;  %v2163_v4 = vor.u32 8388608, %v2162_v30 }
 0x203   :  { %v2028_v54 = vor.u32 4788187, %v2027_v37  ;;  %v2031_v32 = vcvt.s32.f32 %v2024_v41  ;;  %v2038_v62 = vsel %vm4708_vm3, 0, %v4733_v27  ;;  %v2172_v28 = vshll.u32 %v5225_v35, %v2169_v44 }
 0x204   :  { %v2115_v57 = vshll.u32 %v4740_v53, 30  ;;  %v2689_v40 = vadd.s32 4294967169, %v2262_v19  ;;  %v2173_v20 = vshrl.u32 %v5226_v10, %v2170_v63  ;;  %v2175_v0 = vshll.u32 %v5226_v10, %v2169_v44 }
 0x205   :  { %v2029_v61 = vand.u32 2147483647, %v2028_v54  ;;  %v2176_v45 = vshrl.u32 %v5227_v29, %v2170_v63  ;;  %v2168_v39 = vshrl.u32 %v2167_v8, 5  ;;  %v2178_v49 = vshll.u32 %v5227_v29, %v2169_v44 }
 0x206   :  { %v4750_v59 = vsub.s32 %v2112_v12, %v2115_v57  ;;  %v2179_v60 = vshrl.u32 %v5228_v56, %v2170_v63  ;;  %v2108_v51 = vadd.s32 %v4685_v2, %v4692_v33  ;;  %v2181_v30 = vshll.u32 %v5228_v56, %v2169_v44 }
 0x207   :  { %v2032_v21 = vmul.f32 %v2031_v32, %v2029_v61  ;;  %v4757_v47 = vshll.u32 %v2163_v4, 8  ;;  %vm1835_vm9 = vweird.f32 %v5290_v31  ;;  %v2171_v12 = vshrl.u32 %v5225_v35, %v2170_v63 }
 0x208   :  { %v2118_v48 = vsub.s32 0, %v4750_v59  ;;  %v2174_v26 = vor.u32 %v2173_v20, %v2172_v28  ;;  %v2182_v8 = vshrl.u32 %v5249_v7, %v2170_v63  ;;  %v2177_v17 = vor.u32 %v2176_v45, %v2175_v0 }
 0x209   :  { %v2033_v3 = vxor.u32 2147483648, %v2032_v21  ;;  %v2184_v19 = vshll.u32 %v5249_v7, %v2169_v44  ;;  %v2185_v41 = vshrl.u32 %v5250_v23, %v2170_v63  ;;  %v2180_v33 = vor.u32 %v2179_v60, %v2178_v49 }
 0x20a   :  { %v2682_v2 = vmin.u32 %v2118_v48, %v4750_v59  ;;  %vm2187_vm10 = vcmp.lt.s32.totalorder %v2168_v39, 1  ;;  %v2268_v37 = vadd.s32 1, %v2689_v40  ;;  %v2183_v32 = vor.u32 %v2182_v8, %v2181_v30 }
 0x20b   :  { %v2034_v54 = vsel %vm1951_vm2, %v2033_v3, %v2032_v21  ;;  %v2186_v4 = vor.u32 %v2185_v41, %v2184_v19  ;;  %vm2189_vm7 = vcmp.lt.s32.totalorder %v2168_v39, 3  ;;  %vm2188_vm1 = vcmp.lt.s32.totalorder %v2168_v39, 2 }
 0x20c   :  { %v2037_v57 = vsel %vm4708_vm3, %v5303_v55, %v2034_v54  ;;  %v2120_v28 = vclz %v2682_v2  ;;  %vm2190_vm12 = vcmp.lt.s32.totalorder %v2168_v39, 4  ;;  %v2191_v44 = vsel %vm2187_vm10, %v2171_v12, %v2174_v26 }
 0x20d   :  { %v2192_v63 = vsel %vm2190_vm12, %v2180_v33, 2102212464  ;;  %v2195_v61 = vsel %vm2187_vm10, %v2174_v26, %v2177_v17  ;;  %v2196_v20 = vsel %vm2190_vm12, %v2183_v32, 920167782  ;;  %2874 = vcosq.f32 %v2037_v57 }
 0x20e   :  { %v2683_v40 = vadd.s32 4294967294, %v2120_v28  ;;  %v2193_v0 = vsel %vm2189_vm7, %v2177_v17, %v2192_v63  ;;  %v2197_v45 = vsel %vm2189_vm7, %v2180_v33, %v2196_v20  ;;  %v4775_v49 = vpop.eup %2870  ;;  %2876 = vsinq.f32 %v2037_v57 }
 0x20f   :  { %v2198_v60 = vsel %vm2188_vm1, %v2195_v61, %v2197_v45  ;;  %v2199_v21 = vsel %vm2187_vm10, %v2177_v17, %v2180_v33  ;;  %v2200_v30 = vsel %vm2190_vm12, %v2186_v4, 1326507024  ;;  %v2873_v48 = vpop.eup %2872  ;;  %vm1944_vm8 = vcmp.eq.s32.totalorder %v4728_v9, 2  ;;  %v5315_v61 = vld [vmem:[#allocation22_spill] sm:$0xff] }
 0x210   :  { %vm2684_vm11 = vcmp.lt.s32.totalorder %v2683_v40, 0  ;;  %v2201_v12 = vsel %vm2189_vm7, %v2183_v32, %v2200_v30  ;;  %v4782_v26 = vmul.u32.u64.low %v4757_v47, %v2198_v60  ;;  %v4783_v8 = vmul.u32.u64.high %v4757_v47, %v2198_v60, %v4782_v26 }
 0x211   :  { %vm1941_vm6 = vcmp.eq.s32.totalorder %v4728_v9, 0  ;;  %v2123_v3 = vsel %vm2684_vm11, 0, %v2683_v40  ;;  %v2194_v19 = vsel %vm2188_vm1, %v2191_v44, %v2193_v0  ;;  %v2202_v41 = vsel %vm2188_vm1, %v2199_v21, %v2201_v12 }
 0x212   :  { %vm2269_vm14 = vcmp.gt.s32.totalorder %v2268_v37, 0  ;;  %v2124_v17 = vsub.s32 32, %v2123_v3  ;;  %v2125_v2 = vshll.u32 %v4750_v59, %v2123_v3  ;;  %v2128_v33 = vsub.s32 4294967266, %v2123_v3 }
 0x213   :  { %v2270_v54 = vsel %vm2269_vm14, %v2268_v37, 0  ;;  %v4793_v32 = vsel %vm1835_vm9, nan, %v4738_v11  ;;  %v4796_v4 = vmul.u32.u64.low %v4757_v47, %v2202_v41  ;;  %v4797_v57 = vmul.u32.u64.high %v4757_v47, %v2202_v41, %v4796_v4 }
 0x214   :  { %v2272_v28 = vand.u32 31, %v2270_v54  ;;  %v4803_v39 = vand.u32 3, %v2038_v62  ;;  %v2126_v44 = vshrl.u32 %v2108_v51, %v2124_v17  ;;  %v2129_v59 = vadd.s32 127, %v2128_v33 }
 0x215   :  { %v2213_v37 = vadd.s32 1, %v4783_v8  ;;  %vm2054_vm15 = vcmp.lt.s32.totalorder %v5304_v13, 0  ;;  %v2210_v31 = vmul.u32 %v4757_v47, %v2194_v19  ;;  %v2265_v11 = vand.u32 8388607, %v5205_v52 }
 0x216   :  { %v2273_v63 = vsub.s32 32, %v2272_v28  ;;  %v1942_v40 = vxor.u32 2147483648, %v2873_v48  ;;  %v1945_v43 = vxor.u32 2147483648, %v4775_v49  ;;  %v2127_v27 = vor.u32 %v2126_v44, %v2125_v2 }
 0x217   :  { %v2130_v62 = vshll.u32 %v2129_v59, 23  ;;  %vm2212_vm0 = vc.u32 %v4797_v57, %v4782_v26  ;;  %v2275_v51 = vshll.u32 %v5225_v35, %v2272_v28  ;;  %v2278_v47 = vshll.u32 %v5226_v10, %v2272_v28 }
 0x218   :  { %v2276_v0 = vshrl.u32 %v5226_v10, %v2273_v63  ;;  %v5316_v45 = vand.u32 2147483647, %v5304_v13  ;;  %v2134_v30 = vcvt.s32.f32 %v2127_v27  ;;  %v2214_v12 = vsel %vm2212_vm0, %v2213_v37, %v4783_v8 }
 0x219   :  { %v2131_v21 = vor.u32 4788187, %v2130_v62  ;;  %v2279_v3 = vshrl.u32 %v5227_v29, %v2273_v63  ;;  %v2215_v19 = vadd.s32 %v2214_v12, %v2210_v31  ;;  %v4825_v41 = vshrl.u32 %v2270_v54, 5 }
 0x21a   :  { %vm4819_vm2 = vcmp.le.f32.partialorder %v5316_v45, 0.7853982  ;;  %v2284_v17 = vshll.u32 %v5228_v56, %v2272_v28  ;;  %v2285_v2 = vshrl.u32 %v5249_v7, %v2273_v63  ;;  %vm1940_vm3 = vcmp.lt.s32.totalorder %v4728_v9, 2  ;;  %v2875_v59 = vpop.eup %2874 }
 0x21b   :  { %vm2044_vm13 = vcmp.eq.s32.totalorder %v4803_v39, 0  ;;  %vm2047_vm4 = vcmp.eq.s32.totalorder %v4803_v39, 2  ;;  %v2132_v33 = vand.u32 2147483647, %v2131_v21  ;;  %v2266_v4 = vor.u32 8388608, %v2265_v11  ;;  %v2877_v62 = vpop.eup %2876 }
 0x21c   :  { %v2281_v44 = vshll.u32 %v5227_v29, %v2272_v28  ;;  %v2282_v8 = vshrl.u32 %v5228_v56, %v2273_v63  ;;  %v1946_v54 = vsel %vm1944_vm8, %v1945_v43, %v2873_v48  ;;  %v2216_v37 = vadd.s32 536870912, %v2215_v19 }
 0x21d   :  { %v2287_v31 = vshll.u32 %v5249_v7, %v2272_v28  ;;  %v2288_v27 = vshrl.u32 %v5250_v23, %v2273_v63  ;;  %v1943_v45 = vsel %vm1941_vm6, %v4775_v49, %v1942_v40  ;;  %v2135_v21 = vmul.f32 %v2134_v30, %v2132_v33 }
 0x21e   :  { %v2277_v11 = vor.u32 %v2276_v0, %v2275_v51  ;;  %v2280_v12 = vor.u32 %v2279_v3, %v2278_v47  ;;  %vm2043_vm5 = vcmp.lt.s32.totalorder %v4803_v39, 2  ;;  %v2138_v52 = vsub.s32 4, %v4740_v53 }
 0x21f   :  { %vm2157_vm9 = vcmp.lt.s32.totalorder %v5310_v15, 0  ;;  %v2217_v48 = vshrl.u32 %v2216_v37, 30  ;;  %v2286_v43 = vor.u32 %v2285_v2, %v2284_v17  ;;  %vm2290_vm10 = vcmp.lt.s32.totalorder %v4825_v41, 1 }
 0x220   :  { %vm1938_vm7 = vweird.f32 %v5297_v34  ;;  %v2136_v28 = vxor.u32 2147483648, %v2135_v21  ;;  %v2274_v20 = vshrl.u32 %v5225_v35, %v2273_v63  ;;  %v2283_v18 = vor.u32 %v2282_v8, %v2281_v44 }
 0x221   :  { %vm2293_vm1 = vcmp.lt.s32.totalorder %v4825_v41, 4  ;;  %v2218_v49 = vshll.u32 %v2217_v48, 30  ;;  %v2289_v40 = vor.u32 %v2288_v27, %v2287_v31  ;;  %vm2292_vm12 = vcmp.lt.s32.totalorder %v4825_v41, 3 }
 0x222   :  { %v2306_v51 = vshll.u32 %v2266_v4, 8  ;;  %vm2041_vm8 = vweird.f32 %v5303_v55  ;;  %v2137_v0 = vsel %vm2054_vm15, %v2136_v28, %v2135_v21  ;;  %v5319_v47 = vand.u32 2147483647, %v5310_v15 }
 0x223   :  { %vm2291_vm6 = vcmp.lt.s32.totalorder %v4825_v41, 2  ;;  %v2295_v63 = vsel %vm2293_vm1, %v2283_v18, 2102212464  ;;  %v2298_v3 = vsel %vm2290_vm10, %v2277_v11, %v2280_v12  ;;  %v2045_v17 = vxor.u32 2147483648, %v2877_v62 }
 0x224   :  { %vm4854_vm11 = vcmp.le.f32.partialorder %v5319_v47, 0.7853982  ;;  %v2048_v2 = vxor.u32 2147483648, %v2875_v59  ;;  %v4863_v33 = vsub.s32 %v2215_v19, %v2218_v49  ;;  %v2299_v4 = vsel %vm2293_vm1, %v2286_v43, 920167782 }
 0x225   :  { %v2139_v44 = vsel %vm2054_vm15, %v2138_v52, %v4740_v53  ;;  %v2241_v8 = vsub.s32 4, %v2217_v48  ;;  %v2294_v37 = vsel %vm2290_vm10, %v2274_v20, %v2277_v11  ;;  %v2300_v31 = vsel %vm2292_vm12, %v2283_v18, %v2299_v4 }
 0x226   :  { %v2140_v27 = vsel %vm4819_vm2, %v5304_v13, %v2137_v0  ;;  %v2221_v19 = vsub.s32 0, %v4863_v33  ;;  %v2296_v21 = vsel %vm2292_vm12, %v2280_v12, %v2295_v63  ;;  %v2301_v28 = vsel %vm2291_vm6, %v2298_v3, %v2300_v31 }
 0x227   :  { %v2302_v52 = vsel %vm2290_vm10, %v2280_v12, %v2283_v18  ;;  %v2303_v53 = vsel %vm2293_vm1, %v2289_v40, 1326507024  ;;  %v4886_v20 = vmul.u32.u64.low %v2306_v51, %v2301_v28  ;;  %v4887_v11 = vmul.u32.u64.high %v2306_v51, %v2301_v28, %v4886_v20 }
 0x228   :  { %v1947_v49 = vsel %vm1940_vm3, %v1943_v45, %v1946_v54  ;;  %v2046_v0 = vsel %vm2044_vm13, %v2875_v59, %v2045_v17  ;;  %v2049_v47 = vsel %vm2047_vm4, %v2048_v2, %v2877_v62  ;;  %v2686_v63 = vmin.u32 %v2221_v19, %v4863_v33 }
 0x229   :  { %v2141_v18 = vsel %vm4819_vm2, 0, %v2139_v44  ;;  %v2242_v12 = vsel %vm2157_vm9, %v2241_v8, %v2217_v48  ;;  %v2304_v40 = vsel %vm2292_vm12, %v2286_v43, %v2303_v53  ;;  %v2364_v9 = vand.u32 2139095040, %v5315_v61 }
 0x22a   :  { %2878 = vcosq.f32 %v2140_v27  ;;  %v2223_v54 = vclz %v2686_v63  ;;  %v2297_v59 = vsel %vm2291_vm6, %v2294_v37, %v2296_v21  ;;  %v2305_v62 = vsel %vm2291_vm6, %v2302_v52, %v2304_v40 }
 0x22b   :  { %v2050_v60 = vsel %vm2043_vm5, %v2046_v0, %v2049_v47  ;;  %v4909_v45 = vmul.u32.u64.low %v2306_v51, %v2305_v62  ;;  %v4910_v3 = vmul.u32.u64.high %v2306_v51, %v2305_v62, %v4909_v45  ;;  %v2365_v48 = vshrl.u32 %v2364_v9, 23  ;;  %v5323_v0 = vld [vmem:[#allocation27_spill] sm:$0xff] }
 0x22c   :  { %v1948_v43 = vsel %vm1938_vm7, nan, %v1947_v49  ;;  %v2687_v17 = vadd.s32 4294967294, %v2223_v54  ;;  %v2244_v2 = vsel %vm4854_vm11, 0, %v2242_v12  ;;  %v2316_v4 = vadd.s32 1, %v4887_v11 }
 0x22d   :  { %2880 = vsinq.f32 %v2140_v27  ;;  %v2313_v44 = vmul.u32 %v2306_v51, %v2297_v59  ;;  %v2693_v41 = vadd.s32 4294967169, %v2365_v48  ;;  %v5322_v8 = vand.u32 2147483647, %v5315_v61 }
 0x22e   :  { %v4921_v37 = vsel %vm2041_vm8, nan, %v2050_v60  ;;  %v4923_v31 = vand.u32 3, %v2141_v18  ;;  %v2211_v34 = vadd.s32 %v4782_v26, %v4797_v57  ;;  %vm2688_vm14 = vcmp.lt.s32.totalorder %v2687_v17, 0  ;;  %v5324_v18 = vld [vmem:[#allocation28_spill] sm:$0xff] }
 0x22f   :  { %v2368_v39 = vand.u32 8388607, %v5322_v8  ;;  %v2226_v19 = vsel %vm2688_vm14, 0, %v2687_v17  ;;  %v4927_v21 = vand.u32 3, %v2244_v2  ;;  %vm2315_vm15 = vc.u32 %v4910_v3, %v4886_v20  ;;  %v5328_v8 = vld [vmem:[#allocation33_spill] sm:$0xff] }
 0x230   :  { %v2371_v51 = vadd.s32 1, %v2693_v41  ;;  %v2227_v27 = vsub.s32 32, %v2226_v19  ;;  %v2228_v28 = vshll.u32 %v4863_v33, %v2226_v19  ;;  %v2231_v52 = vsub.s32 4294967266, %v2226_v19  ;;  %v5325_v33 = vld [vmem:[#allocation29_spill] sm:$0xff]  ;;  %v5327_v41 = vld [vmem:[#allocation32_spill] sm:$0xff]  ;;  %v5329_v19 = vld [vmem:[#allocation26_spill] sm:$0xff] }
 0x231   :  { %v2317_v55 = vsel %vm2315_vm15, %v2316_v4, %v4887_v11  ;;  %v2369_v49 = vor.u32 8388608, %v2368_v39  ;;  %v4934_v47 = vmul.f32 %v4166_v38, %v5323_v0  ;;  %v4938_v12 = vmul.f32 %v4171_v22, %v5324_v18  ;;  %v5326_v11 = vld [vmem:[#allocation30_spill] sm:$0xff] }
 0x232   :  { %v2318_v53 = vadd.s32 %v2317_v55, %v2313_v44  ;;  %vm2372_vm0 = vcmp.gt.s32.totalorder %v2371_v51, 0  ;;  %v2229_v26 = vshrl.u32 %v2211_v34, %v2227_v27  ;;  %v2232_v57 = vadd.s32 127, %v2231_v52 }
 0x233   :  { %v2373_v63 = vsel %vm2372_vm0, %v2371_v51, 0  ;;  %v4942_v54 = vmul.f32 %v4176_v14, %v5325_v33  ;;  %v4946_v59 = vmul.f32 %v4295_v24, %v5326_v11  ;;  %v4950_v60 = vmul.f32 %v4363_v1, %v3656_v25 }
 0x234   :  { %v2319_v40 = vadd.s32 536870912, %v2318_v53  ;;  %v2375_v9 = vand.u32 31, %v2373_v63  ;;  %v2230_v62 = vor.u32 %v2229_v26, %v2228_v28  ;;  %v2233_v38 = vshll.u32 %v2232_v57, 23 }
 0x235   :  { %v4954_v22 = vmul.f32 %v4515_v16, %v3663_v42  ;;  %v4958_v17 = vshll.u32 %v2369_v49, 8  ;;  %v4962_v14 = vmul.f32 %v4614_v5, %v3669_v46  ;;  %v4965_v4 = vadd.s32 %v4886_v20, %v4910_v3 }
 0x236   :  { %v4956_v45 = vshrl.u32 %v2319_v40, 30  ;;  %v2376_v48 = vsub.s32 32, %v2375_v9  ;;  %v2234_v24 = vor.u32 4788187, %v2233_v38  ;;  %v2237_v2 = vcvt.s32.f32 %v2230_v62 }
 0x237   :  { %v4969_v25 = vmul.f32 %v4618_v50, %v3675_v36  ;;  %v4971_v42 = vpop.eup %2878  ;;  %v2378_v16 = vshll.u32 %v5225_v35, %v2375_v9  ;;  %v2381_v44 = vshll.u32 %v5226_v10, %v2375_v9  ;;  %v4978_v46 = vmul.f32 %v4697_v6, %v5327_v41 }
 0x238   :  { %v2321_v1 = vshll.u32 %v4956_v45, 30  ;;  %v2235_v5 = vand.u32 2147483647, %v2234_v24  ;;  %v2379_v20 = vshrl.u32 %v5226_v10, %v2376_v48  ;;  %v2382_v3 = vshrl.u32 %v5227_v29, %v2376_v48 }
 0x239   :  { %v4984_v36 = vmul.f32 %v4793_v32, %v5328_v8  ;;  %v2384_v39 = vshll.u32 %v5227_v29, %v2375_v9  ;;  %v2385_v34 = vshrl.u32 %v5228_v56, %v2376_v48  ;;  %v4991_v51 = vmul.f32 %v1948_v43, %v5329_v19 }
 0x23a   :  { %v4986_v50 = vsub.s32 %v2318_v53, %v2321_v1  ;;  %v2881_v6 = vpop.eup %2880  ;;  %vm2147_vm2 = vcmp.eq.s32.totalorder %v4923_v31, 0  ;;  %vm2150_vm3 = vcmp.eq.s32.totalorder %v4923_v31, 2  ;;  %v2151_v10 = vxor.u32 2147483648, %v4971_v42 }
 0x23b   :  { %v2238_v27 = vmul.f32 %v2237_v2, %v2235_v5  ;;  %v2374_v28 = vshrl.u32 %v2373_v63, 5  ;;  %v2377_v32 = vshrl.u32 %v5225_v35, %v2376_v48  ;;  %v2380_v55 = vor.u32 %v2379_v20, %v2378_v16  ;;  %v5330_v63 = vld [vmem:[#allocation34_spill] sm:$0xff] }
 0x23c   :  { %v2324_v52 = vsub.s32 0, %v4986_v50  ;;  %v2383_v29 = vor.u32 %v2382_v3, %v2381_v44  ;;  %v2387_v53 = vshll.u32 %v5228_v56, %v2375_v9  ;;  %v2388_v43 = vshrl.u32 %v5249_v7, %v2376_v48 }
 0x23d   :  { %v2239_v49 = vxor.u32 2147483648, %v2238_v27  ;;  %v2390_v0 = vshll.u32 %v5249_v7, %v2375_v9  ;;  %v2391_v26 = vshrl.u32 %v5250_v23, %v2376_v48  ;;  %v2148_v57 = vxor.u32 2147483648, %v2881_v6 }
 0x23e   :  { %v2690_v18 = vmin.u32 %v2324_v52, %v4986_v50  ;;  %v2386_v40 = vor.u32 %v2385_v34, %v2384_v39  ;;  %v5005_v35 = vmul.f32 %v4921_v37, %v5330_v63  ;;  %v2389_v11 = vor.u32 %v2388_v43, %v2387_v53 }
 0x23f   :  { %v2240_v33 = vsel %vm2157_vm9, %v2239_v49, %v2238_v27  ;;  %v2392_v56 = vor.u32 %v2391_v26, %v2390_v0  ;;  %vm2393_vm13 = vcmp.lt.s32.totalorder %v2374_v28, 1  ;;  %vm2146_vm4 = vcmp.lt.s32.totalorder %v4923_v31, 2 }
 0x240   :  { %v2243_v7 = vsel %vm4854_vm11, %v5310_v15, %v2240_v33  ;;  %v2326_v23 = vclz %v2690_v18  ;;  %vm2394_vm5 = vcmp.lt.s32.totalorder %v2374_v28, 2  ;;  %vm2395_vm10 = vcmp.lt.s32.totalorder %v2374_v28, 3 }
 0x241   :  { %2882 = vcosq.f32 %v2243_v7  ;;  %vm2396_vm7 = vcmp.lt.s32.totalorder %v2374_v28, 4  ;;  %v2397_v37 = vsel %vm2393_vm13, %v2377_v32, %v2380_v55  ;;  %v2401_v9 = vsel %vm2393_vm13, %v2380_v55, %v2383_v29  ;;  %v5331_v32 = vld [vmem:[#allocation25_spill] sm:$0xff] }
 0x242   :  { %2884 = vsinq.f32 %v2243_v7  ;;  %v2691_v62 = vadd.s32 4294967294, %v2326_v23  ;;  %v2398_v38 = vsel %vm2396_vm7, %v2386_v40, 2102212464  ;;  %v2402_v48 = vsel %vm2396_vm7, %v2389_v11, 920167782 }
 0x243   :  { %vm2144_vm9 = vweird.f32 %v5304_v13  ;;  %v2399_v24 = vsel %vm2395_vm10, %v2383_v29, %v2398_v38  ;;  %v2403_v30 = vsel %vm2395_vm10, %v2386_v40, %v2402_v48  ;;  %v2405_v2 = vsel %vm2393_vm13, %v2383_v29, %v2386_v40 }
 0x244   :  { %v2406_v1 = vsel %vm2396_vm7, %v2392_v56, 1326507024  ;;  %vm2692_vm1 = vcmp.lt.s32.totalorder %v2691_v62, 0  ;;  %v2400_v16 = vsel %vm2394_vm5, %v2397_v37, %v2399_v24  ;;  %v2404_v44 = vsel %vm2394_vm5, %v2401_v9, %v2403_v30  ;;  %v5332_v24 = vld [vmem:[#allocation36_spill] sm:$0xff] }
 0x245   :  { %v2407_v41 = vsel %vm2395_vm10, %v2389_v11, %v2406_v1  ;;  %v2329_v5 = vsel %vm2692_vm1, 0, %v2691_v62  ;;  %v5024_v3 = vmul.u32.u64.low %v4958_v17, %v2404_v44  ;;  %v5025_v8 = vmul.u32.u64.high %v4958_v17, %v2404_v44, %v5024_v3 }
 0x246   :  { %v2408_v20 = vsel %vm2394_vm5, %v2405_v2, %v2407_v41  ;;  %v2149_v39 = vsel %vm2147_vm2, %v4971_v42, %v2148_v57  ;;  %v2152_v34 = vsel %vm2150_vm3, %v2151_v10, %v2881_v6  ;;  %v2330_v19 = vsub.s32 32, %v2329_v5 }
 0x247   :  { %v2334_v27 = vsub.s32 4294967266, %v2329_v5  ;;  %vm783_vm12 = vcmp.eq.f32.partialorder %v5331_v32, 0.0  ;;  %vm2250_vm8 = vcmp.eq.s32.totalorder %v4927_v21, 0  ;;  %v2331_v28 = vshll.u32 %v4986_v50, %v2329_v5 }
 0x248   :  { %v5037_v52 = vmul.u32.u64.low %v4958_v17, %v2408_v20  ;;  %v5038_v55 = vmul.u32.u64.high %v4958_v17, %v2408_v20, %v5037_v52  ;;  %v2416_v29 = vmul.u32 %v4958_v17, %v2400_v16  ;;  %v2332_v53 = vshrl.u32 %v4965_v4, %v2330_v19  ;;  %v5334_v16 = vld [vmem:[#allocation35_spill] sm:$0xff] }
 0x249   :  { %v2335_v42 = vadd.s32 127, %v2334_v27  ;;  %v2480_v49 = vadd.f32 1.0, %v4934_v47  ;;  %v2481_v6 = vadd.f32 1.0, %v4938_v12  ;;  %vm2247_vm11 = vweird.f32 %v5310_v15 }
 0x24a   :  { %v2419_v10 = vadd.s32 1, %v5025_v8  ;;  %v2482_v43 = vadd.f32 1.0, %v4942_v54  ;;  %v2483_v50 = vadd.f32 1.0, %v4946_v59  ;;  %v2484_v0 = vadd.f32 1.0, %v4950_v60 }
 0x24b   :  { %v2336_v26 = vshll.u32 %v2335_v42, 23  ;;  %v2485_v17 = vadd.f32 1.0, %v4954_v22  ;;  %v2486_v4 = vadd.f32 1.0, %v4962_v14  ;;  %v2487_v57 = vadd.f32 1.0, %v4969_v25 }
 0x24c   :  { %v2153_v47 = vsel %vm2146_vm4, %v2149_v39, %v2152_v34  ;;  %vm2418_vm6 = vc.u32 %v5038_v55, %v5024_v3  ;;  %v2488_v12 = vadd.f32 1.0, %v4978_v46  ;;  %v2489_v54 = vadd.f32 1.0, %v4984_v36  ;;  %v5335_v39 = vld [vmem:[#allocation10_spill] sm:$0xff] }
 0x24d   :  { %vm2253_vm14 = vcmp.eq.s32.totalorder %v4927_v21, 2  ;;  %v2333_v59 = vor.u32 %v2332_v53, %v2331_v28  ;;  %v2420_v60 = vsel %vm2418_vm6, %v2419_v10, %v5025_v8  ;;  %v2490_v22 = vadd.f32 1.0, %v4991_v51 }
 0x24e   :  { %v2337_v14 = vor.u32 4788187, %v2336_v26  ;;  %v2421_v18 = vadd.s32 %v2420_v60, %v2416_v29  ;;  %v2491_v25 = vadd.f32 1.0, %v5005_v35  ;;  %v2514_v31 = vcombine.low %v2480_v49, %v2481_v6  ;;  %v2883_v40 = vpop.eup %2882 }
 0x24f   :  { %v2154_v63 = vsel %vm2144_vm9, nan, %v2153_v47  ;;  %v2515_v33 = vcombine.low %v2482_v43, %v2483_v50  ;;  %v2516_v46 = vcombine.low %v2484_v0, %v2485_v17  ;;  %v2517_v11 = vcombine.low %v2486_v4, %v2487_v57  ;;  %v2885_v36 = vpop.eup %2884 }
 0x250   :  { %v2254_v56 = vxor.u32 2147483648, %v2883_v40  ;;  %v2422_v7 = vadd.s32 536870912, %v2421_v18  ;;  %v2563_v23 = vcombine.low %v2488_v12, %v2489_v54  ;;  %vm2249_vm15 = vcmp.lt.s32.totalorder %v4927_v21, 2 }
 0x251   :  { %v2251_v37 = vxor.u32 2147483648, %v2885_v36  ;;  %v2949_v51 = vmov 1966171168   ;;  %v2564_v62 = vcombine.low %v2490_v22, %v2491_v25  ;;  %v2338_v38 = vand.u32 2147483647, %v2337_v14  ;;  %v2496_v22 = vld [vmem:[#allocation4] sm:$0xff] }
 0x252   :  { %v2519_v9 = vunpack.c.l.s4 %v2949_v51  ;;  %v2255_v35 = vsel %vm2253_vm14, %v2254_v56, %v2885_v36  ;;  %v2340_v48 = vcvt.s32.f32 %v2333_v59  ;;  %v5067_v13 = vshrl.u32 %v2422_v7, 30  ;;  %v5340_v56 = vld [vmem:[#allocation24_spill] sm:$0xff] }
 0x253   :  { %v5333_v30 = vand.u32 2147483648, %v5331_v32  ;;  %v2252_v1 = vsel %vm2250_vm8, %v2883_v40, %v2251_v37  ;;  %v2476_v44 = vmul.f32 %v2154_v63, %v5334_v16  ;;  %vm2260_vm0 = vcmp.lt.s32.totalorder %v5314_v58, 0 }
 0x254   :  { %v2520_v41 = vunpack.c.0.s8 %v2519_v9  ;;  %v2256_v5 = vsel %vm2249_vm15, %v2252_v1, %v2255_v35  ;;  %v2424_v20 = vshll.u32 %v5067_v13, 30  ;;  %v2341_v19 = vmul.f32 %v2340_v48, %v2338_v38 }
 0x255   :  { %v785_v2 = vsel %vm783_vm12, %v5333_v30, %v5332_v24  ;;  %v2257_v8 = vsel %vm2247_vm11, nan, %v2256_v5  ;;  %v5083_v32 = vadd.f32 1.0, %v2476_v44  ;;  %v5336_v12 = vand.u32 2147483647, %v5314_v58 }
 0x256   :  { %v5081_v34 = vsub.s32 %v2520_v41, %v5335_v39  ;;  %v2425_v27 = vsub.s32 %v2421_v18, %v2424_v20  ;;  %v2477_v28 = vmul.f32 %v2257_v8, %v785_v2  ;;  %v2342_v10 = vxor.u32 2147483648, %v2341_v19  ;;  %v5339_v18 = vld [vmem:[#allocation23_spill] sm:$0xff] }
 0x257   :  { %vm5106_vm2 = vcmp.le.f32.partialorder %v5336_v12, 0.7853982  ;;  %v669_v25 = vmul.f32 0.6931472, %v5339_v18  ;;  %v671_v7 = vmul.f32 0.6931472, %v5340_v56  ;;  %vm2350_vm12 = vweird.f32 %v5314_v58 }
 0x258   :  { %v2524_v21 = vrot.slane %v2514_v31, %v5081_v34  ;;  %v2531_v52 = vrot.slane %v2515_v33, %v5081_v34  ;;  %v2427_v29 = vsub.s32 0, %v2425_v27  ;;  %v5087_v53 = vadd.f32 1.0, %v2477_v28 }
 0x259   :  { %v2538_v42 = vrot.slane %v2516_v46, %v5081_v34  ;;  %v2545_v15 = vrot.slane %v2517_v11, %v5081_v34  ;;  %v5092_v6 = vrot.slane %v2563_v23, %v5081_v34  ;;  %v5099_v17 = vrot.slane %v2564_v62, %v5081_v34 }
 0x25a   :  { %v2546_v49 = vcombine.low %v2524_v21, %v2531_v52  ;;  %v2694_v43 = vmin.u32 %v2427_v29, %v2425_v27  ;;  %v2565_v26 = vcombine.low %v5083_v32, %v5087_v53  ;;  %v2343_v59 = vsel %vm2260_vm0, %v2342_v10, %v2341_v19 }
 0x25b   :  { %v2547_v50 = vcombine.low %v2538_v42, %v2545_v15  ;;  %v2595_v47 = vcombine.low %v5092_v6, %v5099_v17  ;;  %v2417_v31 = vadd.s32 %v5024_v3, %v5038_v55  ;;  %v2346_v40 = vsel %vm5106_vm2, %v5314_v58, %v2343_v59 }
 0x25c   :  { %v2554_v0 = vrot.slane %v2546_v49, %v5081_v34  ;;  %v2429_v4 = vclz %v2694_v43  ;;  %v686_v23 = vmul.f32 -2.0, %v669_v25  ;;  %2886 = vcosq.f32 %v2346_v40 }
 0x25d   :  { %v2561_v57 = vrot.slane %v2547_v50, %v5081_v34  ;;  %2888 = vsinq.f32 %v2346_v40  ;;  %v687_v55 = vmul.f32 -2.0, %v671_v7  ;;  %v2344_v62 = vsub.s32 4, %v4956_v45 }
 0x25e   :  { %v2695_v60 = vadd.s32 4294967294, %v2429_v4  ;;  %2890 = vrsqrt.f32 %v686_v23  ;;  %vm2363_vm13 = vcmp.lt.s32.totalorder %v5315_v61, 0  ;;  %v5341_v2 = vand.u32 2147483647, %v5315_v61 }
 0x25f   :  { %v2562_v14 = vcombine.low %v2554_v0, %v2561_v57  ;;  %2892 = vrsqrt.f32 %v687_v55  ;;  %v2345_v24 = vsel %vm2260_vm0, %v2344_v62, %v4956_v45  ;;  %v2447_v20 = vsub.s32 4, %v5067_v13 }
 0x260   :  { %vm2696_vm3 = vcmp.lt.s32.totalorder %v2695_v60, 0  ;;  %vm5126_vm4 = vcmp.le.f32.partialorder %v5341_v2, 0.7853982  ;;  %v2347_v44 = vsel %vm5106_vm2, 0, %v2345_v24  ;;  %vm788_vm7 = vcmp.eq.f32.partialorder %v686_v23, inf }
 0x261   :  { %v2432_v63 = vsel %vm2696_vm3, 0, %v2695_v60  ;;  %v2614_v33 = vmul.f32 %v2562_v14, %v2496_v22  ;;  %v2351_v39 = vand.u32 3, %v2347_v44  ;;  %v2448_v21 = vsel %vm2363_vm13, %v2447_v20, %v5067_v13 }
 0x262   :  { %v2433_v46 = vsub.s32 32, %v2432_v63  ;;  %v2434_v11 = vshll.u32 %v2425_v27, %v2432_v63  ;;  %v2437_v36 = vsub.s32 4294967266, %v2432_v63  ;;  %v2450_v29 = vsel %vm5126_vm4, 0, %v2448_v21 }
 0x263   :  { %2616 = vst [vmem:[#allocation7] sm:$0xff] %v2614_v33  ;;  %vm2353_vm5 = vcmp.eq.s32.totalorder %v2351_v39, 0  ;;  %vm2356_vm10 = vcmp.eq.s32.totalorder %v2351_v39, 2  ;;  %vm2352_vm9 = vcmp.lt.s32.totalorder %v2351_v39, 2  ;;  %vm790_vm1 = vcmp.eq.f32.partialorder %v686_v23, 0.0 }
 0x264   :  { %v2435_v37 = vshrl.u32 %v2417_v31, %v2433_v46  ;;  %v2438_v51 = vadd.s32 127, %v2437_v36  ;;  %v791_v10 = vand.u32 2147483648, %v686_v23  ;;  %v2454_v43 = vand.u32 3, %v2450_v29 }
 0x265   :  { %vm795_vm8 = vcmp.eq.f32.partialorder %v687_v55, inf  ;;  %v798_v12 = vand.u32 2147483648, %v687_v55  ;;  %vm797_vm6 = vcmp.eq.f32.partialorder %v687_v55, 0.0  ;;  %vm2453_vm0 = vweird.f32 %v5315_v61 }
 0x266   :  { %v2436_v9 = vor.u32 %v2435_v37, %v2434_v11  ;;  %v2439_v3 = vshll.u32 %v2438_v51, 23  ;;  %vm2459_vm11 = vcmp.eq.s32.totalorder %v2454_v43, 2  ;;  %vm2456_vm14 = vcmp.eq.s32.totalorder %v2454_v43, 0  ;;  %v2497_v51 = vld [vmem:[#allocation4 + $0x8] sm:$0xff] }
 0x267   :  { %vm2455_vm15 = vcmp.lt.s32.totalorder %v2454_v43, 2  ;;  %v2587_v56 = vrot.slane %v2565_v26, %v5081_v34 }
 0x268   :  { %v2440_v35 = vor.u32 4788187, %v2439_v3  ;;  %v2443_v38 = vcvt.s32.f32 %v2436_v9 }
 0x269   :  { %v2887_v5 = vpop.eup %2886 }
 0x26a   :  { %v2441_v48 = vand.u32 2147483647, %v2440_v35  ;;  %v2889_v8 = vpop.eup %2888  ;;  %v2357_v28 = vxor.u32 2147483648, %v2887_v5 }
 0x26b   :  { %v2891_v19 = vpop.eup %2890  ;;  %v2354_v27 = vxor.u32 2147483648, %v2889_v8 }
 0x26c   :  { %v2444_v30 = vmul.f32 %v2443_v38, %v2441_v48  ;;  %v787_v52 = vmul.f32 %v2891_v19, %v686_v23  ;;  %v2893_v42 = vpop.eup %2892  ;;  %v2358_v49 = vsel %vm2356_vm10, %v2357_v28, %v2889_v8 }
 0x26d   :  { %v2355_v15 = vsel %vm2353_vm5, %v2887_v5, %v2354_v27  ;;  %v794_v0 = vmul.f32 %v2893_v42, %v687_v55 }
 0x26e   :  { %v2445_v16 = vxor.u32 2147483648, %v2444_v30  ;;  %v789_v50 = vsel %vm788_vm7, %v686_v23, %v787_v52  ;;  %v2359_v4 = vsel %vm2352_vm9, %v2355_v15, %v2358_v49 }
 0x26f   :  { %v792_v57 = vsel %vm790_vm1, %v791_v10, %v789_v50  ;;  %v2360_v54 = vsel %vm2350_vm12, nan, %v2359_v4  ;;  %v796_v60 = vsel %vm795_vm8, %v687_v55, %v794_v0 }
 0x270   :  { %v2446_v41 = vsel %vm2363_vm13, %v2445_v16, %v2444_v30  ;;  %v2478_v25 = vmul.f32 %v2360_v54, %v792_v57  ;;  %v799_v31 = vsel %vm797_vm6, %v798_v12, %v796_v60 }
 0x271   :  { %v2449_v45 = vsel %vm5126_vm4, %v5315_v61, %v2446_v41  ;;  %v2603_v61 = vrot.slane %v2595_v47, %v5081_v34 }
 0x272   :  { %2894 = vcosq.f32 %v2449_v45  ;;  %v2494_v46 = vadd.f32 1.0, %v2478_v25 }
 0x273   :  { %2896 = vsinq.f32 %v2449_v45 }
 0x27f   :  { %v2895_v13 = vpop.eup %2894 }
 0x280   :  { %v2897_v59 = vpop.eup %2896  ;;  %v2460_v22 = vxor.u32 2147483648, %v2895_v13 }
 0x281   :  { %v2457_v14 = vxor.u32 2147483648, %v2897_v59 }
 0x282   :  { %v2461_v18 = vsel %vm2459_vm11, %v2460_v22, %v2897_v59 }
 0x283   :  { %v2458_v58 = vsel %vm2456_vm14, %v2895_v13, %v2457_v14 }
 0x284   :  { %v2462_v40 = vsel %vm2455_vm15, %v2458_v58, %v2461_v18 }
 0x285   :  { %v2463_v63 = vsel %vm2453_vm0, nan, %v2462_v40 }
 0x286   :  { %v2479_v33 = vmul.f32 %v2463_v63, %v799_v31 }
 0x288   :  { %v2495_v11 = vadd.f32 1.0, %v2479_v33 }
 0x28a   :  { %v2566_v36 = vcombine.low %v2494_v46, %v2495_v11 }
 0x28c   :  { %v2594_v7 = vrot.slane %v2566_v36, %v5081_v34 }
 0x28e   :  { %v2596_v23 = vcombine.low %v2587_v56, %v2594_v7 }
 0x290   :  { %v2610_v37 = vrot.slane %v2596_v23, %v5081_v34 }
 0x292   :  { %v2611_v9 = vcombine.low %v2603_v61, %v2610_v37 }
 0x294   :  { %v2615_v3 = vmul.f32 %v2611_v9, %v2497_v51 }
 0x296   :  { %2617 = vst [vmem:[#allocation7 + $0x8] sm:$0xff] %v2615_v3 }
 0x297   :  { %2929 = shalt.err (!%p2926_p9)
}
 0x298   :  { %2627 = dma.vmem_to_hbm [thread:$0]  %s2625_s1, 256, %s5156_s2, [#allocation6]  }
 0x299   :  { %2940 = dma.done.wait [#allocation6], 256  }
 0x29a   :  { %2941 = vsyncadd [#allocation6], 4294967040 }
 0x29b   :  { %2631 = vsyncpa [#allocation5], 1 }
 0x29c   :  { %2632 = vsyncpa [#allocation6], 1 }

</bundles_post_ra>
